<compile_context>
chip_gen: v6e
topology: v6e:2x2x1
jax: 0.10.0
libtpu: 0.0.40
codegen_flags: <defaults>
</compile_context>

<pallas_src>
import functools
import numpy as np
import jax
import jax.numpy as jnp
from jax.experimental import pallas as pl
from jax.experimental.pallas import tpu as pltpu

# ----------------------------- config (small shapes) ------------------------
B = 2                       # batch
C = 32                      # transformer_dim
FEAT = (2, 2, 2)            # feat_shape (h, w, d) of image embeddings
NUM_MULTIMASK = 3
T = NUM_MULTIMASK + 1       # num_mask_tokens
N_SPARSE = 2                # number of sparse prompt tokens
C4, C16 = C // 4, C // 16
NUM_OUT_TOKENS = 1          # forward() returns masks[:, 0:1]; set to T for multimask


# ----------------------------- in-kernel math helpers -----------------------
def _gelu(x):
    # TODO(synk): PyTorch nn.GELU() defaults to the exact erf GELU; the tanh
    # approximation is used here for guaranteed Mosaic lowering.
    c = 0.7978845608028654  # sqrt(2/pi)
    return 0.5 * x * (1.0 + jnp.tanh(c * (x + 0.044715 * x * x * x)))


def _softmax(x):
    m = jnp.max(x, axis=-1, keepdims=True)
    e = jnp.exp(x - m)
    return e / jnp.sum(e, axis=-1, keepdims=True)


# ============================================================================
# Fused kernel: prompt (attention stub + MLPs) -> upscaling -> masks
# ============================================================================
def _decoder_kernel(tok_ref, src_ref, pos_ref, txt_ref,
                    wqt_ref, wkt_ref, wvt_ref, wqi_ref, wki_ref, wvi_ref,
                    hw1_ref, hb1_ref, hw2_ref, hb2_ref, hw3_ref, hb3_ref,
                    tw1_ref, tb1_ref, tg_ref, tbeta_ref, tw2_ref, tb2_ref,
                    c1w_ref, c1b_ref, g1_ref, b1_ref,
                    k1_ref, kwd2_ref, w2c_ref, b2e_ref, g2_ref, beta2_ref,
                    o_ref, tokout_ref,
                    *, scale, num_out, n_h1, n_wd1):
    f32 = jnp.float32
    nt = (((1,), (1,)), ((), ()))          # contract last dims: A @ B.T

    # ---------------- two-way attention stub ---------------------------------
    # TODO(synk): single-head stub of the externally-injected TwoWayTransformer.
    t = tok_ref[0]                                              # [Nt, C]
    s = src_ref[0]                                              # [Ni, C]
    sp = s + pos_ref[0]

    q = jnp.dot(t, wqt_ref[...], preferred_element_type=f32)
    k = jnp.dot(sp, wkt_ref[...], preferred_element_type=f32)
    v = jnp.dot(s, wvt_ref[...], preferred_element_type=f32)
    a = _softmax(jax.lax.dot_general(q, k, nt, preferred_element_type=f32) * scale)
    hs = t + jnp.dot(a, v, preferred_element_type=f32)          # [Nt, C]

    q2 = jnp.dot(sp, wqi_ref[...], preferred_element_type=f32)
    k2 = jnp.dot(hs, wki_ref[...], preferred_element_type=f32)
    v2 = jnp.dot(hs, wvi_ref[...], preferred_element_type=f32)
    a2 = _softmax(jax.lax.dot_general(q2, k2, nt, preferred_element_type=f32) * scale)
    so = s + jnp.dot(a2, v2, preferred_element_type=f32)        # [Ni, C]

    tokout_ref[0] = hs[:num_out, :]                             # sam token(s) out

    # ---------------- txt_align MLP: Linear -> LN(1e-5) -> GELU -> Linear ----
    tx = txt_ref[0]                                             # [1, C]
    t1 = jnp.dot(tx, tw1_ref[...], preferred_element_type=f32) + tb1_ref[...]
    mu = jnp.mean(t1, axis=-1, keepdims=True)
    var = jnp.mean((t1 - mu) ** 2, axis=-1, keepdims=True)
    t1 = (t1 - mu) * jax.lax.rsqrt(var + 1e-5) * tg_ref[...] + tbeta_ref[...]
    t1 = _gelu(t1)
    td = jnp.dot(t1, tw2_ref[...], preferred_element_type=f32) + tb2_ref[...]

    # ---------------- hypernetwork MLP(s) for the returned token(s) ----------
    # Text similarity folded in: (hyper + txt_down) @ F == hyper@F + txt_down@F.
    # num_out == 1 in the public forward, so no batching needed here.
    hyp_rows = []
    for i in range(num_out):
        x = hs[i:i + 1, :]
        y = jnp.maximum(jnp.dot(x, hw1_ref[i], preferred_element_type=f32)
                        + hb1_ref[i], 0.0)
        y = jnp.maximum(jnp.dot(y, hw2_ref[i], preferred_element_type=f32)
                        + hb2_ref[i], 0.0)
        y = jnp.dot(y, hw3_ref[i], preferred_element_type=f32) + hb3_ref[i]
        hyp_rows.append(y + td)                                 # [1, C16]

    # ---------------- stage 1: conv1 (commuted) + full-3D up1 + LN1 + GELU ---
    # A[c4, vox] = conv1_w @ so^T via an NT dot_general (no explicit transpose).
    A = jax.lax.dot_general(c1w_ref[...], so, nt,
                            preferred_element_type=f32) + c1b_ref[...]   # [C4, hwd]
    u1 = jnp.dot(A, k1_ref[...], preferred_element_type=f32)            # [C4, H1*WD1]
    mu1 = jnp.mean(u1, axis=0, keepdims=True)
    var1 = jnp.mean((u1 - mu1) ** 2, axis=0, keepdims=True)
    u1 = (u1 - mu1) * jax.lax.rsqrt(var1 + 1e-6) * g1_ref[...] + b1_ref[...]
    u1 = _gelu(u1)

    # ---------------- h -> sublanes restack (tiny, 8-sublane-aligned) --------
    # ustack[(HH, c4), wd1] = u1[c4, HH*WD1 + wd1]     -> [H1*C4, WD1]
    ustack = jnp.concatenate(
        [u1[:, hh * n_wd1:(hh + 1) * n_wd1] for hh in range(n_h1)], axis=0)

    # ---------------- stage 2: (conv2 ∘ up2) + LN2 + GELU, slab-wise ---------
    # W2comb = (h-blend ⊗ channel-deinterleave ⊗ conv2) precomputed [C16*H2, H1*C4];
    # reassociated so the wide matmul is one (64,64)@(64,1024).
    pre = jnp.dot(w2c_ref[...], ustack, preferred_element_type=f32)      # [C16*H2, WD1]
    zb = jnp.dot(pre, kwd2_ref[...], preferred_element_type=f32) + b2e_ref[...]  # [C16*H2, WD2]

    c16 = g2_ref.shape[0]
    n_h2 = zb.shape[0] // c16
    zc = [zb[c * n_h2:(c + 1) * n_h2, :] for c in range(c16)]            # [H2, WD2] slabs
    mu2 = sum(zc) * (1.0 / c16)
    dc = [z - mu2 for z in zc]
    var2 = sum(d * d for d in dc) * (1.0 / c16)
    inv = jax.lax.rsqrt(var2 + 1e-6)
    zn = [_gelu(d * inv * g2_ref[c:c + 1, :] + beta2_ref[c:c + 1, :])
          for c, d in enumerate(dc)]

    # ---------------- masks: dense (H2, WD2) lane-dense stores ---------------
    for i in range(num_out):
        hr = hyp_rows[i]                                                 # [1, C16]
        acc = hr[0:1, 0:1] * zn[0]
        for c in range(1, c16):
            acc = acc + hr[0:1, c:c + 1] * zn[c]
        o_ref[0, i] = acc


# ----------------------------- trilinear interpolation matrices -------------
def interp_matrix_np(n_in, n_out):
    """PyTorch-style linear interpolation (align_corners=False) as a matrix."""
    o = np.arange(n_out, dtype=np.float64)
    src = np.maximum((o + 0.5) * (n_in / n_out) - 0.5, 0.0)
    i0 = np.minimum(np.floor(src).astype(np.int64), n_in - 1)
    i1 = np.minimum(i0 + 1, n_in - 1)
    w1 = src - i0
    W = np.zeros((n_out, n_in), dtype=np.float32)
    W[np.arange(n_out), i0] += (1.0 - w1)
    W[np.arange(n_out), i1] += w1
    return W


def build_consts(p, feat):
    """Precompute interpolation / layout constants once (outside the hot path)."""
    h, w, d = feat
    H1, H2 = 4 * h, 16 * h
    wh1 = interp_matrix_np(h, 4 * h)
    ww1 = interp_matrix_np(w, 4 * w)
    wd1 = interp_matrix_np(d, 4 * d)
    wh2 = interp_matrix_np(4 * h, 16 * h)
    ww2 = interp_matrix_np(4 * w, 16 * w)
    wd2 = interp_matrix_np(4 * d, 16 * d)
    # stage-1 full 3D Kronecker (tiny: [hwd, 64*hwd]); stage-2 stays factored
    # (the full Wh2⊗Ww2⊗Wd2 in f32 would be 64 MiB and not fit v7x VMEM x2).
    k1 = np.kron(wh1, np.kron(ww1, wd1)).T.astype(np.float32)        # [hwd, H1*WD1]
    kwd2 = np.kron(ww2, wd2).T.astype(np.float32)                    # [WD1, WD2]
    # W2comb[(c*H2 + HO), (HH*C4 + c4)] = wh2[HO, HH] * conv2_w[c, c4]
    w2comb = jnp.einsum('oh,cf->cohf', jnp.asarray(wh2),
                        p["conv2_wT"]).reshape(C16 * H2, H1 * C4)
    b2e = jnp.repeat(p["conv2_b"], H2, axis=0)                       # [C16*H2, 1]
    return {"k1": jnp.asarray(k1), "kwd2": jnp.asarray(kwd2),
            "w2comb": w2comb, "b2e": b2e}


# ----------------------------- full forward ---------------------------------
def mask_decoder_forward(p, consts, image_embeddings, text_embedding, image_pe,
                         sparse_prompt_embeddings, dense_prompt_embeddings):
    Bq, Cc, h, w, d = image_embeddings.shape
    Ni = h * w * d
    H1, H2 = 4 * h, 16 * h
    WD1, WD2 = 16 * w * d, 256 * w * d
    num_out = NUM_OUT_TOKENS

    # tokens = cat(mask_tokens, sparse prompts)   (tiny XLA glue)
    out_tok = jnp.broadcast_to(p["mask_tokens"][None], (Bq, T, Cc))
    tokens = jnp.concatenate([out_tok, sparse_prompt_embeddings], axis=1)
    Nt = tokens.shape[1]

    # src = image + dense prompts, flattened to [B, Ni, C]   (tiny XLA glue)
    src_flat = jnp.swapaxes(
        (image_embeddings + dense_prompt_embeddings).reshape(Bq, Cc, Ni), 1, 2)
    pos_flat = jnp.swapaxes(image_pe.reshape(1, Cc, Ni), 1, 2)
    text3 = text_embedding.reshape(Bq, 1, Cc)

    kern = functools.partial(_decoder_kernel, scale=1.0 / float(np.sqrt(Cc)),
                             num_out=num_out, n_h1=H1, n_wd1=WD1)
    c2 = lambda s: pl.BlockSpec(s, lambda b: (0, 0))
    c3 = lambda s: pl.BlockSpec(s, lambda b: (0, 0, 0))

    masks4, tok_out = pl.pallas_call(
        kern,
        out_shape=(jax.ShapeDtypeStruct((Bq, num_out, H2, WD2), jnp.float32),
                   jax.ShapeDtypeStruct((Bq, num_out, Cc), jnp.float32)),
        grid=(Bq,),
        in_specs=[
            pl.BlockSpec((1, Nt, Cc), lambda b: (b, 0, 0)),     # tokens
            pl.BlockSpec((1, Ni, Cc), lambda b: (b, 0, 0)),     # src
            pl.BlockSpec((1, Ni, Cc), lambda b: (0, 0, 0)),     # pos (shared)
            pl.BlockSpec((1, 1, Cc), lambda b: (b, 0, 0)),      # text
            c2((Cc, Cc)), c2((Cc, Cc)), c2((Cc, Cc)),           # attn weights
            c2((Cc, Cc)), c2((Cc, Cc)), c2((Cc, Cc)),
            c3((num_out, Cc, C4)), c3((num_out, 1, C4)),        # hypernet (token 0..)
            c3((num_out, C4, C4)), c3((num_out, 1, C4)),
            c3((num_out, C4, C16)), c3((num_out, 1, C16)),
            c2((Cc, C4)), c2((1, C4)), c2((1, C4)), c2((1, C4)),  # txt MLP
            c2((C4, C16)), c2((1, C16)),
            c2((C4, Cc)), c2((C4, 1)), c2((C4, 1)), c2((C4, 1)),  # conv1 / LN1
            c2((Ni, H1 * WD1)), c2((WD1, WD2)),                   # K1, kwd2
            c2((C16 * H2, H1 * C4)), c2((C16 * H2, 1)),           # W2comb, b2e
            c2((C16, 1)), c2((C16, 1)),                           # LN2 gamma/beta
        ],
        out_specs=(pl.BlockSpec((1, num_out, H2, WD2), lambda b: (b, 0, 0, 0)),
                   pl.BlockSpec((1, num_out, Cc), lambda b: (b, 0, 0))),
        compiler_params=pltpu.CompilerParams(dimension_semantics=("parallel",)),
    )(tokens, src_flat, pos_flat, text3,
      p["wq_t"], p["wk_t"], p["wv_t"], p["wq_i"], p["wk_i"], p["wv_i"],
      p["hyp_w1"], p["hyp_b1"], p["hyp_w2"], p["hyp_b2"], p["hyp_w3"], p["hyp_b3"],
      p["txt_w1"], p["txt_b1"], p["txt_g"], p["txt_beta"], p["txt_w2"], p["txt_b2"],
      p["conv1_wT"], p["conv1_b"], p["ln1_g"], p["ln1_b"],
      consts["k1"], consts["kwd2"], consts["w2comb"], consts["b2e"],
      p["ln2_g"], p["ln2_b"])

    masks = masks4.reshape(Bq, num_out, H2, 16 * w, 16 * d)
    return masks, tok_out


# ----------------------------- deterministic params -------------------------
def init_params(key):
    keys = jax.random.split(key, 32)
    it = iter(range(32))

    def nrm(shape, s=0.05):
        return jax.random.normal(keys[next(it)], shape, jnp.float32) * s

    p = {}
    p["mask_tokens"] = nrm((T, C), 0.1)
    for name in ["wq_t", "wk_t", "wv_t", "wq_i", "wk_i", "wv_i"]:
        p[name] = nrm((C, C))
    # conv weights stored pre-transposed: y[cout, vox] = Wt @ x[cin, vox] + b
    p["conv1_wT"] = nrm((C4, C), 0.1)
    p["conv1_b"] = nrm((C4, 1), 0.01)
    p["ln1_g"] = jnp.ones((C4, 1), jnp.float32)
    p["ln1_b"] = jnp.zeros((C4, 1), jnp.float32)
    p["conv2_wT"] = nrm((C16, C4), 0.1)
    p["conv2_b"] = nrm((C16, 1), 0.01)
    p["ln2_g"] = jnp.ones((C16, 1), jnp.float32)
    p["ln2_b"] = jnp.zeros((C16, 1), jnp.float32)
    p["hyp_w1"] = nrm((T, C, C4), 0.1)
    p["hyp_b1"] = nrm((T, 1, C4), 0.01)
    p["hyp_w2"] = nrm((T, C4, C4), 0.1)
    p["hyp_b2"] = nrm((T, 1, C4), 0.01)
    p["hyp_w3"] = nrm((T, C4, C16), 0.1)
    p["hyp_b3"] = nrm((T, 1, C16), 0.01)
    p["txt_w1"] = nrm((C, C4), 0.1)
    p["txt_b1"] = nrm((1, C4), 0.01)
    p["txt_g"] = jnp.ones((1, C4), jnp.float32)
    p["txt_beta"] = jnp.zeros((1, C4), jnp.float32)
    p["txt_w2"] = nrm((C4, C16), 0.1)
    p["txt_b2"] = nrm((1, C16), 0.01)
    return p


# ----------------------------- main ------------------------------------------
if __name__ == "__main__":
    key = jax.random.PRNGKey(0)
    pkey, k1, k2, k3, k4, k5 = jax.random.split(key, 6)
    params = init_params(pkey)
    consts = build_consts(params, FEAT)          # one-time derived constants

    h, w, d = FEAT
    image_embeddings = jax.random.normal(k1, (B, C, h, w, d), jnp.float32)
    text_embedding = jax.random.normal(k2, (B, C), jnp.float32)
    image_pe = jax.random.normal(k3, (1, C, h, w, d), jnp.float32)
    sparse_prompt_embeddings = jax.random.normal(k4, (B, N_SPARSE, C), jnp.float32)
    dense_prompt_embeddings = jax.random.normal(k5, (B, C, h, w, d), jnp.float32)

    masks, sam_tokens_out = mask_decoder_forward(
        params, consts, image_embeddings, text_embedding, image_pe,
        sparse_prompt_embeddings, dense_prompt_embeddings)
    jax.block_until_ready((masks, sam_tokens_out))

    assert masks.shape == (B, 1, 16 * h, 16 * w, 16 * d)
    assert sam_tokens_out.shape == (B, 1, C)
    print("KERNEL_OK")
</pallas_src>

<mosaic_0001>
module attributes {stable_mosaic.version = 11 : i64} {
  func.func @_decoder_kernel(%arg0: i32, %arg1: memref<1x6x32xf32, #tpu.memory_space<vmem>>, %arg2: memref<1x8x32xf32, #tpu.memory_space<vmem>>, %arg3: memref<1x8x32xf32, #tpu.memory_space<vmem>>, %arg4: memref<1x1x32xf32, #tpu.memory_space<vmem>>, %arg5: memref<32x32xf32, #tpu.memory_space<vmem>>, %arg6: memref<32x32xf32, #tpu.memory_space<vmem>>, %arg7: memref<32x32xf32, #tpu.memory_space<vmem>>, %arg8: memref<32x32xf32, #tpu.memory_space<vmem>>, %arg9: memref<32x32xf32, #tpu.memory_space<vmem>>, %arg10: memref<32x32xf32, #tpu.memory_space<vmem>>, %arg11: memref<1x32x8xf32, #tpu.memory_space<vmem>>, %arg12: memref<1x1x8xf32, #tpu.memory_space<vmem>>, %arg13: memref<1x8x8xf32, #tpu.memory_space<vmem>>, %arg14: memref<1x1x8xf32, #tpu.memory_space<vmem>>, %arg15: memref<1x8x2xf32, #tpu.memory_space<vmem>>, %arg16: memref<1x1x2xf32, #tpu.memory_space<vmem>>, %arg17: memref<32x8xf32, #tpu.memory_space<vmem>>, %arg18: memref<1x8xf32, #tpu.memory_space<vmem>>, %arg19: memref<1x8xf32, #tpu.memory_space<vmem>>, %arg20: memref<1x8xf32, #tpu.memory_space<vmem>>, %arg21: memref<8x2xf32, #tpu.memory_space<vmem>>, %arg22: memref<1x2xf32, #tpu.memory_space<vmem>>, %arg23: memref<8x32xf32, #tpu.memory_space<vmem>>, %arg24: memref<8x1xf32, #tpu.memory_space<vmem>>, %arg25: memref<8x1xf32, #tpu.memory_space<vmem>>, %arg26: memref<8x1xf32, #tpu.memory_space<vmem>>, %arg27: memref<8x512xf32, #tpu.memory_space<vmem>>, %arg28: memref<64x1024xf32, #tpu.memory_space<vmem>>, %arg29: memref<64x64xf32, #tpu.memory_space<vmem>>, %arg30: memref<64x1xf32, #tpu.memory_space<vmem>>, %arg31: memref<2x1xf32, #tpu.memory_space<vmem>>, %arg32: memref<2x1xf32, #tpu.memory_space<vmem>>, %arg33: memref<1x1x32x1024xf32, #tpu.memory_space<vmem>>, %arg34: memref<1x1x32xf32, #tpu.memory_space<vmem>>) attributes {dimension_semantics = [#tpu.dimension_semantics<parallel>], iteration_bounds = array<i64: 2>, scalar_prefetch = 0 : i64, scratch_operands = 0 : i64, tpu.core_type = #tpu.core_type<tc>, window_params = [{transform_indices = @transform_0, window_bounds = array<i64: 1, 6, 32>}, {transform_indices = @transform_1, window_bounds = array<i64: 1, 8, 32>}, {pipeline_mode = #tpu.pipeline_mode<synchronous>, transform_indices = @transform_2, window_bounds = array<i64: 1, 8, 32>}, {transform_indices = @transform_3, window_bounds = array<i64: 1, 1, 32>}, {pipeline_mode = #tpu.pipeline_mode<synchronous>, transform_indices = @transform_4, window_bounds = array<i64: 32, 32>}, {pipeline_mode = #tpu.pipeline_mode<synchronous>, transform_indices = @transform_5, window_bounds = array<i64: 32, 32>}, {pipeline_mode = #tpu.pipeline_mode<synchronous>, transform_indices = @transform_6, window_bounds = array<i64: 32, 32>}, {pipeline_mode = #tpu.pipeline_mode<synchronous>, transform_indices = @transform_7, window_bounds = array<i64: 32, 32>}, {pipeline_mode = #tpu.pipeline_mode<synchronous>, transform_indices = @transform_8, window_bounds = array<i64: 32, 32>}, {pipeline_mode = #tpu.pipeline_mode<synchronous>, transform_indices = @transform_9, window_bounds = array<i64: 32, 32>}, {transform_indices = @transform_10, window_bounds = array<i64: 1, 32, 8>}, {transform_indices = @transform_11, window_bounds = array<i64: 1, 1, 8>}, {transform_indices = @transform_12, window_bounds = array<i64: 1, 8, 8>}, {transform_indices = @transform_13, window_bounds = array<i64: 1, 1, 8>}, {transform_indices = @transform_14, window_bounds = array<i64: 1, 8, 2>}, {transform_indices = @transform_15, window_bounds = array<i64: 1, 1, 2>}, {pipeline_mode = #tpu.pipeline_mode<synchronous>, transform_indices = @transform_16, window_bounds = array<i64: 32, 8>}, {pipeline_mode = #tpu.pipeline_mode<synchronous>, transform_indices = @transform_17, window_bounds = array<i64: 1, 8>}, {pipeline_mode = #tpu.pipeline_mode<synchronous>, transform_indices = @transform_18, window_bounds = array<i64: 1, 8>}, {pipeline_mode = #tpu.pipeline_mode<synchronous>, transform_indices = @transform_19, window_bounds = array<i64: 1, 8>}, {pipeline_mode = #tpu.pipeline_mode<synchronous>, transform_indices = @transform_20, window_bounds = array<i64: 8, 2>}, {pipeline_mode = #tpu.pipeline_mode<synchronous>, transform_indices = @transform_21, window_bounds = array<i64: 1, 2>}, {pipeline_mode = #tpu.pipeline_mode<synchronous>, transform_indices = @transform_22, window_bounds = array<i64: 8, 32>}, {pipeline_mode = #tpu.pipeline_mode<synchronous>, transform_indices = @transform_23, window_bounds = array<i64: 8, 1>}, {pipeline_mode = #tpu.pipeline_mode<synchronous>, transform_indices = @transform_24, window_bounds = array<i64: 8, 1>}, {pipeline_mode = #tpu.pipeline_mode<synchronous>, transform_indices = @transform_25, window_bounds = array<i64: 8, 1>}, {pipeline_mode = #tpu.pipeline_mode<synchronous>, transform_indices = @transform_26, window_bounds = array<i64: 8, 512>}, {pipeline_mode = #tpu.pipeline_mode<synchronous>, transform_indices = @transform_27, window_bounds = array<i64: 64, 1024>}, {pipeline_mode = #tpu.pipeline_mode<synchronous>, transform_indices = @transform_28, window_bounds = array<i64: 64, 64>}, {pipeline_mode = #tpu.pipeline_mode<synchronous>, transform_indices = @transform_29, window_bounds = array<i64: 64, 1>}, {pipeline_mode = #tpu.pipeline_mode<synchronous>, transform_indices = @transform_30, window_bounds = array<i64: 2, 1>}, {pipeline_mode = #tpu.pipeline_mode<synchronous>, transform_indices = @transform_31, window_bounds = array<i64: 2, 1>}, {transform_indices = @transform_32, window_bounds = array<i64: 1, 1, 32, 1024>}, {transform_indices = @transform_33, window_bounds = array<i64: 1, 1, 32>}]} {
    %c0 = arith.constant 0 : index
    %c0_0 = arith.constant 0 : index
    %c0_1 = arith.constant 0 : index
    %0 = vector.load %arg1[%c0, %c0_0, %c0_1] : memref<1x6x32xf32, #tpu.memory_space<vmem>>, vector<1x6x32xf32>
    %1 = vector.shape_cast %0 : vector<1x6x32xf32> to vector<6x32xf32>
    %c0_2 = arith.constant 0 : index
    %c0_3 = arith.constant 0 : index
    %c0_4 = arith.constant 0 : index
    %2 = vector.load %arg2[%c0_2, %c0_3, %c0_4] : memref<1x8x32xf32, #tpu.memory_space<vmem>>, vector<1x8x32xf32>
    %3 = vector.shape_cast %2 : vector<1x8x32xf32> to vector<8x32xf32>
    %c0_5 = arith.constant 0 : index
    %c0_6 = arith.constant 0 : index
    %c0_7 = arith.constant 0 : index
    %4 = vector.load %arg3[%c0_5, %c0_6, %c0_7] : memref<1x8x32xf32, #tpu.memory_space<vmem>>, vector<1x8x32xf32>
    %5 = vector.shape_cast %4 : vector<1x8x32xf32> to vector<8x32xf32>
    %6 = arith.addf %3, %5 : vector<8x32xf32>
    %c0_8 = arith.constant 0 : index
    %c0_9 = arith.constant 0 : index
    %7 = vector.load %arg5[%c0_8, %c0_9] : memref<32x32xf32, #tpu.memory_space<vmem>>, vector<32x32xf32>
    %cst = arith.constant dense<0.000000e+00> : vector<6x32xf32>
    %8 = tpu.matmul %1, %7, %cst {dimension_numbers = #tpu.dot_dimension_numbers<[1], [0], [0], [1], [0, 0, 1, 1], [], []>} : vector<6x32xf32>, vector<32x32xf32>, vector<6x32xf32> -> vector<6x32xf32>
    %c0_10 = arith.constant 0 : index
    %c0_11 = arith.constant 0 : index
    %9 = vector.load %arg6[%c0_10, %c0_11] : memref<32x32xf32, #tpu.memory_space<vmem>>, vector<32x32xf32>
    %cst_12 = arith.constant dense<0.000000e+00> : vector<8x32xf32>
    %10 = tpu.matmul %6, %9, %cst_12 {dimension_numbers = #tpu.dot_dimension_numbers<[1], [0], [0], [1], [0, 0, 1, 1], [], []>} : vector<8x32xf32>, vector<32x32xf32>, vector<8x32xf32> -> vector<8x32xf32>
    %c0_13 = arith.constant 0 : index
    %c0_14 = arith.constant 0 : index
    %11 = vector.load %arg7[%c0_13, %c0_14] : memref<32x32xf32, #tpu.memory_space<vmem>>, vector<32x32xf32>
    %cst_15 = arith.constant dense<0.000000e+00> : vector<8x32xf32>
    %12 = tpu.matmul %3, %11, %cst_15 {dimension_numbers = #tpu.dot_dimension_numbers<[1], [0], [0], [1], [0, 0, 1, 1], [], []>} : vector<8x32xf32>, vector<32x32xf32>, vector<8x32xf32> -> vector<8x32xf32>
    %cst_16 = arith.constant dense<0.000000e+00> : vector<6x8xf32>
    %13 = tpu.matmul %8, %10, %cst_16 {dimension_numbers = #tpu.dot_dimension_numbers<[1], [1], [0], [0], [0, 0, 1, 0], [], []>} : vector<6x32xf32>, vector<8x32xf32>, vector<6x8xf32> -> vector<6x8xf32>
    %cst_17 = arith.constant 0.176776692 : f32
    %14 = vector.broadcast %cst_17 : f32 to vector<6x8xf32>
    %15 = arith.mulf %13, %14 : vector<6x8xf32>
    %cst_18 = arith.constant dense<0xFF800000> : vector<6xf32>
    %16 = vector.multi_reduction <maximumf>, %15, %cst_18 [1] : vector<6x8xf32> to vector<6xf32>
    %17 = vector.shape_cast %16 : vector<6xf32> to vector<6x1xf32>
    %18 = vector.broadcast %17 : vector<6x1xf32> to vector<6x8xf32>
    %19 = arith.subf %15, %18 : vector<6x8xf32>
    %20 = math.exp %19 : vector<6x8xf32>
    %cst_19 = arith.constant dense<0.000000e+00> : vector<6xf32>
    %21 = vector.multi_reduction <add>, %20, %cst_19 [1] : vector<6x8xf32> to vector<6xf32>
    %22 = vector.shape_cast %21 : vector<6xf32> to vector<6x1xf32>
    %23 = vector.broadcast %22 : vector<6x1xf32> to vector<6x8xf32>
    %24 = arith.divf %20, %23 : vector<6x8xf32>
    %cst_20 = arith.constant dense<0.000000e+00> : vector<6x32xf32>
    %25 = tpu.matmul %24, %12, %cst_20 {dimension_numbers = #tpu.dot_dimension_numbers<[1], [0], [0], [1], [0, 0, 1, 1], [], []>} : vector<6x8xf32>, vector<8x32xf32>, vector<6x32xf32> -> vector<6x32xf32>
    %26 = arith.addf %1, %25 : vector<6x32xf32>
    %c0_21 = arith.constant 0 : index
    %c0_22 = arith.constant 0 : index
    %27 = vector.load %arg8[%c0_21, %c0_22] : memref<32x32xf32, #tpu.memory_space<vmem>>, vector<32x32xf32>
    %cst_23 = arith.constant dense<0.000000e+00> : vector<8x32xf32>
    %28 = tpu.matmul %6, %27, %cst_23 {dimension_numbers = #tpu.dot_dimension_numbers<[1], [0], [0], [1], [0, 0, 1, 1], [], []>} : vector<8x32xf32>, vector<32x32xf32>, vector<8x32xf32> -> vector<8x32xf32>
    %c0_24 = arith.constant 0 : index
    %c0_25 = arith.constant 0 : index
    %29 = vector.load %arg9[%c0_24, %c0_25] : memref<32x32xf32, #tpu.memory_space<vmem>>, vector<32x32xf32>
    %cst_26 = arith.constant dense<0.000000e+00> : vector<6x32xf32>
    %30 = tpu.matmul %26, %29, %cst_26 {dimension_numbers = #tpu.dot_dimension_numbers<[1], [0], [0], [1], [0, 0, 1, 1], [], []>} : vector<6x32xf32>, vector<32x32xf32>, vector<6x32xf32> -> vector<6x32xf32>
    %c0_27 = arith.constant 0 : index
    %c0_28 = arith.constant 0 : index
    %31 = vector.load %arg10[%c0_27, %c0_28] : memref<32x32xf32, #tpu.memory_space<vmem>>, vector<32x32xf32>
    %cst_29 = arith.constant dense<0.000000e+00> : vector<6x32xf32>
    %32 = tpu.matmul %26, %31, %cst_29 {dimension_numbers = #tpu.dot_dimension_numbers<[1], [0], [0], [1], [0, 0, 1, 1], [], []>} : vector<6x32xf32>, vector<32x32xf32>, vector<6x32xf32> -> vector<6x32xf32>
    %cst_30 = arith.constant dense<0.000000e+00> : vector<8x6xf32>
    %33 = tpu.matmul %28, %30, %cst_30 {dimension_numbers = #tpu.dot_dimension_numbers<[1], [1], [0], [0], [0, 0, 1, 0], [], []>} : vector<8x32xf32>, vector<6x32xf32>, vector<8x6xf32> -> vector<8x6xf32>
    %cst_31 = arith.constant 0.176776692 : f32
    %34 = vector.broadcast %cst_31 : f32 to vector<8x6xf32>
    %35 = arith.mulf %33, %34 : vector<8x6xf32>
    %cst_32 = arith.constant dense<0xFF800000> : vector<8xf32>
    %36 = vector.multi_reduction <maximumf>, %35, %cst_32 [1] : vector<8x6xf32> to vector<8xf32>
    %37 = vector.shape_cast %36 : vector<8xf32> to vector<8x1xf32>
    %38 = vector.broadcast %37 : vector<8x1xf32> to vector<8x6xf32>
    %39 = arith.subf %35, %38 : vector<8x6xf32>
    %40 = math.exp %39 : vector<8x6xf32>
    %cst_33 = arith.constant dense<0.000000e+00> : vector<8xf32>
    %41 = vector.multi_reduction <add>, %40, %cst_33 [1] : vector<8x6xf32> to vector<8xf32>
    %42 = vector.shape_cast %41 : vector<8xf32> to vector<8x1xf32>
    %43 = vector.broadcast %42 : vector<8x1xf32> to vector<8x6xf32>
    %44 = arith.divf %40, %43 : vector<8x6xf32>
    %cst_34 = arith.constant dense<0.000000e+00> : vector<8x32xf32>
    %45 = tpu.matmul %44, %32, %cst_34 {dimension_numbers = #tpu.dot_dimension_numbers<[1], [0], [0], [1], [0, 0, 1, 1], [], []>} : vector<8x6xf32>, vector<6x32xf32>, vector<8x32xf32> -> vector<8x32xf32>
    %46 = arith.addf %3, %45 : vector<8x32xf32>
    %47 = vector.extract_strided_slice %26 {offsets = [0, 0], sizes = [1, 32], strides = [1, 1]} : vector<6x32xf32> to vector<1x32xf32>
    %c0_35 = arith.constant 0 : index
    %c0_36 = arith.constant 0 : index
    %c0_37 = arith.constant 0 : index
    %48 = vector.load %arg34[%c0_35, %c0_36, %c0_37] : memref<1x1x32xf32, #tpu.memory_space<vmem>>, vector<1x1x32xf32>
    %49 = vector.shape_cast %48 : vector<1x1x32xf32> to vector<1x32xf32>
    %50 = vector.shape_cast %47 : vector<1x32xf32> to vector<1x1x32xf32>
    tpu.vector_store %arg34[%c0_35, %c0_36, %c0_37], %50 {strides = array<i32>} : memref<1x1x32xf32, #tpu.memory_space<vmem>>, vector<1x1x32xf32>,
    %c0_38 = arith.constant 0 : index
    %c0_39 = arith.constant 0 : index
    %c0_40 = arith.constant 0 : index
    %51 = vector.load %arg4[%c0_38, %c0_39, %c0_40] : memref<1x1x32xf32, #tpu.memory_space<vmem>>, vector<1x1x32xf32>
    %52 = vector.shape_cast %51 : vector<1x1x32xf32> to vector<1x32xf32>
    %c0_41 = arith.constant 0 : index
    %c0_42 = arith.constant 0 : index
    %53 = vector.load %arg17[%c0_41, %c0_42] : memref<32x8xf32, #tpu.memory_space<vmem>>, vector<32x8xf32>
    %cst_43 = arith.constant dense<0.000000e+00> : vector<1x8xf32>
    %54 = tpu.matmul %52, %53, %cst_43 {dimension_numbers = #tpu.dot_dimension_numbers<[1], [0], [0], [1], [0, 0, 1, 1], [], []>} : vector<1x32xf32>, vector<32x8xf32>, vector<1x8xf32> -> vector<1x8xf32>
    %c0_44 = arith.constant 0 : index
    %c0_45 = arith.constant 0 : index
    %55 = vector.load %arg18[%c0_44, %c0_45] : memref<1x8xf32, #tpu.memory_space<vmem>>, vector<1x8xf32>
    %56 = arith.addf %54, %55 : vector<1x8xf32>
    %cst_46 = arith.constant dense<0.000000e+00> : vector<1xf32>
    %57 = vector.multi_reduction <add>, %56, %cst_46 [1] : vector<1x8xf32> to vector<1xf32>
    %58 = vector.shape_cast %57 : vector<1xf32> to vector<1x1xf32>
    %cst_47 = arith.constant 8.000000e+00 : f32
    %59 = vector.broadcast %cst_47 : f32 to vector<1x1xf32>
    %60 = arith.divf %58, %59 : vector<1x1xf32>
    %61 = vector.broadcast %60 : vector<1x1xf32> to vector<1x8xf32>
    %62 = arith.subf %56, %61 : vector<1x8xf32>
    %63 = arith.mulf %62, %62 : vector<1x8xf32>
    %cst_48 = arith.constant dense<0.000000e+00> : vector<1xf32>
    %64 = vector.multi_reduction <add>, %63, %cst_48 [1] : vector<1x8xf32> to vector<1xf32>
    %65 = vector.shape_cast %64 : vector<1xf32> to vector<1x1xf32>
    %cst_49 = arith.constant 8.000000e+00 : f32
    %66 = vector.broadcast %cst_49 : f32 to vector<1x1xf32>
    %67 = arith.divf %65, %66 : vector<1x1xf32>
    %68 = vector.broadcast %60 : vector<1x1xf32> to vector<1x8xf32>
    %69 = arith.subf %56, %68 : vector<1x8xf32>
    %cst_50 = arith.constant 9.99999974E-6 : f32
    %70 = vector.broadcast %cst_50 : f32 to vector<1x1xf32>
    %71 = arith.addf %67, %70 : vector<1x1xf32>
    %72 = math.rsqrt %71 : vector<1x1xf32>
    %73 = vector.broadcast %72 : vector<1x1xf32> to vector<1x8xf32>
    %74 = arith.mulf %69, %73 : vector<1x8xf32>
    %c0_51 = arith.constant 0 : index
    %c0_52 = arith.constant 0 : index
    %75 = vector.load %arg19[%c0_51, %c0_52] : memref<1x8xf32, #tpu.memory_space<vmem>>, vector<1x8xf32>
    %76 = arith.mulf %74, %75 : vector<1x8xf32>
    %c0_53 = arith.constant 0 : index
    %c0_54 = arith.constant 0 : index
    %77 = vector.load %arg20[%c0_53, %c0_54] : memref<1x8xf32, #tpu.memory_space<vmem>>, vector<1x8xf32>
    %78 = arith.addf %76, %77 : vector<1x8xf32>
    %cst_55 = arith.constant 5.000000e-01 : f32
    %79 = vector.broadcast %cst_55 : f32 to vector<1x8xf32>
    %80 = arith.mulf %79, %78 : vector<1x8xf32>
    %cst_56 = arith.constant 4.471500e-02 : f32
    %81 = vector.broadcast %cst_56 : f32 to vector<1x8xf32>
    %82 = arith.mulf %81, %78 : vector<1x8xf32>
    %83 = arith.mulf %82, %78 : vector<1x8xf32>
    %84 = arith.mulf %83, %78 : vector<1x8xf32>
    %85 = arith.addf %78, %84 : vector<1x8xf32>
    %cst_57 = arith.constant 0.797884583 : f32
    %86 = vector.broadcast %cst_57 : f32 to vector<1x8xf32>
    %87 = arith.mulf %86, %85 : vector<1x8xf32>
    %88 = math.tanh %87 : vector<1x8xf32>
    %cst_58 = arith.constant 1.000000e+00 : f32
    %89 = vector.broadcast %cst_58 : f32 to vector<1x8xf32>
    %90 = arith.addf %89, %88 : vector<1x8xf32>
    %91 = arith.mulf %80, %90 : vector<1x8xf32>
    %c0_59 = arith.constant 0 : index
    %c0_60 = arith.constant 0 : index
    %92 = vector.load %arg21[%c0_59, %c0_60] : memref<8x2xf32, #tpu.memory_space<vmem>>, vector<8x2xf32>
    %cst_61 = arith.constant dense<0.000000e+00> : vector<1x2xf32>
    %93 = tpu.matmul %91, %92, %cst_61 {dimension_numbers = #tpu.dot_dimension_numbers<[1], [0], [0], [1], [0, 0, 1, 1], [], []>} : vector<1x8xf32>, vector<8x2xf32>, vector<1x2xf32> -> vector<1x2xf32>
    %c0_62 = arith.constant 0 : index
    %c0_63 = arith.constant 0 : index
    %94 = vector.load %arg22[%c0_62, %c0_63] : memref<1x2xf32, #tpu.memory_space<vmem>>, vector<1x2xf32>
    %95 = arith.addf %93, %94 : vector<1x2xf32>
    %96 = vector.extract_strided_slice %26 {offsets = [0, 0], sizes = [1, 32], strides = [1, 1]} : vector<6x32xf32> to vector<1x32xf32>
    %c0_64 = arith.constant 0 : index
    %c0_65 = arith.constant 0 : index
    %c0_66 = arith.constant 0 : index
    %97 = vector.load %arg11[%c0_64, %c0_65, %c0_66] : memref<1x32x8xf32, #tpu.memory_space<vmem>>, vector<1x32x8xf32>
    %98 = vector.shape_cast %97 : vector<1x32x8xf32> to vector<32x8xf32>
    %cst_67 = arith.constant dense<0.000000e+00> : vector<1x8xf32>
    %99 = tpu.matmul %96, %98, %cst_67 {dimension_numbers = #tpu.dot_dimension_numbers<[1], [0], [0], [1], [0, 0, 1, 1], [], []>} : vector<1x32xf32>, vector<32x8xf32>, vector<1x8xf32> -> vector<1x8xf32>
    %c0_68 = arith.constant 0 : index
    %c0_69 = arith.constant 0 : index
    %c0_70 = arith.constant 0 : index
    %100 = vector.load %arg12[%c0_68, %c0_69, %c0_70] : memref<1x1x8xf32, #tpu.memory_space<vmem>>, vector<1x1x8xf32>
    %101 = vector.shape_cast %100 : vector<1x1x8xf32> to vector<1x8xf32>
    %102 = arith.addf %99, %101 : vector<1x8xf32>
    %cst_71 = arith.constant 0.000000e+00 : f32
    %103 = vector.broadcast %cst_71 : f32 to vector<1x8xf32>
    %104 = arith.maximumf %102, %103 : vector<1x8xf32>
    %c0_72 = arith.constant 0 : index
    %c0_73 = arith.constant 0 : index
    %c0_74 = arith.constant 0 : index
    %105 = vector.load %arg13[%c0_72, %c0_73, %c0_74] : memref<1x8x8xf32, #tpu.memory_space<vmem>>, vector<1x8x8xf32>
    %106 = vector.shape_cast %105 : vector<1x8x8xf32> to vector<8x8xf32>
    %cst_75 = arith.constant dense<0.000000e+00> : vector<1x8xf32>
    %107 = tpu.matmul %104, %106, %cst_75 {dimension_numbers = #tpu.dot_dimension_numbers<[1], [0], [0], [1], [0, 0, 1, 1], [], []>} : vector<1x8xf32>, vector<8x8xf32>, vector<1x8xf32> -> vector<1x8xf32>
    %c0_76 = arith.constant 0 : index
    %c0_77 = arith.constant 0 : index
    %c0_78 = arith.constant 0 : index
    %108 = vector.load %arg14[%c0_76, %c0_77, %c0_78] : memref<1x1x8xf32, #tpu.memory_space<vmem>>, vector<1x1x8xf32>
    %109 = vector.shape_cast %108 : vector<1x1x8xf32> to vector<1x8xf32>
    %110 = arith.addf %107, %109 : vector<1x8xf32>
    %cst_79 = arith.constant 0.000000e+00 : f32
    %111 = vector.broadcast %cst_79 : f32 to vector<1x8xf32>
    %112 = arith.maximumf %110, %111 : vector<1x8xf32>
    %c0_80 = arith.constant 0 : index
    %c0_81 = arith.constant 0 : index
    %c0_82 = arith.constant 0 : index
    %113 = vector.load %arg15[%c0_80, %c0_81, %c0_82] : memref<1x8x2xf32, #tpu.memory_space<vmem>>, vector<1x8x2xf32>
    %114 = vector.shape_cast %113 : vector<1x8x2xf32> to vector<8x2xf32>
    %cst_83 = arith.constant dense<0.000000e+00> : vector<1x2xf32>
    %115 = tpu.matmul %112, %114, %cst_83 {dimension_numbers = #tpu.dot_dimension_numbers<[1], [0], [0], [1], [0, 0, 1, 1], [], []>} : vector<1x8xf32>, vector<8x2xf32>, vector<1x2xf32> -> vector<1x2xf32>
    %c0_84 = arith.constant 0 : index
    %c0_85 = arith.constant 0 : index
    %c0_86 = arith.constant 0 : index
    %116 = vector.load %arg16[%c0_84, %c0_85, %c0_86] : memref<1x1x2xf32, #tpu.memory_space<vmem>>, vector<1x1x2xf32>
    %117 = vector.shape_cast %116 : vector<1x1x2xf32> to vector<1x2xf32>
    %118 = arith.addf %115, %117 : vector<1x2xf32>
    %119 = arith.addf %118, %95 : vector<1x2xf32>
    %c0_87 = arith.constant 0 : index
    %c0_88 = arith.constant 0 : index
    %120 = vector.load %arg23[%c0_87, %c0_88] : memref<8x32xf32, #tpu.memory_space<vmem>>, vector<8x32xf32>
    %cst_89 = arith.constant dense<0.000000e+00> : vector<8x8xf32>
    %121 = tpu.matmul %120, %46, %cst_89 {dimension_numbers = #tpu.dot_dimension_numbers<[1], [1], [0], [0], [0, 0, 1, 0], [], []>} : vector<8x32xf32>, vector<8x32xf32>, vector<8x8xf32> -> vector<8x8xf32>
    %c0_90 = arith.constant 0 : index
    %c0_91 = arith.constant 0 : index
    %122 = vector.load %arg24[%c0_90, %c0_91] : memref<8x1xf32, #tpu.memory_space<vmem>>, vector<8x1xf32>
    %123 = vector.broadcast %122 : vector<8x1xf32> to vector<8x8xf32>
    %124 = arith.addf %121, %123 : vector<8x8xf32>
    %c0_92 = arith.constant 0 : index
    %c0_93 = arith.constant 0 : index
    %125 = vector.load %arg27[%c0_92, %c0_93] : memref<8x512xf32, #tpu.memory_space<vmem>>, vector<8x512xf32>
    %cst_94 = arith.constant dense<0.000000e+00> : vector<8x512xf32>
    %126 = tpu.matmul %124, %125, %cst_94 {dimension_numbers = #tpu.dot_dimension_numbers<[1], [0], [0], [1], [0, 0, 1, 1], [], []>} : vector<8x8xf32>, vector<8x512xf32>, vector<8x512xf32> -> vector<8x512xf32>
    %cst_95 = arith.constant dense<0.000000e+00> : vector<512xf32>
    %127 = vector.multi_reduction <add>, %126, %cst_95 [0] : vector<8x512xf32> to vector<512xf32>
    %128 = vector.shape_cast %127 : vector<512xf32> to vector<1x512xf32>
    %cst_96 = arith.constant 8.000000e+00 : f32
    %129 = vector.broadcast %cst_96 : f32 to vector<1x512xf32>
    %130 = arith.divf %128, %129 : vector<1x512xf32>
    %131 = vector.broadcast %130 : vector<1x512xf32> to vector<8x512xf32>
    %132 = arith.subf %126, %131 : vector<8x512xf32>
    %133 = arith.mulf %132, %132 : vector<8x512xf32>
    %cst_97 = arith.constant dense<0.000000e+00> : vector<512xf32>
    %134 = vector.multi_reduction <add>, %133, %cst_97 [0] : vector<8x512xf32> to vector<512xf32>
    %135 = vector.shape_cast %134 : vector<512xf32> to vector<1x512xf32>
    %cst_98 = arith.constant 8.000000e+00 : f32
    %136 = vector.broadcast %cst_98 : f32 to vector<1x512xf32>
    %137 = arith.divf %135, %136 : vector<1x512xf32>
    %138 = vector.broadcast %130 : vector<1x512xf32> to vector<8x512xf32>
    %139 = arith.subf %126, %138 : vector<8x512xf32>
    %cst_99 = arith.constant 9.99999997E-7 : f32
    %140 = vector.broadcast %cst_99 : f32 to vector<1x512xf32>
    %141 = arith.addf %137, %140 : vector<1x512xf32>
    %142 = math.rsqrt %141 : vector<1x512xf32>
    %143 = vector.broadcast %142 : vector<1x512xf32> to vector<8x512xf32>
    %144 = arith.mulf %139, %143 : vector<8x512xf32>
    %c0_100 = arith.constant 0 : index
    %c0_101 = arith.constant 0 : index
    %145 = vector.load %arg25[%c0_100, %c0_101] : memref<8x1xf32, #tpu.memory_space<vmem>>, vector<8x1xf32>
    %146 = vector.broadcast %145 : vector<8x1xf32> to vector<8x512xf32>
    %147 = arith.mulf %144, %146 : vector<8x512xf32>
    %c0_102 = arith.constant 0 : index
    %c0_103 = arith.constant 0 : index
    %148 = vector.load %arg26[%c0_102, %c0_103] : memref<8x1xf32, #tpu.memory_space<vmem>>, vector<8x1xf32>
    %149 = vector.broadcast %148 : vector<8x1xf32> to vector<8x512xf32>
    %150 = arith.addf %147, %149 : vector<8x512xf32>
    %cst_104 = arith.constant 5.000000e-01 : f32
    %151 = vector.broadcast %cst_104 : f32 to vector<8x512xf32>
    %152 = arith.mulf %151, %150 : vector<8x512xf32>
    %cst_105 = arith.constant 4.471500e-02 : f32
    %153 = vector.broadcast %cst_105 : f32 to vector<8x512xf32>
    %154 = arith.mulf %153, %150 : vector<8x512xf32>
    %155 = arith.mulf %154, %150 : vector<8x512xf32>
    %156 = arith.mulf %155, %150 : vector<8x512xf32>
    %157 = arith.addf %150, %156 : vector<8x512xf32>
    %cst_106 = arith.constant 0.797884583 : f32
    %158 = vector.broadcast %cst_106 : f32 to vector<8x512xf32>
    %159 = arith.mulf %158, %157 : vector<8x512xf32>
    %160 = math.tanh %159 : vector<8x512xf32>
    %cst_107 = arith.constant 1.000000e+00 : f32
    %161 = vector.broadcast %cst_107 : f32 to vector<8x512xf32>
    %162 = arith.addf %161, %160 : vector<8x512xf32>
    %163 = arith.mulf %152, %162 : vector<8x512xf32>
    %164 = vector.extract_strided_slice %163 {offsets = [0, 0], sizes = [8, 64], strides = [1, 1]} : vector<8x512xf32> to vector<8x64xf32>
    %165 = vector.extract_strided_slice %163 {offsets = [0, 64], sizes = [8, 64], strides = [1, 1]} : vector<8x512xf32> to vector<8x64xf32>
    %166 = vector.extract_strided_slice %163 {offsets = [0, 128], sizes = [8, 64], strides = [1, 1]} : vector<8x512xf32> to vector<8x64xf32>
    %167 = vector.extract_strided_slice %163 {offsets = [0, 192], sizes = [8, 64], strides = [1, 1]} : vector<8x512xf32> to vector<8x64xf32>
    %168 = vector.extract_strided_slice %163 {offsets = [0, 256], sizes = [8, 64], strides = [1, 1]} : vector<8x512xf32> to vector<8x64xf32>
    %169 = vector.extract_strided_slice %163 {offsets = [0, 320], sizes = [8, 64], strides = [1, 1]} : vector<8x512xf32> to vector<8x64xf32>
    %170 = vector.extract_strided_slice %163 {offsets = [0, 384], sizes = [8, 64], strides = [1, 1]} : vector<8x512xf32> to vector<8x64xf32>
    %171 = vector.extract_strided_slice %163 {offsets = [0, 448], sizes = [8, 64], strides = [1, 1]} : vector<8x512xf32> to vector<8x64xf32>
    %172 = tpu.concatenate %164, %165, %166, %167, %168, %169, %170, %171 in 0 : vector<8x64xf32>, vector<8x64xf32>, vector<8x64xf32>, vector<8x64xf32>, vector<8x64xf32>, vector<8x64xf32>, vector<8x64xf32>, vector<8x64xf32> -> vector<64x64xf32>
    %c0_108 = arith.constant 0 : index
    %c0_109 = arith.constant 0 : index
    %173 = vector.load %arg29[%c0_108, %c0_109] : memref<64x64xf32, #tpu.memory_space<vmem>>, vector<64x64xf32>
    %cst_110 = arith.constant dense<0.000000e+00> : vector<64x64xf32>
    %174 = tpu.matmul %173, %172, %cst_110 {dimension_numbers = #tpu.dot_dimension_numbers<[1], [0], [0], [1], [0, 0, 1, 1], [], []>} : vector<64x64xf32>, vector<64x64xf32>, vector<64x64xf32> -> vector<64x64xf32>
    %c0_111 = arith.constant 0 : index
    %c0_112 = arith.constant 0 : index
    %175 = vector.load %arg28[%c0_111, %c0_112] : memref<64x1024xf32, #tpu.memory_space<vmem>>, vector<64x1024xf32>
    %cst_113 = arith.constant dense<0.000000e+00> : vector<64x1024xf32>
    %176 = tpu.matmul %174, %175, %cst_113 {dimension_numbers = #tpu.dot_dimension_numbers<[1], [0], [0], [1], [0, 0, 1, 1], [], []>} : vector<64x64xf32>, vector<64x1024xf32>, vector<64x1024xf32> -> vector<64x1024xf32>
    %c0_114 = arith.constant 0 : index
    %c0_115 = arith.constant 0 : index
    %177 = vector.load %arg30[%c0_114, %c0_115] : memref<64x1xf32, #tpu.memory_space<vmem>>, vector<64x1xf32>
    %178 = vector.broadcast %177 : vector<64x1xf32> to vector<64x1024xf32>
    %179 = arith.addf %176, %178 : vector<64x1024xf32>
    %180 = vector.extract_strided_slice %179 {offsets = [0, 0], sizes = [32, 1024], strides = [1, 1]} : vector<64x1024xf32> to vector<32x1024xf32>
    %181 = vector.extract_strided_slice %179 {offsets = [32, 0], sizes = [32, 1024], strides = [1, 1]} : vector<64x1024xf32> to vector<32x1024xf32>
    %cst_116 = arith.constant 0.000000e+00 : f32
    %182 = vector.broadcast %cst_116 : f32 to vector<32x1024xf32>
    %183 = arith.addf %182, %180 : vector<32x1024xf32>
    %184 = arith.addf %183, %181 : vector<32x1024xf32>
    %cst_117 = arith.constant 5.000000e-01 : f32
    %185 = vector.broadcast %cst_117 : f32 to vector<32x1024xf32>
    %186 = arith.mulf %184, %185 : vector<32x1024xf32>
    %187 = arith.subf %180, %186 : vector<32x1024xf32>
    %188 = arith.subf %181, %186 : vector<32x1024xf32>
    %189 = arith.mulf %187, %187 : vector<32x1024xf32>
    %cst_118 = arith.constant 0.000000e+00 : f32
    %190 = vector.broadcast %cst_118 : f32 to vector<32x1024xf32>
    %191 = arith.addf %190, %189 : vector<32x1024xf32>
    %192 = arith.mulf %188, %188 : vector<32x1024xf32>
    %193 = arith.addf %191, %192 : vector<32x1024xf32>
    %cst_119 = arith.constant 5.000000e-01 : f32
    %194 = vector.broadcast %cst_119 : f32 to vector<32x1024xf32>
    %195 = arith.mulf %193, %194 : vector<32x1024xf32>
    %cst_120 = arith.constant 9.99999997E-7 : f32
    %196 = vector.broadcast %cst_120 : f32 to vector<32x1024xf32>
    %197 = arith.addf %195, %196 : vector<32x1024xf32>
    %198 = math.rsqrt %197 : vector<32x1024xf32>
    %199 = arith.mulf %187, %198 : vector<32x1024xf32>
    %c0_121 = arith.constant 0 : index
    %c0_122 = arith.constant 0 : index
    %200 = vector.load %arg31[%c0_121, %c0_122] : memref<2x1xf32, #tpu.memory_space<vmem>>, vector<1x1xf32>
    %201 = vector.broadcast %200 : vector<1x1xf32> to vector<32x1024xf32>
    %202 = arith.mulf %199, %201 : vector<32x1024xf32>
    %c0_123 = arith.constant 0 : index
    %c0_124 = arith.constant 0 : index
    %203 = vector.load %arg32[%c0_123, %c0_124] : memref<2x1xf32, #tpu.memory_space<vmem>>, vector<1x1xf32>
    %204 = vector.broadcast %203 : vector<1x1xf32> to vector<32x1024xf32>
    %205 = arith.addf %202, %204 : vector<32x1024xf32>
    %cst_125 = arith.constant 5.000000e-01 : f32
    %206 = vector.broadcast %cst_125 : f32 to vector<32x1024xf32>
    %207 = arith.mulf %206, %205 : vector<32x1024xf32>
    %cst_126 = arith.constant 4.471500e-02 : f32
    %208 = vector.broadcast %cst_126 : f32 to vector<32x1024xf32>
    %209 = arith.mulf %208, %205 : vector<32x1024xf32>
    %210 = arith.mulf %209, %205 : vector<32x1024xf32>
    %211 = arith.mulf %210, %205 : vector<32x1024xf32>
    %212 = arith.addf %205, %211 : vector<32x1024xf32>
    %cst_127 = arith.constant 0.797884583 : f32
    %213 = vector.broadcast %cst_127 : f32 to vector<32x1024xf32>
    %214 = arith.mulf %213, %212 : vector<32x1024xf32>
    %215 = math.tanh %214 : vector<32x1024xf32>
    %cst_128 = arith.constant 1.000000e+00 : f32
    %216 = vector.broadcast %cst_128 : f32 to vector<32x1024xf32>
    %217 = arith.addf %216, %215 : vector<32x1024xf32>
    %218 = arith.mulf %207, %217 : vector<32x1024xf32>
    %219 = arith.mulf %188, %198 : vector<32x1024xf32>
    %c1 = arith.constant 1 : index
    %c0_129 = arith.constant 0 : index
    %220 = vector.load %arg31[%c1, %c0_129] : memref<2x1xf32, #tpu.memory_space<vmem>>, vector<1x1xf32>
    %221 = vector.broadcast %220 : vector<1x1xf32> to vector<32x1024xf32>
    %222 = arith.mulf %219, %221 : vector<32x1024xf32>
    %c1_130 = arith.constant 1 : index
    %c0_131 = arith.constant 0 : index
    %223 = vector.load %arg32[%c1_130, %c0_131] : memref<2x1xf32, #tpu.memory_space<vmem>>, vector<1x1xf32>
    %224 = vector.broadcast %223 : vector<1x1xf32> to vector<32x1024xf32>
    %225 = arith.addf %222, %224 : vector<32x1024xf32>
    %cst_132 = arith.constant 5.000000e-01 : f32
    %226 = vector.broadcast %cst_132 : f32 to vector<32x1024xf32>
    %227 = arith.mulf %226, %225 : vector<32x1024xf32>
    %cst_133 = arith.constant 4.471500e-02 : f32
    %228 = vector.broadcast %cst_133 : f32 to vector<32x1024xf32>
    %229 = arith.mulf %228, %225 : vector<32x1024xf32>
    %230 = arith.mulf %229, %225 : vector<32x1024xf32>
    %231 = arith.mulf %230, %225 : vector<32x1024xf32>
    %232 = arith.addf %225, %231 : vector<32x1024xf32>
    %cst_134 = arith.constant 0.797884583 : f32
    %233 = vector.broadcast %cst_134 : f32 to vector<32x1024xf32>
    %234 = arith.mulf %233, %232 : vector<32x1024xf32>
    %235 = math.tanh %234 : vector<32x1024xf32>
    %cst_135 = arith.constant 1.000000e+00 : f32
    %236 = vector.broadcast %cst_135 : f32 to vector<32x1024xf32>
    %237 = arith.addf %236, %235 : vector<32x1024xf32>
    %238 = arith.mulf %227, %237 : vector<32x1024xf32>
    %239 = vector.extract_strided_slice %119 {offsets = [0, 0], sizes = [1, 1], strides = [1, 1]} : vector<1x2xf32> to vector<1x1xf32>
    %240 = vector.broadcast %239 : vector<1x1xf32> to vector<32x1024xf32>
    %241 = arith.mulf %240, %218 : vector<32x1024xf32>
    %242 = vector.extract_strided_slice %119 {offsets = [0, 1], sizes = [1, 1], strides = [1, 1]} : vector<1x2xf32> to vector<1x1xf32>
    %243 = vector.broadcast %242 : vector<1x1xf32> to vector<32x1024xf32>
    %244 = arith.mulf %243, %238 : vector<32x1024xf32>
    %245 = arith.addf %241, %244 : vector<32x1024xf32>
    %c0_136 = arith.constant 0 : index
    %c0_137 = arith.constant 0 : index
    %c0_138 = arith.constant 0 : index
    %c0_139 = arith.constant 0 : index
    %246 = vector.load %arg33[%c0_136, %c0_137, %c0_138, %c0_139] : memref<1x1x32x1024xf32, #tpu.memory_space<vmem>>, vector<1x1x32x1024xf32>
    %247 = vector.shape_cast %246 : vector<1x1x32x1024xf32> to vector<32x1024xf32>
    %248 = vector.shape_cast %245 : vector<32x1024xf32> to vector<1x1x32x1024xf32>
    tpu.vector_store %arg33[%c0_136, %c0_137, %c0_138, %c0_139], %248 {strides = array<i32>} : memref<1x1x32x1024xf32, #tpu.memory_space<vmem>>, vector<1x1x32x1024xf32>,
    return
  }
  func.func @transform_0(%arg0: i32) -> (i32, i32, i32) {
    %c0_i32 = arith.constant 0 : i32
    %c0_i32_0 = arith.constant 0 : i32
    %c0_i32_1 = arith.constant 0 : i32
    return %arg0, %c0_i32, %c0_i32_0 : i32, i32, i32
  }
  func.func @transform_1(%arg0: i32) -> (i32, i32, i32) {
    %c0_i32 = arith.constant 0 : i32
    %c0_i32_0 = arith.constant 0 : i32
    %c0_i32_1 = arith.constant 0 : i32
    return %arg0, %c0_i32, %c0_i32_0 : i32, i32, i32
  }
  func.func @transform_2(%arg0: i32) -> (i32, i32, i32) {
    %c0_i32 = arith.constant 0 : i32
    %c0_i32_0 = arith.constant 0 : i32
    %c0_i32_1 = arith.constant 0 : i32
    %c0_i32_2 = arith.constant 0 : i32
    return %c0_i32, %c0_i32_0, %c0_i32_1 : i32, i32, i32
  }
  func.func @transform_3(%arg0: i32) -> (i32, i32, i32) {
    %c0_i32 = arith.constant 0 : i32
    %c0_i32_0 = arith.constant 0 : i32
    %c0_i32_1 = arith.constant 0 : i32
    return %arg0, %c0_i32, %c0_i32_0 : i32, i32, i32
  }
  func.func @transform_4(%arg0: i32) -> (i32, i32) {
    %c0_i32 = arith.constant 0 : i32
    %c0_i32_0 = arith.constant 0 : i32
    %c0_i32_1 = arith.constant 0 : i32
    return %c0_i32, %c0_i32_0 : i32, i32
  }
  func.func @transform_5(%arg0: i32) -> (i32, i32) {
    %c0_i32 = arith.constant 0 : i32
    %c0_i32_0 = arith.constant 0 : i32
    %c0_i32_1 = arith.constant 0 : i32
    return %c0_i32, %c0_i32_0 : i32, i32
  }
  func.func @transform_6(%arg0: i32) -> (i32, i32) {
    %c0_i32 = arith.constant 0 : i32
    %c0_i32_0 = arith.constant 0 : i32
    %c0_i32_1 = arith.constant 0 : i32
    return %c0_i32, %c0_i32_0 : i32, i32
  }
  func.func @transform_7(%arg0: i32) -> (i32, i32) {
    %c0_i32 = arith.constant 0 : i32
    %c0_i32_0 = arith.constant 0 : i32
    %c0_i32_1 = arith.constant 0 : i32
    return %c0_i32, %c0_i32_0 : i32, i32
  }
  func.func @transform_8(%arg0: i32) -> (i32, i32) {
    %c0_i32 = arith.constant 0 : i32
    %c0_i32_0 = arith.constant 0 : i32
    %c0_i32_1 = arith.constant 0 : i32
    return %c0_i32, %c0_i32_0 : i32, i32
  }
  func.func @transform_9(%arg0: i32) -> (i32, i32) {
    %c0_i32 = arith.constant 0 : i32
    %c0_i32_0 = arith.constant 0 : i32
    %c0_i32_1 = arith.constant 0 : i32
    return %c0_i32, %c0_i32_0 : i32, i32
  }
  func.func @transform_10(%arg0: i32) -> (i32, i32, i32) {
    %c0_i32 = arith.constant 0 : i32
    %c0_i32_0 = arith.constant 0 : i32
    %c0_i32_1 = arith.constant 0 : i32
    %c0_i32_2 = arith.constant 0 : i32
    return %c0_i32, %c0_i32_0, %c0_i32_1 : i32, i32, i32
  }
  func.func @transform_11(%arg0: i32) -> (i32, i32, i32) {
    %c0_i32 = arith.constant 0 : i32
    %c0_i32_0 = arith.constant 0 : i32
    %c0_i32_1 = arith.constant 0 : i32
    %c0_i32_2 = arith.constant 0 : i32
    return %c0_i32, %c0_i32_0, %c0_i32_1 : i32, i32, i32
  }
  func.func @transform_12(%arg0: i32) -> (i32, i32, i32) {
    %c0_i32 = arith.constant 0 : i32
    %c0_i32_0 = arith.constant 0 : i32
    %c0_i32_1 = arith.constant 0 : i32
    %c0_i32_2 = arith.constant 0 : i32
    return %c0_i32, %c0_i32_0, %c0_i32_1 : i32, i32, i32
  }
  func.func @transform_13(%arg0: i32) -> (i32, i32, i32) {
    %c0_i32 = arith.constant 0 : i32
    %c0_i32_0 = arith.constant 0 : i32
    %c0_i32_1 = arith.constant 0 : i32
    %c0_i32_2 = arith.constant 0 : i32
    return %c0_i32, %c0_i32_0, %c0_i32_1 : i32, i32, i32
  }
  func.func @transform_14(%arg0: i32) -> (i32, i32, i32) {
    %c0_i32 = arith.constant 0 : i32
    %c0_i32_0 = arith.constant 0 : i32
    %c0_i32_1 = arith.constant 0 : i32
    %c0_i32_2 = arith.constant 0 : i32
    return %c0_i32, %c0_i32_0, %c0_i32_1 : i32, i32, i32
  }
  func.func @transform_15(%arg0: i32) -> (i32, i32, i32) {
    %c0_i32 = arith.constant 0 : i32
    %c0_i32_0 = arith.constant 0 : i32
    %c0_i32_1 = arith.constant 0 : i32
    %c0_i32_2 = arith.constant 0 : i32
    return %c0_i32, %c0_i32_0, %c0_i32_1 : i32, i32, i32
  }
  func.func @transform_16(%arg0: i32) -> (i32, i32) {
    %c0_i32 = arith.constant 0 : i32
    %c0_i32_0 = arith.constant 0 : i32
    %c0_i32_1 = arith.constant 0 : i32
    return %c0_i32, %c0_i32_0 : i32, i32
  }
  func.func @transform_17(%arg0: i32) -> (i32, i32) {
    %c0_i32 = arith.constant 0 : i32
    %c0_i32_0 = arith.constant 0 : i32
    %c0_i32_1 = arith.constant 0 : i32
    return %c0_i32, %c0_i32_0 : i32, i32
  }
  func.func @transform_18(%arg0: i32) -> (i32, i32) {
    %c0_i32 = arith.constant 0 : i32
    %c0_i32_0 = arith.constant 0 : i32
    %c0_i32_1 = arith.constant 0 : i32
    return %c0_i32, %c0_i32_0 : i32, i32
  }
  func.func @transform_19(%arg0: i32) -> (i32, i32) {
    %c0_i32 = arith.constant 0 : i32
    %c0_i32_0 = arith.constant 0 : i32
    %c0_i32_1 = arith.constant 0 : i32
    return %c0_i32, %c0_i32_0 : i32, i32
  }
  func.func @transform_20(%arg0: i32) -> (i32, i32) {
    %c0_i32 = arith.constant 0 : i32
    %c0_i32_0 = arith.constant 0 : i32
    %c0_i32_1 = arith.constant 0 : i32
    return %c0_i32, %c0_i32_0 : i32, i32
  }
  func.func @transform_21(%arg0: i32) -> (i32, i32) {
    %c0_i32 = arith.constant 0 : i32
    %c0_i32_0 = arith.constant 0 : i32
    %c0_i32_1 = arith.constant 0 : i32
    return %c0_i32, %c0_i32_0 : i32, i32
  }
  func.func @transform_22(%arg0: i32) -> (i32, i32) {
    %c0_i32 = arith.constant 0 : i32
    %c0_i32_0 = arith.constant 0 : i32
    %c0_i32_1 = arith.constant 0 : i32
    return %c0_i32, %c0_i32_0 : i32, i32
  }
  func.func @transform_23(%arg0: i32) -> (i32, i32) {
    %c0_i32 = arith.constant 0 : i32
    %c0_i32_0 = arith.constant 0 : i32
    %c0_i32_1 = arith.constant 0 : i32
    return %c0_i32, %c0_i32_0 : i32, i32
  }
  func.func @transform_24(%arg0: i32) -> (i32, i32) {
    %c0_i32 = arith.constant 0 : i32
    %c0_i32_0 = arith.constant 0 : i32
    %c0_i32_1 = arith.constant 0 : i32
    return %c0_i32, %c0_i32_0 : i32, i32
  }
  func.func @transform_25(%arg0: i32) -> (i32, i32) {
    %c0_i32 = arith.constant 0 : i32
    %c0_i32_0 = arith.constant 0 : i32
    %c0_i32_1 = arith.constant 0 : i32
    return %c0_i32, %c0_i32_0 : i32, i32
  }
  func.func @transform_26(%arg0: i32) -> (i32, i32) {
    %c0_i32 = arith.constant 0 : i32
    %c0_i32_0 = arith.constant 0 : i32
    %c0_i32_1 = arith.constant 0 : i32
    return %c0_i32, %c0_i32_0 : i32, i32
  }
  func.func @transform_27(%arg0: i32) -> (i32, i32) {
    %c0_i32 = arith.constant 0 : i32
    %c0_i32_0 = arith.constant 0 : i32
    %c0_i32_1 = arith.constant 0 : i32
    return %c0_i32, %c0_i32_0 : i32, i32
  }
  func.func @transform_28(%arg0: i32) -> (i32, i32) {
    %c0_i32 = arith.constant 0 : i32
    %c0_i32_0 = arith.constant 0 : i32
    %c0_i32_1 = arith.constant 0 : i32
    return %c0_i32, %c0_i32_0 : i32, i32
  }
  func.func @transform_29(%arg0: i32) -> (i32, i32) {
    %c0_i32 = arith.constant 0 : i32
    %c0_i32_0 = arith.constant 0 : i32
    %c0_i32_1 = arith.constant 0 : i32
    return %c0_i32, %c0_i32_0 : i32, i32
  }
  func.func @transform_30(%arg0: i32) -> (i32, i32) {
    %c0_i32 = arith.constant 0 : i32
    %c0_i32_0 = arith.constant 0 : i32
    %c0_i32_1 = arith.constant 0 : i32
    return %c0_i32, %c0_i32_0 : i32, i32
  }
  func.func @transform_31(%arg0: i32) -> (i32, i32) {
    %c0_i32 = arith.constant 0 : i32
    %c0_i32_0 = arith.constant 0 : i32
    %c0_i32_1 = arith.constant 0 : i32
    return %c0_i32, %c0_i32_0 : i32, i32
  }
  func.func @transform_32(%arg0: i32) -> (i32, i32, i32, i32) {
    %c0_i32 = arith.constant 0 : i32
    %c0_i32_0 = arith.constant 0 : i32
    %c0_i32_1 = arith.constant 0 : i32
    %c0_i32_2 = arith.constant 0 : i32
    return %arg0, %c0_i32, %c0_i32_0, %c0_i32_1 : i32, i32, i32, i32
  }
  func.func @transform_33(%arg0: i32) -> (i32, i32, i32) {
    %c0_i32 = arith.constant 0 : i32
    %c0_i32_0 = arith.constant 0 : i32
    %c0_i32_1 = arith.constant 0 : i32
    return %arg0, %c0_i32, %c0_i32_0 : i32, i32, i32
  }
}

</mosaic_0001>

<bundles_post_ra>
// kernel: tpu_custom_call.1
= control target key start
LH: loop header
LB: loop body
LE: loop exit
PB: predicated region body
PF: predicated region fallthrough
CT: control target
= control target key end

     0   :  { %s5888_s6 = smov 1   ;;  %s5889_s10 = smov 2   ;;  %s7849_s0 = inlined_call_operand.smem [shape: u32[34], index: -1, kind: input, shape index: {}] }
   0x1   :  { %s5944_s5 = sld [smem:[%s7849_s0]]   ;;  %s5890_s14 = smov 3  }
   0x2   :  { %s5949_s9 = sld [smem:[%s7849_s0 + %s5888_s6]]   ;;  %s5891_s18 = smov 4  }
   0x3   :  { %s5954_s13 = sld [smem:[%s7849_s0 + %s5889_s10]]   ;;  %s5892_s22 = smov 5  }
   0x4   :  { %s5959_s17 = sld [smem:[%s7849_s0 + %s5890_s14]]   ;;  %s5893_s26 = smov 6  }
   0x5   :  { %s5964_s21 = sld [smem:[%s7849_s0 + %s5891_s18]]   ;;  %s5894_s30 = smov 7  }
   0x6   :  { %s5969_s25 = sld [smem:[%s7849_s0 + %s5892_s22]]   ;;  %s5895_s4 = smov 8  }
   0x7   :  { %7888 = sst [smem:[#allocation20_spill]] %s5944_s5  ;;  %s5896_s10 = smov 9  }
   0x8   :  { %s5974_s29 = sld [smem:[%s7849_s0 + %s5893_s26]]   ;;  %s5897_s15 = smov 10  }
   0x9   :  { %7889 = sst [smem:[#allocation21_spill]] %s5954_s13  ;;  %s5898_s20 = smov 11  }
   0xa   :  { %s5979_s3 = sld [smem:[%s7849_s0 + %s5894_s30]]   ;;  %s5899_s26 = smov 12  }
   0xb   :  { %s5984_s8 = sld [smem:[%s7849_s0 + %s5895_s4]]   ;;  %s5900_s1 = smov 13  }
   0xc   :  { %s5989_s14 = sld [smem:[%s7849_s0 + %s5896_s10]]   ;;  %s5901_s7 = smov 14  }
   0xd   :  { %s5994_s19 = sld [smem:[%s7849_s0 + %s5897_s15]]   ;;  %s5902_s15 = smov 15  }
   0xe   :  { %s5999_s24 = sld [smem:[%s7849_s0 + %s5898_s20]]   ;;  %s5903_s22 = smov 16  }
   0xf   :  { %s6004_s30 = sld [smem:[%s7849_s0 + %s5899_s26]]   ;;  %s5904_s28 = smov 17  }
  0x10   :  { %7890 = sst [smem:[#allocation22_spill]] %s5979_s3 }
  0x11   :  { %7891 = sst [smem:[#allocation23_spill]] %s5984_s8 }
  0x12   :  { %s6009_s6 = sld [smem:[%s7849_s0 + %s5900_s1]]  }
  0x13   :  { %7892 = sst [smem:[#allocation24_spill]] %s5994_s19 }
  0x14   :  { %7893 = sst [smem:[#allocation25_spill]] %s5999_s24 }
  0x15   :  { %7894 = sst [smem:[#allocation26_spill]] %s6004_s30 }
  0x16   :  { %s6014_s12 = sld [smem:[%s7849_s0 + %s5901_s7]]   ;;  %s5905_s7 = smov 18  }
  0x17   :  { %s6019_s20 = sld [smem:[%s7849_s0 + %s5902_s15]]   ;;  %s5906_s15 = smov 19  }
  0x18   :  { %7895 = sst [smem:[#allocation27_spill]] %s6009_s6 }
  0x19   :  { %s6024_s27 = sld [smem:[%s7849_s0 + %s5903_s22]]   ;;  %s5907_s22 = smov 20  }
  0x1a   :  { %s6029_s4 = sld [smem:[%s7849_s0 + %s5904_s28]]   ;;  %s5908_s28 = smov 21  }
  0x1b   :  { %s6044_s30 = sld [smem:[%s7849_s0 + %s5907_s22]]   ;;  %s5911_s22 = smov 24  }
  0x1c   :  { %7896 = sst [smem:[#allocation28_spill]] %s6014_s12 }
  0x1d   :  { %7897 = sst [smem:[#allocation29_spill]] %s6019_s20 }
  0x1e   :  { %s6034_s12 = sld [smem:[%s7849_s0 + %s5905_s7]]   ;;  %s5909_s7 = smov 22  }
  0x1f   :  { %s6039_s20 = sld [smem:[%s7849_s0 + %s5906_s15]]   ;;  %s5910_s15 = smov 23  }
  0x20   :  { %7898 = sst [smem:[#allocation30_spill]] %s6029_s4 }
  0x21   :  { %7901 = sst [smem:[#allocation33_spill]] %s6044_s30 }
  0x22   :  { %s6049_s19 = sld [smem:[%s7849_s0 + %s5908_s28]]   ;;  %s5912_s28 = smov 25  }
  0x23   :  { %s6064_s30 = sld [smem:[%s7849_s0 + %s5911_s22]]   ;;  %s5915_s22 = smov 28  }
  0x24   :  { %7899 = sst [smem:[#allocation31_spill]] %s6034_s12 }
  0x25   :  { %7900 = sst [smem:[#allocation32_spill]] %s6039_s20 }
  0x26   :  { %s6054_s12 = sld [smem:[%s7849_s0 + %s5909_s7]]   ;;  %s5913_s7 = smov 26  }
  0x27   :  { %s6059_s20 = sld [smem:[%s7849_s0 + %s5910_s15]]   ;;  %s5914_s15 = smov 27  }
  0x28   :  { %7902 = sst [smem:[#allocation34_spill]] %s6049_s19 }
  0x29   :  { %7905 = sst [smem:[#allocation37_spill]] %s6064_s30 }
  0x2a   :  { %s6069_s19 = sld [smem:[%s7849_s0 + %s5912_s28]]   ;;  %s5916_s28 = smov 29  }
  0x2b   :  { %s6084_s30 = sld [smem:[%s7849_s0 + %s5915_s22]]   ;;  %s5919_s22 = smov 32  }
  0x2c   :  { %7903 = sst [smem:[#allocation35_spill]] %s6054_s12 }
  0x2d   :  { %7904 = sst [smem:[#allocation36_spill]] %s6059_s20 }
  0x2e   :  { %s6074_s12 = sld [smem:[%s7849_s0 + %s5913_s7]]   ;;  %s5917_s7 = smov 30  }
  0x2f   :  { %s6079_s20 = sld [smem:[%s7849_s0 + %s5914_s15]]   ;;  %s5918_s15 = smov 31  }
  0x30   :  { %7906 = sst [smem:[#allocation38_spill]] %s6069_s19 }
  0x31   :  { %7909 = sst [smem:[#allocation41_spill]] %s6084_s30 }
  0x32   :  { %s6089_s19 = sld [smem:[%s7849_s0 + %s5916_s28]]   ;;  %s5920_s28 = smov 33  }
  0x33   :  { %s6099_s4 = sld [smem:[%s7849_s0 + %s5918_s15]]  }
  0x34   :  { %7907 = sst [smem:[#allocation39_spill]] %s6074_s12 }
  0x35   :  { %7908 = sst [smem:[#allocation40_spill]] %s6079_s20 }
  0x36   :  { %s6094_s12 = sld [smem:[%s7849_s0 + %s5917_s7]]  }
  0x37   :  { %s6104_s30 = sld [smem:[%s7849_s0 + %s5919_s22]]  }
  0x38   :  { %7910 = sst [smem:[#allocation42_spill]] %s6089_s19 }
  0x39   :  { %7911 = sst [smem:[#allocation43_spill]] %s6099_s4 }
  0x3a   :  { %s6109_s19 = sld [smem:[%s7849_s0 + %s5920_s28]]  }
  0x3d   :  { %7912 = sst [smem:[#allocation44_spill]] %s6104_s30 }
  0x40   :  { %7913 = sst [smem:[#allocation45_spill]] %s6109_s19 }
  0x41   :  { %73 = vsyncpa [#allocation3], 0 }
  0x42   :  { %74 = vsyncpa [#allocation6], 0 }
  0x43   :  { %76 = vsyncpa [#allocation6 + $0x1], 0 }
  0x44   :  { %77 = vsyncpa [#allocation9], 0 }
  0x45   :  { %78 = vsyncpa [#allocation4], 0 }
  0x46   :  { %80 = vsyncpa [#allocation4 + $0x1], 0 }
  0x47   :  { %81 = vsyncpa [#allocation13], 0 }
  0x48   :  { %83 = vsyncpa [#allocation13 + $0x1], 0  ;;  %s6111_s7 = smov 0   ;;  %s6113_s10 = smov 0  }
  0x49   :  { %s6115_s11 = smov 0   ;;  %s6117_s15 = smov 0  }
  0x4a LB: > { %s7914_s8 = sld [smem:[#allocation23_spill]]  ;;  %s5921_s0 = smov [#allocation7]   ;;  %s5886_s15 = sphi %s6117_s15, %s7990_s15   ;;  %s5882_s11 = sphi %s6115_s11, %s7989_s11   ;;  %s5878_s10 = sphi %s6113_s10, %s7988_s10   ;;  %s5874_s7 = sphi %s6111_s7, %s7987_s7  }
  0x4b   : > { %s7915_s3 = sld [smem:[#allocation22_spill]]  ;;  %s878_s16 = sshll.u32 %s5921_s0, 4  ;;  %s6137_s16 = int_to_ptr.vmem [resolvable:$true] %s878_s16 }
  0x4c   : > { %s7916_s24 = sld [smem:[#allocation25_spill]]  ;;  %s6132_s18 = sadd.s32 4294967295, %s5886_s15  }
  0x4d   : > { %s7917_s6 = sld [smem:[#allocation27_spill]]  ;;  %p4969_p0 = scmp.ge.s32.totalorder %s5886_s15, 1 }
  0x4e   : > { %p7857_p1 = scmp.eq.s32.totalorder %s6132_s18, 0  ;;  %p833_p2 = scmp.lt.s32.totalorder %s5886_s15, 3 }
  0x4f   : > { %s5922_s23 = smov [#allocation8]   ;;  %s5923_s28 = smov [#allocation2]  }
  0x50   : > { %p6139_p3 = pnand %p4969_p0, %p833_p2  ;;  %s892_s26 = sshll.u32 %s5922_s23, 4  ;;  %s6146_s26 = int_to_ptr.vmem [resolvable:$true] %s892_s26 }
  0x51   : > { %s846_s1 = sshll.u32 %s5923_s28, 4  ;;  %s5924_s0 = smov [#allocation10]   ;;  %s6154_s1 = int_to_ptr.vmem [resolvable:$true] %s846_s1 }
  0x52   : > { %s7918_s22 = scalar_select %p6139_p3, 1, 0 }
  0x53   : > { %p5315_p5 = pneg %p6139_p3  ;;  %s6156_s30 = sshll.u32 %s5924_s0, 4  ;;  %s942_s30 = int_to_ptr.vmem [resolvable:$true] %s6156_s30 }
  0x54   : > { %s5648_s19 = scalar_lea.hbm %s7916_s24, 16  ;;  %s5653_s28 = scalar_lea.hbm %s7916_s24, 64 }
  0x55   : > { %p6150_p6 = pnand %p5315_p5, %p7857_p1  ;;  %p5649_p7 = scmp.ne.s32.totalorder %s7916_s24, %s5648_s19 }
  0x56   : > { %p5654_p11 = scmp.lt.s32.totalorder %s5653_s28, %s5648_s19 }
  0x57   : > { %p6162_p8 = pneg %p6150_p6 }
  0x59   : > { %p5651_p9 = pnand %p6162_p8, %p5649_p7 }
  0x5b   : > { %p5652_p10 = pneg %p5651_p9 }
  0x5d   : > { %p5655_p12 = pnand %p5654_p11, %p5652_p10 }
  0x5f   : > { %5658 = shalt.err (!%p5655_p12)
}
  0x60   : > { %s5659_s0 = scalar_lea.vmem %s6137_s16, 16  ;;  %s5666_s4 = scalar_lea.vmem %s6137_s16, 32 }
  0x61   : > { %p5660_p13 = scmp.ne.s32.totalorder %s6137_s16, %s5659_s0  ;;  %p5667_p5 = scmp.lt.s32.totalorder %s6137_s16, %s6137_s16 }
  0x62   : > { %p5668_p4 = scmp.lt.s32.totalorder %s5666_s4, %s5659_s0 }
  0x63   : > { %p5662_p0 = pnand %p5660_p13, %p6162_p8 }
  0x64   : > { %p5669_p7 = por %p5668_p4, %p5667_p5 }
  0x65   : > { %p5663_p2 = pneg %p5662_p0 }
  0x67   : > { %p5670_p9 = pnand %p5669_p7, %p5663_p2 }
  0x69   : > { %5673 = shalt.err (!%p5670_p9)
}
  0x6a   : > { %5321 = dma.hbm_to_vmem [thread:$0]  (!%p6150_p6), %s7916_s24, 16, %s6137_s16, [#allocation6]  }
  0x6b   : > { %s5674_s19 = scalar_lea.hbm %s7917_s6, 16  ;;  %s5679_s28 = scalar_lea.hbm %s7917_s6, 64 }
  0x6c   : > { %p5675_p10 = scmp.ne.s32.totalorder %s7917_s6, %s5674_s19  ;;  %p5680_p13 = scmp.lt.s32.totalorder %s5679_s28, %s5674_s19 }
  0x6e   : > { %p5677_p11 = pnand %p5675_p10, %p6162_p8 }
  0x70   : > { %p5678_p12 = pneg %p5677_p11 }
  0x72   : > { %p5681_p0 = pnand %p5680_p13, %p5678_p12 }
  0x74   : > { %5684 = shalt.err (!%p5681_p0)
}
  0x75   : > { %s5685_s4 = scalar_lea.vmem %s6146_s26, 16  ;;  %s5692_s16 = scalar_lea.vmem %s6146_s26, 32 }
  0x76   : > { %p5686_p4 = scmp.ne.s32.totalorder %s6146_s26, %s5685_s4  ;;  %p5693_p7 = scmp.lt.s32.totalorder %s6146_s26, %s6146_s26 }
  0x77   : > { %p5694_p9 = scmp.lt.s32.totalorder %s5692_s16, %s5685_s4 }
  0x78   : > { %p5688_p2 = pnand %p5686_p4, %p6162_p8 }
  0x79   : > { %p5695_p10 = por %p5694_p9, %p5693_p7 }
  0x7a   : > { %p5689_p5 = pneg %p5688_p2 }
  0x7c   : > { %p5696_p11 = pnand %p5695_p10, %p5689_p5 }
  0x7e   : > { %5699 = shalt.err (!%p5696_p11)
}
  0x7f   : > { %5324 = dma.hbm_to_vmem [thread:$0]  (!%p6150_p6), %s7917_s6, 16, %s6146_s26, [#allocation9]  }
  0x80   : > { %s5711_s0 = scalar_lea.vmem %s6154_s1, 128  ;;  %p5719_p4 = scmp.lt.s32.totalorder %s6154_s1, %s6154_s1 }
  0x81   : > { %p5712_p12 = scmp.ne.s32.totalorder %s6154_s1, %s5711_s0  ;;  %p5720_p2 = scmp.lt.s32.totalorder %s5711_s0, %s5711_s0 }
  0x83   : > { %p5714_p13 = pnand %p5712_p12, %p6162_p8  ;;  %p5721_p7 = por %p5720_p2, %p5719_p4 }
  0x85   : > { %p5715_p0 = pneg %p5714_p13 }
  0x87   : > { %p5722_p5 = pnand %p5721_p7, %p5715_p0 }
  0x89   : > { %5725 = shalt.err (!%p5722_p5)
}
  0x8a   : > { %s7921_s13 = sld [smem:[#allocation21_spill]]  ;;  %s5737_s26 = scalar_lea.vmem %s942_s30, 8192 }
  0x8b   : > { %p5738_p9 = scmp.ne.s32.totalorder %s942_s30, %s5737_s26  ;;  %p5745_p12 = scmp.lt.s32.totalorder %s942_s30, %s942_s30 }
  0x8c   : > { %p5746_p13 = scmp.lt.s32.totalorder %s5737_s26, %s5737_s26 }
  0x8d   : > { %p5740_p10 = pnand %p5738_p9, %p6162_p8 }
  0x8e   : > { %p5747_p1 = por %p5746_p13, %p5745_p12 }
  0x8f   : > { %p5741_p11 = pneg %p5740_p10 }
  0x90   : > { %5318 = dma.hbm_to_vmem [thread:$0]  (!%p6150_p6), %s7921_s13, 128, %s6154_s1, [#allocation3]  }
  0x91   : > { %p5748_p3 = pnand %p5747_p1, %p5741_p11 }
  0x93   : > { %5751 = shalt.err (!%p5748_p3)
}
  0x94   : > { %s5925_s19 = smov 1024   ;;  %s7922_s20 = sld [smem:[#allocation40_spill]] }
  0x95   : > { %s5926_s1 = smov 64   ;;  %s4968_s23 = sadd.s32 4294967294, %s5886_s15  }
  0x96   : > { %s6214_s28 = sadd.s32 1, %s5886_s15   ;;  %s169_s16 = sadd.s32 1, %s5882_s11 }
  0x97   : > { %s166_s4 = ssub.s32 %s5886_s15, %s6214_s28  ;;  %p176_p3 = scmp.ne.s32.totalorder %s5882_s11, %s5878_s10 }
  0x98   : > { %p167_p1 = scmp.eq.s32.totalorder %s166_s4, 0  ;;  %p177_p8 = scmp.eq.s32.totalorder %s5886_s15, 0 }
  0x99   : > { %p182_p0 = scmp.ne.s32.totalorder %s5878_s10, %s5874_s7  ;;  %p794_p7 = scmp.eq.s32.totalorder %s6132_s18, 1 }
  0x9a   : > { %5327 = dma.hbm_to_vmem [thread:$0]  (!%p6150_p6), %s7922_s20, 8192, %s942_s30, [#allocation9], %s5925_s19, %s5925_s19, %s5926_s1  }
  0x9b   : > { %s6225_s0 = scalar_select %p167_p1, %s5882_s11, %s169_s16  }
  0x9c   : > { %p6227_p4 = por %p177_p8, %p176_p3  ;;  %p7925_p6 = scmp.eq.s32.totalorder %s6132_s18, 0 }
  0x9d   : > { %7923 = sst [smem:[#allocation46_spill]] %s6225_s0  ;;  %p800_p5 = scmp.eq.s32.totalorder %s4968_s23, 1 }
  0x9e   : > { %p6233_p2 = por %p7925_p6, %p182_p0  ;;  %p5343_p9 = scmp.lt.s32.totalorder %s5886_s15, 2 }
  0x9f   : > { %s981_s2 = sand.u32 1, %s5886_s15   ;;  %p6240_p10 = por %p794_p7, %p176_p3 }
  0xa0   : > { %s7926_s30 = scalar_select %p6233_p2, 1, 0 }
  0xa1   : > { %s7927_s19 = scalar_select %p6240_p10, 1, 0 }
  0xa2   : > { %p6244_p11 = por %p800_p5, %p182_p0  ;;  %s983_s4 = sand.u32 1, %s5882_s11  }
  0xa3   : > { %s4975_s16 = sshll.u32 %s5886_s15, 4  ;;  %s984_s23 = scalar_lea.vmem [#allocation5], %s983_s4 }
  0xa4   : > { %s7928_s1 = scalar_select %p6244_p11, 1, 0 }
  0xa5   : > { %s6251_s6 = scalar_lea.hbm %s5959_s17, %s4975_s16  ;;  %s991_s13 = sshll.u32 %s984_s23, 4  ;;  %s992_s13 = int_to_ptr.vmem [resolvable:$true] %s991_s13 }
  0xa6   : > { %p6255_p12 = pnand %p5343_p9, %p6227_p4  ;;  %s982_s24 = scalar_lea.sflag [#allocation6], %s981_s2 }
  0xa7   : > { %s5752_s0 = scalar_lea.hbm %s6251_s6, 16  ;;  %s5757_s16 = scalar_lea.hbm %s5959_s17, 32 }
  0xa8   : > { %s7929_s20 = scalar_select %p6255_p12, 1, 0 }
  0xa9   : > { %p5753_p13 = scmp.ne.s32.totalorder %s6251_s6, %s5752_s0  ;;  %p5754_p1 = pneg %p6255_p12 }
  0xaa   : > { %p5758_p0 = scmp.lt.s32.totalorder %s6251_s6, %s5959_s17  ;;  %p5759_p6 = scmp.lt.s32.totalorder %s5757_s16, %s5752_s0 }
  0xab   : > { %p5755_p3 = pnand %p5754_p1, %p5753_p13 }
  0xac   : > { %p5760_p7 = por %p5759_p6, %p5758_p0 }
  0xad   : > { %p5756_p8 = pneg %p5755_p3 }
  0xaf   : > { %p5761_p5 = pnand %p5760_p7, %p5756_p8 }
  0xb1   : > { %5764 = shalt.err (!%p5761_p5)
}
  0xb2   : > { %s5765_s4 = scalar_lea.vmem %s992_s13, 16  ;;  %s5927_s26 = smov [#allocation5]  }
  0xb3   : > { %p5766_p11 = scmp.ne.s32.totalorder %s992_s13, %s5765_s4  ;;  %s5770_s23 = sshll.u32 %s5927_s26, 4  ;;  %s5771_s23 = int_to_ptr.vmem [resolvable:$false] %s5770_s23 }
  0xb4   : > { %s5772_s2 = scalar_lea.vmem %s5771_s23, 32  ;;  %p5773_p10 = scmp.lt.s32.totalorder %s992_s13, %s5771_s23 }
  0xb5   : > { %p5768_p4 = pnand %p5766_p11, %p5754_p1  ;;  %p5774_p2 = scmp.lt.s32.totalorder %s5772_s2, %s5765_s4 }
  0xb7   : > { %p5769_p9 = pneg %p5768_p4  ;;  %p5775_p12 = por %p5774_p2, %p5773_p10 }
  0xb9   : > { %p5776_p13 = pnand %p5775_p12, %p5769_p9 }
  0xbb   : > { %5779 = shalt.err (!%p5776_p13)
}
  0xbc   : > { %p7930_p3 = scmp.ne.s32.totalorder %s7929_s20, 0  ;;  %p7931_p8 = scmp.ne.s32.totalorder %s7918_s22, 0 }
  0xbe   : > { %5331 = dma.hbm_to_vmem [thread:$0]  (!%p7930_p3), %s6251_s6, 16, %s992_s13, %s982_s24  }
  0xbf   : > { %1000 = sbr.rel (%p7931_p8) target bundleno = 3414 (0xd56), region = 148 }
  0xc4   : > { %p7932_p0 = scmp.eq.s32.totalorder %s6132_s18, 0 }
  0xc6   : > { %5849 = dma.done.wait (%p7932_p0), [#allocation3], 128   ;;  %p7933_p11 = pmov %p7932_p0 }
  0xc7   : > { %s1006_s0 = sand.u32 1, %s6132_s18   ;;  %s6277_s16 = sand.u32 1, %s5878_s10  }
  0xc8   : > { %5851 = vsyncadd (%p7933_p11), [#allocation3], 4294967168  ;;  %s1007_s4 = scalar_lea.sflag [#allocation6], %s1006_s0  ;;  %s1009_s20 = scalar_lea.vmem [#allocation5], %s6277_s16 }
  0xc9   : > { %p7934_p2 = scmp.ne.s32.totalorder %s7926_s30, 0 }
  0xcb   : > { %5853 = dma.done.wait (%p7934_p2), %s1007_s4, 16  }
  0xcc   : > { %5855 = vsyncadd (%p7934_p2), %s1007_s4, 4294967280  ;;  %p7935_p10 = pmov %p7932_p0 }
  0xcd   : > { %p7936_p12 = pmov %p7932_p0 }
  0xce   : > { %5857 = dma.done.wait (%p7935_p10), [#allocation6], 16  }
  0xcf   : > { %5859 = vsyncadd (%p7936_p12), [#allocation6], 4294967280  ;;  %p7937_p1 = pmov %p7932_p0 }
  0xd0   : > { %p7938_p6 = pmov %p7932_p0 }
  0xd1   : > { %5861 = dma.done.wait (%p7937_p1), [#allocation9], 8208  }
  0xd2   : > { %5863 = vsyncadd (%p7938_p6), [#allocation9], 4294959088  ;;  %s7939_s5 = sld [smem:[#allocation20_spill]]  ;;  %p1115_p7 = scmp.lt.s32.totalorder %s6132_s18, 1  ;;  %v5928_v0 = vmov 0.0   ;;  %vm5929_vm0 = vmmov 0  }
  0xd3   : > { %5125 = vmatprep.subr.mxu1 %v5928_v0  ;;  %5133 = vmatprep.mubr.msk.f32.mxu1 %vm5929_vm0, %v5928_v0  ;;  %v1130_v1 = vld [vmem:[%s5964_s21 + $0x18] sm:$0xff]  ;;  %v1129_v2 = vld [vmem:[%s5964_s21 + $0x10] sm:$0xff]  ;;  %v1128_v3 = vld [vmem:[%s5964_s21 + $0x8] sm:$0xff]  ;;  %vm1131_vm1 = vcmask 261120   ;;  %vm1436_vm2 = vcmask 62464   ;;  %vm1448_vm3 = vcmask 64512  }
  0xd4   : > { %s1116_s13 = scalar_select %p1115_p7, %s6132_s18, 1  ;;  %5147 = vmatprep.subr.mxu0 %v5928_v0  ;;  %5155 = vmatprep.mubr.msk.f32.mxu0 %vm5929_vm0, %v5928_v0  ;;  %v1127_v4 = vld [vmem:[%s5964_s21] sm:$0xff]  ;;  %v1208_v6 = vld [vmem:[%s5969_s25 + $0x18] sm:$0xff]  ;;  %v1207_v7 = vld [vmem:[%s5969_s25 + $0x10] sm:$0xff]  ;;  %vm1915_vm4 = vcmask 253952   ;;  %vm1840_vm5 = vcmask 1045504  }
  0xd5   : > { %5126 = vmatpush3.msra.mxu1 %v1130_v1  ;;  %v1125_v9 = vld [vmem:[#allocation2] sm:$0xff]  ;;  %v1206_v10 = vld [vmem:[%s5969_s25 + $0x8] sm:$0xff]  ;;  %v1285_v17 = vld [vmem:[%s5974_s29 + $0x18] sm:$0xff]  ;;  %s7940_s30 = sld [smem:[#allocation30_spill]]  ;;  %s7865_s26 = scalar_lea.vmem [#allocation12], %s6277_s16  ;;  %vm1996_vm6 = vcmask 57344  }
  0xd6   : > { %s4982_s24 = sshll.u32 %s1116_s13, 3  ;;  %5127 = vmatprep.subr.mxu1 %v5928_v0  ;;  %v1205_v12 = vld [vmem:[%s5969_s25] sm:$0xff]  ;;  %v1284_v18 = vld [vmem:[%s5974_s29 + $0x10] sm:$0xff]  ;;  %5148 = vmatpush3.msra.mxu0 %v1285_v17  ;;  %v1283_v19 = vld [vmem:[%s5974_s29 + $0x8] sm:$0xff]  ;;  %vm1825_vm7 = vcmask 48128   ;;  %s7941_s23 = sld [smem:[#allocation31_spill]] }
  0xd7   : > { %5128 = vmatpush3.msra.mxu1 %v1129_v2  ;;  %s1122_s22 = scalar_lea.vmem %s5949_s9, %s4982_s24  ;;  %5149 = vmatprep.subr.mxu0 %v5928_v0  ;;  %v1282_v20 = vld [vmem:[%s5974_s29] sm:$0xff]  ;;  %v1526_v32 = vld [vmem:[%s7915_s3 + $0x18] sm:$0xff]  ;;  %v1525_v33 = vld [vmem:[%s7915_s3 + $0x10] sm:$0xff]  ;;  %s7942_s2 = sld [smem:[#allocation32_spill]]  ;;  %vm2715_vm8 = vcmask 523264  }
  0xd8   : > { %s1118_s6 = scalar_lea.vmem %s7939_s5, %s4982_s24  ;;  %5129 = vmatprep.subr.mxu1 %v5928_v0  ;;  %v6316_v8 = vld [vmem:[%s1122_s22] sm:$0xff]  ;;  %5150 = vmatpush3.msra.mxu0 %v1284_v18  ;;  %v1524_v34 = vld [vmem:[%s7915_s3 + $0x8] sm:$0xff]  ;;  %v1677_v36 = vld [vmem:[%s5989_s14 + $0x18] sm:$0xff]  ;;  %s7943_s0 = sld [smem:[#allocation33_spill]] }
  0xd9   : > { %5130 = vmatpush3.msra.mxu1 %v1128_v3  ;;  %v6307_v5 = vld [vmem:[%s1118_s6] sm:$0x3f]  ;;  %v1126_v11 = vadd.f32 %v1125_v9, %v6316_v8  ;;  %5151 = vmatprep.subr.mxu0 %v5928_v0  ;;  %v1676_v37 = vld [vmem:[%s5989_s14 + $0x10] sm:$0xff]  ;;  %v1675_v38 = vld [vmem:[%s5989_s14 + $0x8] sm:$0xff]  ;;  %s7944_s4 = sld [smem:[#allocation24_spill]]  ;;  %p7981_p4 = scmp.ne.s32.totalorder %s7927_s19, 0 }
  0xda   : > { %5131 = vmatprep.subr.mxu1 %v5928_v0  ;;  %5152 = vmatpush3.msra.mxu0 %v1283_v19  ;;  %v1523_v35 = vld [vmem:[%s7915_s3] sm:$0xff]  ;;  %v1600_v42 = vld [vmem:[%s7914_s8 + $0x18] sm:$0xff]  ;;  %v1599_v43 = vld [vmem:[%s7914_s8 + $0x10] sm:$0xff]  ;;  %s7946_s13 = sld [smem:[#allocation36_spill]] }
  0xdb   : > { %5132 = vmatpush3.msra.mxu1 %v1127_v4  ;;  %5153 = vmatprep.subr.mxu0 %v5928_v0  ;;  %v1598_v44 = vld [vmem:[%s7914_s8 + $0x8] sm:$0xff]  ;;  %v1674_v45 = vld [vmem:[%s5989_s14] sm:$0xff]  ;;  %v1921_v51 = vld [vmem:[%s6024_s27 + $0x18] sm:$0xff]  ;;  %s7947_s24 = sld [smem:[#allocation42_spill]] }
  0xdc   : > { %5134 = vmatmul.mubr.msk.f32.vlgmr.msra.gmra.mxu1 %vm1131_vm1, %v6307_v5  ;;  %5136 = vmatprep.subr.mxu1 %v5928_v0  ;;  %v1597_v46 = vld [vmem:[%s7914_s8] sm:$0xff]  ;;  %v1920_v53 = vld [vmem:[%s6024_s27 + $0x10] sm:$0xff]  ;;  %v1919_v54 = vld [vmem:[%s6024_s27 + $0x8] sm:$0xff]  ;;  %s7948_s6 = sld [smem:[#allocation35_spill]] }
  0xdd   : > { %5137 = vmatpush3.msra.mxu1 %v1208_v6  ;;  %5144 = vmatprep.mubr.msk.f32.mxu1 %vm5929_vm0, %v5928_v0  ;;  %v1918_v55 = vld [vmem:[%s6024_s27] sm:$0xff]  ;;  %s7949_s22 = sld [smem:[#allocation39_spill]] }
  0xde   : > { %5138 = vmatprep.subr.mxu1 %v5928_v0  ;;  %5154 = vmatpush3.msra.mxu0 %v1282_v20  ;;  %v1917_v56 = vld [vmem:[%s1009_s20] sm:$0x1]  ;;  %s7945_s20 = sld [smem:[#allocation26_spill]] }
  0xdf   : > { %5139 = vmatpush3.msra.mxu1 %v1207_v7  ;;  %5156 = vmatmul.mubr.msk.f32.vlgmr.msra.gmra.mxu0 %vm1131_vm1, %v6316_v8  ;;  %v1922_v61 = vld [vmem:[%s7940_s30] sm:$0x1]  ;;  %s7950_s30 = sld [smem:[#allocation28_spill]] }
  0xe0   : > { %5140 = vmatprep.subr.mxu1 %v5928_v0  ;;  %5168 = vmatprep.subr.mxu0 %v5928_v0 }
  0xe1   : > { %5141 = vmatpush3.msra.mxu1 %v1206_v10  ;;  %5176 = vmatprep.mubr.msk.f32.mxu0 %vm5929_vm0, %v5928_v0 }
  0xe2   : > { %5142 = vmatprep.subr.mxu1 %v5928_v0  ;;  %5169 = vmatpush3.msra.mxu0 %v1526_v32 }
  0xe3   : > { %5143 = vmatpush3.msra.mxu1 %v1205_v12  ;;  %5170 = vmatprep.subr.mxu0 %v5928_v0 }
  0xe4   : > { %5145 = vmatmul.mubr.msk.f32.vlgmr.msra.gmra.mxu1 %vm1131_vm1, %v1126_v11  ;;  %5158 = vmatprep.subr.mxu1 %v5928_v0 }
  0xe5   : > { %5160 = vmatprep.mubr.msk.f32.mxu1 %vm5929_vm0, %v5928_v0  ;;  %5171 = vmatpush3.msra.mxu0 %v1525_v33 }
  0xe6   : > { %5172 = vmatprep.subr.mxu0 %v5928_v0 }
  0xe7   : > { %5173 = vmatpush3.msra.mxu0 %v1524_v34 }
  0xe8   : > { %5174 = vmatprep.subr.mxu0 %v5928_v0 }
  0xe9   : > { %5175 = vmatpush3.msra.mxu0 %v1523_v35 }
  0xea   : > { %5190 = vmatprep.subr.mxu0 %v5928_v0  ;;  %5177 = vmatmul.mubr.msk.f32.vlgmr.msra.gmra.mxu0 %vm1131_vm1, %v1126_v11 }
  0xeb   : > { %5191 = vmatpush3.msra.mxu0 %v1677_v36  ;;  %5198 = vmatprep.mubr.msk.f32.mxu0 %vm5929_vm0, %v5928_v0  ;;  %v2024_v36 = vld [vmem:[%s7943_s0] sm:$0xff]  ;;  %s7953_s0 = sld [smem:[#allocation43_spill]] }
  0xec   : > { %5192 = vmatprep.subr.mxu0 %v5928_v0 }
  0xed   : > { %5193 = vmatpush3.msra.mxu0 %v1676_v37 }
  0xee   : > { %5194 = vmatprep.subr.mxu0 %v5928_v0 }
  0xef   : > { %5195 = vmatpush3.msra.mxu0 %v1675_v38 }
  0xf0   : > { %5196 = vmatprep.subr.mxu0 %v5928_v0 }
  0xf1   : > { %5197 = vmatpush3.msra.mxu0 %v1674_v45  ;;  %v2328_v45 = vld [vmem:[%s7946_s13] sm:$0xff]  ;;  %s7955_s13 = sld [smem:[#allocation29_spill]] }
  0xf2   : > { %5211 = vmatprep.subr.mxu0 %v5928_v0 }
 0x19c   : > { %v1201_v13 = vpop.f32.mrf.mxu1 }
 0x19e   : > { %v5135_v14 = vpop.f32.mrf.mxu1 }
 0x19f   : > { %v1355_v30 = vpop.f32.mrf.mxu0 }
 0x1a1   : > { %v5157_v31 = vpop.f32.mrf.mxu0 }
 0x1a4   : > { %v1278_v15 = vpop.f32.mrf.mxu1 }
 0x1a5   : > { %5159 = vmatpush3.xpose.msk.msra.mxu1 %vm1131_vm1, %v1278_v15 }
 0x1a6   : > { %v5146_v16 = vpop.f32.mrf.mxu1  ;;  %5163 = vmatprep.subr.mxu1 %v5928_v0 }
 0x1a8   : > { %5161 = vmatmul.mubr.msk.f32.vlgmr.msra.gmra.mxu1 %vm1131_vm1, %v1201_v13 }
 0x1a9   : > { %5165 = vmatprep.mubr.msk.f32.mxu1 %vm5929_vm0, %v5928_v0  ;;  %5164 = vmatpush3.msra.mxu1 %v1355_v30 }
 0x1aa   : > { %5179 = vmatprep.subr.mxu1 %v5928_v0  ;;  %v1593_v47 = vpop.f32.mrf.mxu0 }
 0x1ac   : > { %v5178_v48 = vpop.f32.mrf.mxu0 }
 0x1ad   : > { %v2913_v48 = vld [vmem:[%s7947_s24 + $0x20] sm:$0xff] }
 0x268   : > { %v1431_v21 = vpop.f32.mrf.mxu1 }
 0x269   : > { %v1435_v22 = vmul.f32 0.17677669, %v1431_v21 }
 0x26a   : > { %v5162_v23 = vpop.f32.mrf.mxu1 }
 0x26b   : > { %v1437_v24 = vsel %vm1436_vm2, %v1435_v22, -inf  ;;  %v2011_v23 = vld [vmem:[%s7941_s23] sm:$0x1]  ;;  %s7951_s23 = sld [smem:[#allocation37_spill]] }
 0x26c   : > { %1438 = vmax.xlane.f32.xlu0 %v1437_v24 }
 0x2f5   : > { %v1439_v25 = vpop.xlane.xlu0 %1438 }
 0x2f6   : > { %v1440_v26 = vsub.f32 %v1435_v22, %v1439_v25  ;;  %v2013_v25 = vld [vmem:[%s7942_s2] sm:$0x1]  ;;  %s7952_s2 = sld [smem:[#allocation38_spill]] }
 0x2f8   : > { %v1441_v27 = vmul.f32 1.442695, %v1440_v26 }
 0x2fa   : > { %5428 = vpow2.f32 %v1441_v27 }
 0x307   : > { %v5429_v28 = vpop.eup %5428 }
 0x308   : > { %v1443_v29 = vsel %vm1436_vm2, %v5429_v28, 0.0 }
 0x309   : > { %1444 = vadd.xlane.f32.xlu0 %v1443_v29 }
 0x392   : > { %v1445_v39 = vpop.xlane.xlu0 %1444 }
 0x393   : > { %5430 = vrcp.f32 %v1445_v39 }
 0x3a0   : > { %v5431_v40 = vpop.eup %5430 }
 0x3a1   : > { %v1447_v41 = vmul.f32 %v5431_v40, %v5429_v28  ;;  %v2102_v40 = vld [vmem:[%s7944_s4 + $0x18] sm:$0xff] }
 0x3a3   : > { %5166 = vmatmul.mubr.msk.f32.vlgmr.msra.gmra.mxu1 %vm1448_vm3, %v1447_v41  ;;  %v2101_v41 = vld [vmem:[%s7944_s4 + $0x10] sm:$0xff] }
 0x3a4   : > { %5180 = vmatpush3.msra.mxu1 %v1600_v42  ;;  %5187 = vmatprep.mubr.msk.f32.mxu1 %vm5929_vm0, %v5928_v0  ;;  %v2100_v42 = vld [vmem:[%s7944_s4 + $0x8] sm:$0xff] }
 0x3a5   : > { %5181 = vmatprep.subr.mxu1 %v5928_v0 }
 0x3a6   : > { %5182 = vmatpush3.msra.mxu1 %v1599_v43  ;;  %v2099_v43 = vld [vmem:[%s7944_s4] sm:$0xff] }
 0x3a7   : > { %5183 = vmatprep.subr.mxu1 %v5928_v0 }
 0x3a8   : > { %5184 = vmatpush3.msra.mxu1 %v1598_v44  ;;  %v2175_v44 = vld [vmem:[%s7945_s20] sm:$0xff]  ;;  %s7954_s20 = sld [smem:[#allocation34_spill]] }
 0x3a9   : > { %5185 = vmatprep.subr.mxu1 %v5928_v0 }
 0x3aa   : > { %5186 = vmatpush3.msra.mxu1 %v1597_v46  ;;  %v5930_v46 = vmov 0  }
 0x3ab   : > { %5201 = vmatprep.subr.mxu1 %v5928_v0  ;;  %5426 = vset.pattern.permute.xlu0 %v5930_v46 }
 0x3ac   : > { %5427 = vset.pattern.permute.xlu1 %v5930_v46 }
 0x463   : > { %v1518_v49 = vpop.f32.mrf.mxu1 }
 0x464   : > { %v6379_v50 = vadd.f32 %v1518_v49, %v6307_v5  ;;  %v2915_v49 = vld [vmem:[%s7947_s24 + $0x30] sm:$0xff] }
 0x465   : > { %v5167_v52 = vpop.f32.mrf.mxu1 }
 0x466   : > { %5188 = vmatmul.mubr.msk.f32.vlgmr.msra.gmra.mxu1 %vm1131_vm1, %v6379_v50  ;;  %5199 = vmatmul.mubr.msk.f32.vlgmr.msra.gmra.mxu0 %vm1131_vm1, %v6379_v50  ;;  %1916 = vst.msk [vmem:[%s7865_s26] sm:$0x1] %vm1915_vm4, %v6379_v50 }
 0x467   : > { %5212 = vmatpush3.msra.mxu0 %v1921_v51  ;;  %5219 = vmatprep.mubr.msk.f32.mxu0 %vm5929_vm0, %v5928_v0 }
 0x468   : > { %5213 = vmatprep.subr.mxu0 %v5928_v0  ;;  %5203 = vmatprep.mubr.msk.f32.mxu1 %vm5929_vm0, %v5928_v0 }
 0x469   : > { %5214 = vmatpush3.msra.mxu0 %v1920_v53  ;;  %v2327_v53 = vld [vmem:[%s7948_s6] sm:$0xff]  ;;  %s5931_s6 = smov 127  }
 0x46a   : > { %5215 = vmatprep.subr.mxu0 %v5928_v0 }
 0x46b   : > { %5216 = vmatpush3.msra.mxu0 %v1919_v54 }
 0x46c   : > { %5217 = vmatprep.subr.mxu0 %v5928_v0 }
 0x46d   : > { %5218 = vmatpush3.msra.mxu0 %v1918_v55 }
 0x46e   : > { %5220 = vmatmul.mubr.msk.f32.vlgmr.msra.gmra.mxu0 %vm1131_vm1, %v1917_v56  ;;  %5238 = vmatprep.subr.mxu0 %v5928_v0  ;;  %v2103_v56 = vld [vmem:[#allocation7] sm:$0x1] }
 0x46f   : > { %5240 = vmatprep.mubr.msk.f32.mxu0 %vm5929_vm0, %v5928_v0  ;;  %5239 = vmatpush3.msra.mxu0 %v2175_v44 }
 0x470   : > { %5243 = vmatprep.subr.mxu0 %v5928_v0 }
 0x526   : > { %v1670_v57 = vpop.f32.mrf.mxu1  ;;  %v1744_v58 = vpop.f32.mrf.mxu0 }
 0x527   : > { %5202 = vmatpush3.xpose.msk.msra.mxu1 %vm1131_vm1, %v1670_v57 }
 0x528   : > { %v5189_v59 = vpop.f32.mrf.mxu1  ;;  %v5200_v60 = vpop.f32.mrf.mxu0  ;;  %5206 = vmatprep.subr.mxu1 %v5928_v0 }
 0x529   : > { %v2413_v60 = vld [vmem:[%s7949_s22 + $0x18] sm:$0xff] }
 0x52a   : > { %5204 = vmatmul.mubr.msk.f32.vlgmr.msra.gmra.mxu1 %vm1131_vm1, %v1593_v47  ;;  %v2911_v47 = vld [vmem:[%s7947_s24 + $0x10] sm:$0xff] }
 0x52b   : > { %5207 = vmatpush3.msk.msra.mxu1 %vm1840_vm5, %v1744_v58  ;;  %5208 = vmatprep.mubr.msk.f32.mxu1 %vm5929_vm0, %v5928_v0 }
 0x52c   : > { %5222 = vmatprep.subr.mxu1 %v5928_v0 }
 0x52e   : > { %v1992_v62 = vpop.f32.mrf.mxu0 }
 0x52f   : > { %v1993_v63 = vadd.f32 %v1992_v62, %v1922_v61  ;;  %v2412_v61 = vld [vmem:[%s7949_s22 + $0x10] sm:$0xff]  ;;  %v2251_v62 = vld [vmem:[%s7950_s30] sm:$0xff]  ;;  %s7956_s30 = sld [smem:[#allocation41_spill]] }
 0x530   : > { %v5221_v1 = vpop.f32.mrf.mxu0 }
 0x531   : > { %v1997_v2 = vsel %vm1996_vm6, %v1993_v63, 0.0  ;;  %v2635_v1 = vld [vmem:[%s7951_s23] sm:$0xff]  ;;  %s7864_s23 = smov 64  }
 0x532   : > { %1998 = vadd.xlane.f32.xlu1 %v1997_v2  ;;  %v2645_v2 = vld [vmem:[%s7952_s2] sm:$0xff] }
 0x5bb   : > { %v1999_v3 = vpop.xlane.xlu1 %1998 }
 0x5bc   : > { %v2001_v4 = vmul.f32 0.125, %v1999_v3 }
 0x5be   : > { %v2002_v5 = vsub.f32 %v1993_v63, %v2001_v4  ;;  %v2411_v63 = vld [vmem:[%s7949_s22 + $0x8] sm:$0xff] }
 0x5c0   : > { %v2003_v6 = vmul.f32 %v2002_v5, %v2002_v5 }
 0x5c2   : > { %v2004_v7 = vsel %vm1996_vm6, %v2003_v6, 0.0 }
 0x5c3   : > { %2005 = vadd.xlane.f32.xlu0 %v2004_v7  ;;  %v2176_v7 = vld [vmem:[#allocation8] sm:$0x1] }
 0x5d9   : > { %2331 = vperm.xlu0 %5426, %v2328_v45  }
 0x5dd   : > { %2929 = vperm.xlu0 %5426, %v2911_v47  }
 0x5e1   : > { %2939 = vperm.xlu0 %5426, %v2913_v48  }
 0x5e5   : > { %2949 = vperm.xlu0 %5426, %v2915_v49  }
 0x5ea   : > { %v1820_v9 = vpop.f32.mrf.mxu1 }
 0x5eb   : > { %v1824_v10 = vmul.f32 0.17677669, %v1820_v9 }
 0x5ec   : > { %v5205_v11 = vpop.f32.mrf.mxu1 }
 0x5ed   : > { %v1826_v12 = vsel %vm1825_vm7, %v1824_v10, -inf }
 0x5ee   : > { %1827 = vmax.xlane.f32.xlu1 %v1826_v12 }
 0x64c   : > { %v2006_v18 = vpop.xlane.xlu0 %2005 }
 0x64d   : > { %v2007_v19 = vmul.f32 0.125, %v2006_v18 }
 0x64f   : > { %v2008_v20 = vadd.f32 1e-05, %v2007_v19 }
 0x654   : > { %v2332_v3 = vpop.permute.xlu0 %2331 }
 0x677   : > { %v1828_v13 = vpop.xlane.xlu1 %1827 }
 0x678   : > { %v1829_v14 = vsub.f32 %v1824_v10, %v1828_v13  ;;  %v2410_v13 = vld [vmem:[%s7949_s22] sm:$0xff] }
 0x67a   : > { %v1830_v15 = vmul.f32 1.442695, %v1829_v14  ;;  %v3849_v14 = vld [vmem:[%s6094_s12] sm:$0x1] }
 0x67b   : > { %5281 = vpush %v3849_v14 }
 0x67c   : > { %5432 = vpow2.f32 %v1830_v15  ;;  %v3886_v15 = vld [vmem:[%s7953_s0] sm:$0x1] }
 0x67d   : > { %5434 = vrsqrt.f32 %v2008_v20  ;;  %5283 = vpush %v3886_v15 }
 0x689   : > { %v5433_v16 = vpop.eup %5432 }
 0x68a   : > { %v1832_v17 = vsel %vm1825_vm7, %v5433_v16, 0.0  ;;  %v5435_v21 = vpop.eup %5434 }
 0x68b   : > { %1833 = vadd.xlane.f32.xlu1 %v1832_v17  ;;  %v2010_v22 = vmul.f32 %v5435_v21, %v2002_v5  ;;  %v4280_v17 = vld [vmem:[%s7953_s0 + $0x1] sm:$0x1]  ;;  %s5933_s0 = smov [#allocation12]  }
 0x68c   : > { %s5784_s3 = sshll.u32 %s5933_s0, 4  ;;  %s5785_s3 = int_to_ptr.vmem [resolvable:$false] %s5784_s3 }
 0x68d   : > { %v2012_v24 = vmul.f32 %v2011_v23, %v2010_v22  ;;  %s5786_s4 = scalar_lea.vmem %s5785_s3, 32 }
 0x68f   : > { %v2014_v26 = vadd.f32 %v2013_v25, %v2012_v24 }
 0x691   : > { %v2016_v27 = vmul.f32 0.044715, %v2014_v26  ;;  %v2015_v38 = vmul.f32 0.5, %v2014_v26 }
 0x693   : > { %v2017_v28 = vmul.f32 %v2016_v27, %v2014_v26 }
 0x695   : > { %v2018_v29 = vmul.f32 %v2017_v28, %v2014_v26 }
 0x697   : > { %v2019_v30 = vadd.f32 %v2018_v29, %v2014_v26  ;;  %v2025_v29 = vld [vmem:[%s7954_s20] sm:$0x1] }
 0x699   : > { %v2020_v31 = vmul.f32 0.7978846, %v2019_v30 }
 0x69b   : > { %5436 = vtanh.f32 %v2020_v31 }
 0x69c   : > { %2638 = vperm.xlu1 %5427, %v2635_v1  }
 0x6a0   : > { %2648 = vperm.xlu1 %5427, %v2645_v2  }
 0x6a8   : > { %v5437_v33 = vpop.eup %5436 }
 0x6a9   : > { %v2022_v37 = vadd.f32 1.0, %v5437_v33 }
 0x6ab   : > { %v2023_v39 = vmul.f32 %v2022_v37, %v2015_v38 }
 0x6ac   : > { %s5282_s2 = spop %5281 }
 0x6ae   : > { %s5284_s20 = spop %5283 }
 0x714   : > { %v1834_v32 = vpop.xlane.xlu1 %1833 }
 0x715   : > { %5438 = vrcp.f32 %v1834_v32  ;;  %v2252_v32 = vld [vmem:[%s7955_s13] sm:$0x1] }
 0x722   : > { %v5439_v34 = vpop.eup %5438 }
 0x723   : > { %v1836_v35 = vmul.f32 %v5439_v34, %v5433_v16  ;;  %v4243_v16 = vld [vmem:[%s6094_s12 + $0x1] sm:$0x1] }
 0x724   : > { %5285 = vpush %v4243_v16 }
 0x725   : > { %5209 = vmatmul.mubr.msk.f32.vlgmr.msra.gmra.mxu1 %vm1825_vm7, %v1836_v35  ;;  %5287 = vpush %v4280_v17 }
 0x726   : > { %5223 = vmatpush3.msra.mxu1 %v2024_v36  ;;  %5224 = vmatprep.mubr.msk.f32.mxu1 %vm5929_vm0, %v5928_v0 }
 0x727   : > { %5227 = vmatprep.subr.mxu1 %v5928_v0 }
 0x729   : > { %5225 = vmatmul.mubr.msk.f32.vlgmr.msra.gmra.mxu1 %vm1448_vm3, %v2023_v39 }
 0x72a   : > { %5228 = vmatpush3.msra.mxu1 %v2102_v40  ;;  %5235 = vmatprep.mubr.msk.f32.mxu1 %vm5929_vm0, %v5928_v0 }
 0x72b   : > { %5229 = vmatprep.subr.mxu1 %v5928_v0 }
 0x72c   : > { %5230 = vmatpush3.msra.mxu1 %v2101_v41 }
 0x72d   : > { %5231 = vmatprep.subr.mxu1 %v5928_v0 }
 0x72e   : > { %5232 = vmatpush3.msra.mxu1 %v2100_v42 }
 0x72f   : > { %5233 = vmatprep.subr.mxu1 %v5928_v0 }
 0x730   : > { %5234 = vmatpush3.msra.mxu1 %v2099_v43 }
 0x731   : > { %5236 = vmatmul.mubr.msk.f32.vlgmr.msra.gmra.mxu1 %vm1131_vm1, %v6379_v50  ;;  %5248 = vmatprep.subr.mxu1 %v5928_v0 }
 0x732   : > { %5250 = vmatprep.mubr.msk.f32.mxu1 %vm5929_vm0, %v5928_v0 }
 0x755   : > { %s5286_s13 = spop %5285 }
 0x7e5   : > { %v1910_v50 = vpop.f32.mrf.mxu1 }
 0x7e6   : > { %v1914_v51 = vadd.f32 %v1910_v50, %v6316_v8 }
 0x7e7   : > { %v5210_v52 = vpop.f32.mrf.mxu1 }
 0x7e8   : > { %5249 = vmatpush3.xpose.msk.msra.mxu1 %vm1131_vm1, %v1914_v51 }
 0x7e9   : > { %v6446_v54 = vpop.f32.mrf.mxu1  ;;  %2518 = vmatprep.subr.mxu1 %v2413_v60 }
 0x7ea   : > { %v2096_v36 = vadd.f32 %v6446_v54, %v2025_v29 }
 0x7eb   : > { %v5226_v55 = vpop.f32.mrf.mxu1  ;;  %5251 = vmatmul.mubr.msk.f32.vlgmr.msra.gmra.mxu1 %vm1131_vm1, %v2327_v53 }
 0x7ec   : > { %2552 = vmatprep.mubr.f32.mxu1 %v5928_v0  ;;  %2519 = vmatpush1.msra.mxu1 %v2412_v61 }
 0x7f1   : > { %v2170_v57 = vpop.f32.mrf.mxu1 }
 0x7f2   : > { %v2171_v58 = vadd.f32 %v2170_v57, %v2103_v56 }
 0x7f3   : > { %v5237_v8 = vpop.f32.mrf.mxu1 }
 0x7f4   : > { %v2174_v59 = vmax.f32 %v2171_v58, 0.0 }
 0x7f6   : > { %5241 = vmatmul.mubr.msk.f32.vlgmr.msra.gmra.mxu0 %vm1448_vm3, %v2174_v59 }
 0x7f7   : > { %5245 = vmatprep.mubr.msk.f32.mxu0 %vm5929_vm0, %v5928_v0  ;;  %5244 = vmatpush3.msra.mxu0 %v2251_v62 }
 0x7f8   : > { %2447 = vmatprep.subr.mxu0 %v2411_v63 }
 0x8ab   : > { %v2406_v4 = vpop.f32.mrf.mxu1 }
 0x8ac   : > { %v2407_v5 = vadd.f32 %v2406_v4, %v2332_v3 }
 0x8ad   : > { %v5252_v6 = vpop.f32.mrf.mxu1 }
 0x8ae   : > { %5005 = vmatmul.mubr.msk.f32.vlgmr.msra.gmra.mxu1 %vm1448_vm3, %v2407_v5 }
 0x8af   : > { %3045 = vmatprep.mubr.f32.mxu1 %v5928_v0 }
 0x8b6   : > { %v2246_v9 = vpop.f32.mrf.mxu0 }
 0x8b7   : > { %v2247_v10 = vadd.f32 %v2246_v9, %v2176_v7 }
 0x8b8   : > { %v5242_v11 = vpop.f32.mrf.mxu0 }
 0x8b9   : > { %v2250_v12 = vmax.f32 %v2247_v10, 0.0 }
 0x8bb   : > { %5246 = vmatmul.mubr.msk.f32.vlgmr.msra.gmra.mxu0 %vm1448_vm3, %v2250_v12 }
 0x8bc   : > { %2448 = vmatpush1.msra.mxu0 %v2410_v13  ;;  %2481 = vmatprep.mubr.f32.mxu0 %v5928_v0 }
 0x8bf   : > { %5004 = vmatmul.mubr.msk.f32.vlgmr.msra.gmra.mxu0 %vm1448_vm3, %v2407_v5 }
 0x96e   : > { %v2554_v18 = vpop.f32.mrf.mxu1 }
 0x96f   : > { %v2571_v19 = vrot.slane %v2554_v18, 4 }
 0x970   : > { %v2556_v20 = vpop.f32.mrf.mxu1 }
 0x971   : > { %v2572_v21 = vadd.f32 %v2571_v19, %v2554_v18  ;;  %v2577_v22 = vrot.slane %v2556_v20, 4 }
 0x973   : > { %v2573_v23 = vrot.slane %v2572_v21, 2  ;;  %v2578_v24 = vadd.f32 %v2577_v22, %v2556_v20 }
 0x975   : > { %v2574_v25 = vadd.f32 %v2573_v23, %v2572_v21  ;;  %v2579_v26 = vrot.slane %v2578_v24, 2 }
 0x977   : > { %v2575_v27 = vrot.slane %v2574_v25, 1  ;;  %v2580_v28 = vadd.f32 %v2579_v26, %v2578_v24 }
 0x979   : > { %v2576_v30 = vadd.f32 %v2575_v27, %v2574_v25  ;;  %v2581_v31 = vrot.slane %v2580_v28, 1  ;;  %v2639_v27 = vpop.permute.xlu1 %2638 }
 0x97b   : > { %v2585_v33 = vmul.f32 0.125, %v2576_v30  ;;  %v2582_v34 = vadd.f32 %v2581_v31, %v2580_v28  ;;  %v2322_v35 = vpop.f32.mrf.mxu0 }
 0x97c   : > { %v2323_v37 = vadd.f32 %v2322_v35, %v2252_v32 }
 0x97d   : > { %v6472_v38 = vsub.f32 %v2554_v18, %v2585_v33  ;;  %v2586_v39 = vmul.f32 0.125, %v2582_v34  ;;  %v5247_v40 = vpop.f32.mrf.mxu0 }
 0x97e   : > { %v2326_v41 = vadd.f32 %v2323_v37, %v2096_v36  ;;  %v2649_v37 = vpop.permute.xlu1 %2648 }
 0x97f   : > { %v2593_v42 = vmul.f32 %v6472_v38, %v6472_v38  ;;  %v6476_v43 = vsub.f32 %v2556_v20, %v2586_v39  ;;  %v2483_v44 = vpop.f32.mrf.mxu0 }
 0x980   : > { %v2559_v45 = vrot.slane %v2483_v44, 4  ;;  %4641 = vrot.lane.b32.xlu0 %v2326_v41, %s5931_s6  ;;  %5289 = vpush %v2326_v41  ;;  %s5288_s6 = spop %5287 }
 0x981   : > { %v2607_v46 = vrot.slane %v2593_v42, 4  ;;  %v2594_v47 = vmul.f32 %v6476_v43, %v6476_v43  ;;  %v2485_v48 = vpop.f32.mrf.mxu0 }
 0x982   : > { %v2560_v49 = vadd.f32 %v2559_v45, %v2483_v44  ;;  %v2565_v50 = vrot.slane %v2485_v48, 4 }
 0x983   : > { %v2608_v51 = vadd.f32 %v2607_v46, %v2593_v42  ;;  %v2613_v52 = vrot.slane %v2594_v47, 4 }
 0x984   : > { %v2561_v53 = vrot.slane %v2560_v49, 2  ;;  %v2566_v54 = vadd.f32 %v2565_v50, %v2485_v48 }
 0x985   : > { %v2609_v55 = vrot.slane %v2608_v51, 2  ;;  %v2614_v56 = vadd.f32 %v2613_v52, %v2594_v47 }
 0x986   : > { %v2562_v57 = vadd.f32 %v2561_v53, %v2560_v49  ;;  %v2567_v58 = vrot.slane %v2566_v54, 2 }
 0x987   : > { %v2610_v8 = vadd.f32 %v2609_v55, %v2608_v51  ;;  %v2615_v59 = vrot.slane %v2614_v56, 2 }
 0x988   : > { %v2563_v60 = vrot.slane %v2562_v57, 1  ;;  %v2568_v61 = vadd.f32 %v2567_v58, %v2566_v54 }
 0x989   : > { %v2611_v62 = vrot.slane %v2610_v8, 1  ;;  %v2616_v63 = vadd.f32 %v2615_v59, %v2614_v56 }
 0x98a   : > { %v2564_v1 = vadd.f32 %v2563_v60, %v2562_v57  ;;  %v2569_v2 = vrot.slane %v2568_v61, 1 }
 0x98b   : > { %v2612_v3 = vadd.f32 %v2611_v62, %v2610_v8  ;;  %v2617_v4 = vrot.slane %v2616_v63, 1 }
 0x98c   : > { %v2583_v5 = vmul.f32 0.125, %v2564_v1  ;;  %v2570_v6 = vadd.f32 %v2569_v2, %v2568_v61 }
 0x98d   : > { %v2621_v7 = vmul.f32 0.125, %v2612_v3  ;;  %v2618_v9 = vadd.f32 %v2617_v4, %v2616_v63 }
 0x98e   : > { %v2587_v10 = vsub.f32 %v2483_v44, %v2583_v5  ;;  %v2584_v11 = vmul.f32 0.125, %v2570_v6 }
 0x98f   : > { %v2625_v12 = vadd.f32 1e-06, %v2621_v7  ;;  %v2622_v13 = vmul.f32 0.125, %v2618_v9 }
 0x990   : > { %v2591_v14 = vmul.f32 %v2587_v10, %v2587_v10  ;;  %v2588_v15 = vsub.f32 %v2485_v48, %v2584_v11 }
 0x991   : > { %5440 = vrsqrt.f32 %v2625_v12  ;;  %v2626_v16 = vadd.f32 1e-06, %v2622_v13 }
 0x992   : > { %v2595_v17 = vrot.slane %v2591_v14, 4  ;;  %v2592_v18 = vmul.f32 %v2588_v15, %v2588_v15 }
 0x993   : > { %5442 = vrsqrt.f32 %v2626_v16 }
 0x994   : > { %v2596_v19 = vadd.f32 %v2595_v17, %v2591_v14  ;;  %v2601_v20 = vrot.slane %v2592_v18, 4  ;;  %v2707_v17 = vld [vmem:[%s7956_s30] sm:$0xff] }
 0x995   : > { %5269 = vmatprep.mubr.msk.f32.mxu0 %vm2715_vm8, %v2707_v17 }
 0x996   : > { %v2597_v21 = vrot.slane %v2596_v19, 2  ;;  %v2602_v22 = vadd.f32 %v2601_v20, %v2592_v18 }
 0x998   : > { %v2598_v23 = vadd.f32 %v2597_v21, %v2596_v19  ;;  %v2603_v24 = vrot.slane %v2602_v22, 2 }
 0x99a   : > { %v2599_v25 = vrot.slane %v2598_v23, 1  ;;  %v2604_v26 = vadd.f32 %v2603_v24, %v2602_v22 }
 0x99c   : > { %v2600_v28 = vadd.f32 %v2599_v25, %v2598_v23  ;;  %v2605_v29 = vrot.slane %v2604_v26, 1 }
 0x99e   : > { %v5441_v30 = vpop.eup %5440  ;;  %v2619_v31 = vmul.f32 0.125, %v2600_v28  ;;  %v2606_v32 = vadd.f32 %v2605_v29, %v2604_v26  ;;  %v2909_v26 = vld [vmem:[%s7947_s24] sm:$0xff]  ;;  %v2912_v28 = vld [vmem:[%s7947_s24 + $0x18] sm:$0xff]  ;;  %v6500_v29 = vpop.permute.xlu0 %2929 }
 0x99f   : > { %v2633_v33 = vmul.f32 %v5441_v30, %v6472_v38  ;;  %7957 = vst [vmem:[#allocation47_spill] sm:$0xff] %v6500_v29  ;;  %v2914_v30 = vld [vmem:[%s7947_s24 + $0x28] sm:$0xff] }
 0x9a0   : > { %v5443_v34 = vpop.eup %5442  ;;  %v2623_v35 = vadd.f32 1e-06, %v2619_v31  ;;  %v2620_v36 = vmul.f32 0.125, %v2606_v32  ;;  %v2902_v31 = vld [vmem:[#allocation10 + $0x1c8] sm:$0xff]  ;;  %v2901_v32 = vld [vmem:[#allocation10 + $0x1c0] sm:$0xff] }
 0x9a1   : > { %v2634_v39 = vmul.f32 %v5443_v34, %v6476_v43  ;;  %v2643_v40 = vmul.f32 %v2639_v27, %v2633_v33  ;;  %2997 = vmatprep.subr.mxu1 %v2902_v31  ;;  %v2894_v34 = vld [vmem:[#allocation10 + $0x188] sm:$0xff] }
 0x9a2   : > { %5444 = vrsqrt.f32 %v2623_v35  ;;  %v2624_v41 = vadd.f32 1e-06, %v2620_v36  ;;  %v6503_v33 = vpop.permute.xlu0 %2939  ;;  %v2916_v35 = vld [vmem:[%s7947_s24 + $0x38] sm:$0xff]  ;;  %2998 = vmatpush1.msra.mxu1 %v2901_v32  ;;  %v2893_v36 = vld [vmem:[#allocation10 + $0x180] sm:$0xff] }
 0x9a3   : > { %v2644_v42 = vmul.f32 %v2639_v27, %v2634_v39  ;;  %v2653_v44 = vadd.f32 %v2649_v37, %v2643_v40  ;;  %7958 = vst [vmem:[#allocation48_spill] sm:$0xff] %v6503_v33  ;;  %2999 = vmatprep.subr.mxu1 %v2894_v34  ;;  %v2885_v39 = vld [vmem:[#allocation10 + $0x140] sm:$0xff]  ;;  %v2878_v40 = vld [vmem:[#allocation10 + $0x108] sm:$0xff]  ;;  %v2884_v34 = vld [vmem:[#allocation10 + $0x138] sm:$0xff] }
 0x9a4   : > { %5446 = vrsqrt.f32 %v2624_v41  ;;  %3000 = vmatpush1.msra.mxu1 %v2893_v36  ;;  %v2877_v41 = vld [vmem:[#allocation10 + $0x100] sm:$0xff]  ;;  %v2882_v32 = vld [vmem:[#allocation10 + $0x128] sm:$0xff]  ;;  %v2883_v36 = vld [vmem:[#allocation10 + $0x130] sm:$0xff] }
 0x9a5   : > { %v2654_v45 = vadd.f32 %v2649_v37, %v2644_v42  ;;  %v2661_v46 = vmul.f32 0.044715, %v2653_v44  ;;  %v2870_v42 = vld [vmem:[#allocation10 + $0xc8] sm:$0xff] }
 0x9a7   : > { %v2662_v47 = vmul.f32 0.044715, %v2654_v45  ;;  %v2665_v48 = vmul.f32 %v2661_v46, %v2653_v44  ;;  %v2862_v46 = vld [vmem:[#allocation10 + $0x88] sm:$0xff] }
 0x9a9   : > { %v2666_v49 = vmul.f32 %v2662_v47, %v2654_v45  ;;  %v2669_v50 = vmul.f32 %v2665_v48, %v2653_v44  ;;  %v2861_v47 = vld [vmem:[#allocation10 + $0x80] sm:$0xff]  ;;  %v2854_v48 = vld [vmem:[#allocation10 + $0x48] sm:$0xff] }
 0x9ab   : > { %v2670_v51 = vmul.f32 %v2666_v49, %v2654_v45  ;;  %v2673_v38 = vadd.f32 %v2669_v50, %v2653_v44 }
 0x9ad   : > { %v2674_v52 = vadd.f32 %v2670_v51, %v2654_v45  ;;  %v2677_v53 = vmul.f32 0.7978846, %v2673_v38 }
 0x9af   : > { %v5445_v54 = vpop.eup %5444  ;;  %v2678_v55 = vmul.f32 0.7978846, %v2674_v52  ;;  %5448 = vtanh.f32 %v2677_v53  ;;  %v2708_v53 = vld [vmem:[%s7956_s30 + $0x8] sm:$0xff] }
 0x9b0   : > { %v2631_v56 = vmul.f32 %v5445_v54, %v2587_v10  ;;  %v2658_v10 = vmul.f32 0.5, %v2654_v45  ;;  %v2869_v45 = vld [vmem:[#allocation10 + $0xc0] sm:$0xff]  ;;  %v2904_v54 = vld [vmem:[#allocation10 + $0x1d8] sm:$0xff] }
 0x9b1   : > { %v5447_v43 = vpop.eup %5446  ;;  %5450 = vtanh.f32 %v2678_v55  ;;  %v2709_v55 = vld [vmem:[%s7956_s30 + $0x10] sm:$0xff] }
 0x9b2   : > { %v2632_v57 = vmul.f32 %v5447_v43, %v2588_v15  ;;  %v2641_v58 = vmul.f32 %v2639_v27, %v2631_v56  ;;  %v2657_v15 = vmul.f32 0.5, %v2653_v44  ;;  %v6506_v44 = vpop.permute.xlu0 %2949  ;;  %v2903_v56 = vld [vmem:[#allocation10 + $0x1d0] sm:$0xff]  ;;  %v2896_v43 = vld [vmem:[#allocation10 + $0x198] sm:$0xff] }
 0x9b3   : > { %7959 = vst [vmem:[#allocation49_spill] sm:$0xff] %v6506_v44 }
 0x9b4   : > { %v2642_v8 = vmul.f32 %v2639_v27, %v2632_v57  ;;  %v2651_v59 = vadd.f32 %v2649_v37, %v2641_v58  ;;  %v2910_v27 = vld [vmem:[%s7947_s24 + $0x8] sm:$0xff]  ;;  %v2895_v57 = vld [vmem:[#allocation10 + $0x190] sm:$0xff] }
 0x9b5   : > { %v2710_v58 = vld [vmem:[%s7956_s30 + $0x18] sm:$0xff] }
 0x9b6   : > { %v2652_v60 = vadd.f32 %v2649_v37, %v2642_v8  ;;  %v2659_v61 = vmul.f32 0.044715, %v2651_v59  ;;  %v2655_v24 = vmul.f32 0.5, %v2651_v59  ;;  %v2886_v37 = vld [vmem:[#allocation10 + $0x148] sm:$0xff]  ;;  %v2888_v8 = vld [vmem:[#allocation10 + $0x158] sm:$0xff] }
 0x9b7   : > { %3001 = vmatprep.subr.mxu1 %v2886_v37 }
 0x9b8   : > { %v2660_v62 = vmul.f32 0.044715, %v2652_v60  ;;  %v2663_v63 = vmul.f32 %v2659_v61, %v2651_v59  ;;  %v2656_v20 = vmul.f32 0.5, %v2652_v60  ;;  %3002 = vmatpush1.msra.mxu1 %v2885_v39  ;;  %v2880_v61 = vld [vmem:[#allocation10 + $0x118] sm:$0xff]  ;;  %v2874_v39 = vld [vmem:[#allocation10 + $0xe8] sm:$0xff] }
 0x9b9   : > { %3003 = vmatprep.subr.mxu1 %v2878_v40  ;;  %v2876_v40 = vld [vmem:[#allocation10 + $0xf8] sm:$0xff] }
 0x9ba   : > { %v2664_v1 = vmul.f32 %v2660_v62, %v2652_v60  ;;  %v2667_v2 = vmul.f32 %v2663_v63, %v2651_v59  ;;  %3004 = vmatpush1.msra.mxu1 %v2877_v41  ;;  %v2879_v62 = vld [vmem:[#allocation10 + $0x110] sm:$0xff]  ;;  %v2712_v63 = vld [vmem:[%s7956_s30 + $0x28] sm:$0xff] }
 0x9bb   : > { %3005 = vmatprep.subr.mxu1 %v2870_v42  ;;  %v2873_v41 = vld [vmem:[#allocation10 + $0xe0] sm:$0xff]  ;;  %v2875_v42 = vld [vmem:[#allocation10 + $0xf0] sm:$0xff] }
 0x9bc   : > { %v2668_v3 = vmul.f32 %v2664_v1, %v2652_v60  ;;  %v2671_v4 = vadd.f32 %v2667_v2, %v2651_v59  ;;  %v5449_v5 = vpop.eup %5448  ;;  %3006 = vmatpush1.msra.mxu1 %v2869_v45  ;;  %v2711_v59 = vld [vmem:[%s7956_s30 + $0x20] sm:$0xff]  ;;  %v2713_v2 = vld [vmem:[%s7956_s30 + $0x30] sm:$0xff] }
 0x9bd   : > { %v2685_v14 = vadd.f32 1.0, %v5449_v5  ;;  %3007 = vmatprep.subr.mxu1 %v2862_v46  ;;  %v2872_v1 = vld [vmem:[#allocation10 + $0xd8] sm:$0xff]  ;;  %v2863_v5 = vld [vmem:[#allocation10 + $0x90] sm:$0xff]  ;;  %v2866_v46 = vld [vmem:[#allocation10 + $0xa8] sm:$0xff] }
 0x9be   : > { %v5451_v6 = vpop.eup %5450  ;;  %v2672_v7 = vadd.f32 %v2668_v3, %v2652_v60  ;;  %v2675_v9 = vmul.f32 0.7978846, %v2671_v4  ;;  %3008 = vmatpush1.msra.mxu1 %v2861_v47  ;;  %v2887_v60 = vld [vmem:[#allocation10 + $0x150] sm:$0xff]  ;;  %v2864_v4 = vld [vmem:[#allocation10 + $0x98] sm:$0xff] }
 0x9bf   : > { %v2686_v11 = vadd.f32 1.0, %v5451_v6  ;;  %v6486_v16 = vmul.f32 %v2685_v14, %v2657_v15  ;;  %3009 = vmatprep.subr.mxu1 %v2854_v48  ;;  %v2871_v3 = vld [vmem:[#allocation10 + $0xd0] sm:$0xff]  ;;  %v2906_v15 = vld [vmem:[#allocation10 + $0x1e8] sm:$0xff]  ;;  %v2868_v47 = vld [vmem:[#allocation10 + $0xb8] sm:$0xff] }
 0x9c0   : > { %v2676_v12 = vmul.f32 0.7978846, %v2672_v7  ;;  %5452 = vtanh.f32 %v2675_v9  ;;  %v2714_v6 = vld [vmem:[%s7956_s30 + $0x38] sm:$0xff]  ;;  %v2856_v7 = vld [vmem:[#allocation10 + $0x58] sm:$0xff]  ;;  %v2853_v9 = vld [vmem:[#allocation10 + $0x40] sm:$0xff] }
 0x9c1   : > { %v6482_v13 = vmul.f32 %v2686_v11, %v2658_v10  ;;  %v2855_v10 = vld [vmem:[#allocation10 + $0x50] sm:$0xff]  ;;  %3010 = vmatpush1.msra.mxu1 %v2853_v9  ;;  %v2846_v11 = vld [vmem:[#allocation10 + $0x8] sm:$0xff]  ;;  %v2865_v48 = vld [vmem:[#allocation10 + $0xa0] sm:$0xff] }
 0x9c2   : > { %5454 = vtanh.f32 %v2676_v12  ;;  %v2848_v12 = vld [vmem:[#allocation10 + $0x18] sm:$0xff]  ;;  %3011 = vmatprep.subr.mxu1 %v2846_v11  ;;  %v2847_v14 = vld [vmem:[#allocation10 + $0x10] sm:$0xff] }
 0x9c3   : > { %2704 = vrot.lane.b32.xlu1 %v6482_v13, %s7864_s23 }
 0x9c7   : > { %2700 = vrot.lane.b32.xlu1 %v6486_v16, %s7864_s23 }
 0x9cd   : > { %v5453_v18 = vpop.eup %5452 }
 0x9ce   : > { %v2683_v23 = vadd.f32 1.0, %v5453_v18  ;;  %v2905_v18 = vld [vmem:[#allocation10 + $0x1e0] sm:$0xff] }
 0x9cf   : > { %v5455_v19 = vpop.eup %5454 }
 0x9d0   : > { %v2684_v21 = vadd.f32 1.0, %v5455_v19  ;;  %v6493_v25 = vmul.f32 %v2683_v23, %v2655_v24  ;;  %v2907_v19 = vld [vmem:[#allocation10 + $0x1f0] sm:$0xff]  ;;  %v2897_v23 = vld [vmem:[#allocation10 + $0x1a0] sm:$0xff] }
 0x9d1   : > { %v2899_v24 = vld [vmem:[#allocation10 + $0x1b0] sm:$0xff] }
 0x9d2   : > { %v2688_v22 = vmul.f32 %v2684_v21, %v2656_v20  ;;  %v2898_v21 = vld [vmem:[#allocation10 + $0x1a8] sm:$0xff] }
 0x9d4   : > { %2696 = vrot.lane.b32.xlu1 %v2688_v22, %s7864_s23 }
 0x9d8   : > { %2692 = vrot.lane.b32.xlu1 %v6493_v25, %s7864_s23  ;;  %s5290_s23 = spop %5289 }
 0x9dc   : > { %2919 = vperm.xlu1 %5427, %v2909_v26   ;;  %v2890_v26 = vld [vmem:[#allocation10 + $0x168] sm:$0xff] }
 0x9e0   : > { %2924 = vperm.xlu1 %5427, %v2910_v27   ;;  %v2892_v27 = vld [vmem:[#allocation10 + $0x178] sm:$0xff] }
 0x9e4   : > { %2934 = vperm.xlu1 %5427, %v2912_v28   ;;  %v2889_v28 = vld [vmem:[#allocation10 + $0x160] sm:$0xff] }
 0x9e8   : > { %2944 = vperm.xlu1 %5427, %v2914_v30   ;;  %v2891_v30 = vld [vmem:[#allocation10 + $0x170] sm:$0xff] }
 0x9ec   : > { %2954 = vperm.xlu1 %5427, %v2916_v35   ;;  %v2881_v35 = vld [vmem:[#allocation10 + $0x120] sm:$0xff] }
 0x9f2   : > { %v4642_v49 = vpop.permute.xlu0 %4641 }
 0x9f3   : > { %5291 = vpush %v4642_v49  ;;  %v2867_v49 = vld [vmem:[#allocation10 + $0xb0] sm:$0xff] }
 0xa24   : > { %s5292_s26 = spop %5291 }
 0xa35   : > { %v2705_v50 = vpop.permute.xlu1 %2704 }
 0xa36   : > { %5253 = vmatprep.subr.mxu0 %v2705_v50 }
 0xa37   : > { %5254 = vmatpush3.msra.mxu0 %v2705_v50 }
 0xa38   : > { %5255 = vmatprep.subr.mxu0 %v6482_v13 }
 0xa39   : > { %5256 = vmatpush3.msra.mxu0 %v6482_v13  ;;  %v2701_v51 = vpop.permute.xlu1 %2700  ;;  %v2845_v13 = vld [vmem:[#allocation10] sm:$0xff] }
 0xa3a   : > { %5257 = vmatprep.subr.mxu0 %v2701_v51  ;;  %3012 = vmatpush1.msra.mxu1 %v2845_v13  ;;  %v6645_v13 = vstv %s5284_s20  ;;  %s5049_s20 = sshll.u32 %s6132_s18, 4 }
 0xa3b   : > { %5258 = vmatpush3.msra.mxu0 %v2701_v51  ;;  %3223 = vmatprep.subr.mxu1 %v2906_v15  ;;  %v2858_v51 = vld [vmem:[#allocation10 + $0x68] sm:$0xff] }
 0xa3c   : > { %5259 = vmatprep.subr.mxu0 %v6486_v16 }
 0xa3d   : > { %5260 = vmatpush3.msra.mxu0 %v6486_v16  ;;  %v2908_v16 = vld [vmem:[#allocation10 + $0x1f8] sm:$0xff] }
 0xa46   : > { %v2697_v38 = vpop.permute.xlu1 %2696 }
 0xa47   : > { %5261 = vmatprep.subr.mxu0 %v2697_v38 }
 0xa48   : > { %5262 = vmatpush3.msra.mxu0 %v2697_v38  ;;  %v2860_v38 = vld [vmem:[#allocation10 + $0x78] sm:$0xff] }
 0xa49   : > { %5263 = vmatprep.subr.mxu0 %v2688_v22 }
 0xa4a   : > { %5264 = vmatpush3.msra.mxu0 %v2688_v22  ;;  %v2693_v52 = vpop.permute.xlu1 %2692  ;;  %v2900_v22 = vld [vmem:[#allocation10 + $0x1b8] sm:$0xff] }
 0xa4b   : > { %5265 = vmatprep.subr.mxu0 %v2693_v52 }
 0xa4c   : > { %5266 = vmatpush3.msra.mxu0 %v2693_v52  ;;  %v2857_v52 = vld [vmem:[#allocation10 + $0x60] sm:$0xff] }
 0xa4d   : > { %5267 = vmatprep.subr.mxu0 %v6493_v25 }
 0xa4e   : > { %5268 = vmatpush3.msra.mxu0 %v6493_v25 }
 0xa4f   : > { %5270 = vmatmul.mubr.msk.f32.vlgmr.msra.gmra.mxu0 %vm2715_vm8, %v2708_v53  ;;  %3110 = vmatprep.subr.mxu0 %v2904_v54  ;;  %v2859_v53 = vld [vmem:[#allocation10 + $0x70] sm:$0xff] }
 0xa50   : > { %5272 = vmatprep.mubr.msk.f32.mxu0 %vm2715_vm8, %v2709_v55  ;;  %3111 = vmatpush1.msra.mxu0 %v2903_v56  ;;  %v2850_v55 = vld [vmem:[#allocation10 + $0x28] sm:$0xff]  ;;  %v2852_v56 = vld [vmem:[#allocation10 + $0x38] sm:$0xff] }
 0xa51   : > { %3112 = vmatprep.subr.mxu0 %v2896_v43  ;;  %v2849_v43 = vld [vmem:[#allocation10 + $0x20] sm:$0xff] }
 0xa52   : > { %3113 = vmatpush1.msra.mxu0 %v2895_v57  ;;  %v2851_v57 = vld [vmem:[#allocation10 + $0x30] sm:$0xff] }
 0xa53   : > { %5273 = vmatmul.mubr.msk.f32.gmra.mxu0 %vm2715_vm8, %v2710_v58  ;;  %3114 = vmatprep.subr.mxu0 %v2888_v8 }
 0xa54   : > { %5275 = vmatprep.mubr.msk.f32.mxu0 %vm2715_vm8, %v2711_v59  ;;  %3115 = vmatpush1.msra.mxu0 %v2887_v60 }
 0xa55   : > { %3116 = vmatprep.subr.mxu0 %v2880_v61 }
 0xa56   : > { %3117 = vmatpush1.msra.mxu0 %v2879_v62 }
 0xa57   : > { %5276 = vmatmul.mubr.msk.f32.gmra.mxu0 %vm2715_vm8, %v2712_v63  ;;  %3118 = vmatprep.subr.mxu0 %v2872_v1  ;;  %v6633_v61 = vpop.permute.xlu1 %2919 }
 0xa58   : > { %5278 = vmatprep.mubr.msk.f32.mxu0 %vm2715_vm8, %v2713_v2  ;;  %3119 = vmatpush1.msra.mxu0 %v2871_v3  ;;  %7960 = vst [vmem:[#allocation50_spill] sm:$0xff] %v6633_v61 }
 0xa59   : > { %3120 = vmatprep.subr.mxu0 %v2864_v4 }
 0xa5a   : > { %3121 = vmatpush1.msra.mxu0 %v2863_v5 }
 0xa5b   : > { %5279 = vmatmul.mubr.msk.f32.gmra.mxu0 %vm2715_vm8, %v2714_v6  ;;  %3122 = vmatprep.subr.mxu0 %v2856_v7  ;;  %v6635_v4 = vpop.permute.xlu1 %2924 }
 0xa5c   : > { %3158 = vmatprep.mubr.f32.mxu0 %v5928_v0  ;;  %3123 = vmatpush1.msra.mxu0 %v2855_v10  ;;  %7961 = vst [vmem:[#allocation51_spill] sm:$0xff] %v6635_v4 }
 0xa5d   : > { %3124 = vmatprep.subr.mxu0 %v2848_v12  ;;  %v6643_v12 = vstv %s5282_s2  ;;  %s7979_s2 = sld [smem:[#allocation45_spill]] }
 0xa5e   : > { %3125 = vmatpush1.msra.mxu0 %v2847_v14  ;;  %v6647_v14 = vstv %s5286_s13 }
 0xa5f   : > { %3336 = vmatprep.subr.mxu0 %v2908_v16  ;;  %v6649_v15 = vpop.permute.xlu1 %2934  ;;  %v6651_v16 = vstv %s5288_s6  ;;  %s7980_s6 = scalar_lea.vmem [#allocation12], %s6277_s16 }
 0xa60   : > { %7962 = vst [vmem:[#allocation52_spill] sm:$0xff] %v6649_v15 }
 0xa63   : > { %s7507_s13 = scalar_lea.hbm %s7979_s2, %s5049_s20  ;;  %s4748_s20 = scalar_lea.sflag [#allocation13], %s6277_s16 }
 0xb0f   : > { %v6529_v17 = vpop.f32.mrf.mxu0 }
 0xb11   : > { %v6531_v20 = vpop.f32.mrf.mxu0 }
 0xb12   : > { %5014 = vmatmul.mubr.msk.f32.vlgmr.msra.gmra.mxu1 %vm2715_vm8, %v6531_v20  ;;  %5022 = vmatmul.mubr.msk.f32.vlgmr.msra.gmra.mxu0 %vm2715_vm8, %v6531_v20 }
 0xb13   : > { %3224 = vmatpush1.msra.mxu1 %v2905_v18  ;;  %3337 = vmatpush1.msra.mxu0 %v2907_v19  ;;  %v6539_v25 = vpop.f32.mrf.mxu0  ;;  %v6655_v18 = vstv %s5292_s26  ;;  %s4981_s26 = sshll.u32 %s6277_s16, 8 }
 0xb14   : > { %3051 = vmatprep.mubr.f32.mxu1 %v5928_v0  ;;  %3164 = vmatprep.mubr.f32.mxu0 %v5928_v0 }
 0xb15   : > { %3225 = vmatprep.subr.mxu1 %v2898_v21  ;;  %3338 = vmatprep.subr.mxu0 %v2900_v22  ;;  %v6547_v31 = vpop.f32.mrf.mxu0 }
 0xb16   : > { %5015 = vmatmul.mubr.msk.f32.gmra.mxu1 %vm2715_vm8, %v6529_v17  ;;  %5023 = vmatmul.mubr.msk.f32.gmra.mxu0 %vm2715_vm8, %v6529_v17 }
 0xb17   : > { %3226 = vmatpush1.msra.mxu1 %v2897_v23  ;;  %3339 = vmatpush1.msra.mxu0 %v2899_v24  ;;  %v6555_v37 = vpop.f32.mrf.mxu0 }
 0xb18   : > { %3057 = vmatprep.mubr.f32.mxu1 %v5928_v0  ;;  %3170 = vmatprep.mubr.f32.mxu0 %v5928_v0 }
 0xb19   : > { %3227 = vmatprep.subr.mxu1 %v2890_v26  ;;  %3340 = vmatprep.subr.mxu0 %v2892_v27  ;;  %v6563_v45 = vpop.f32.mrf.mxu0 }
 0xb1a   : > { %5016 = vmatmul.mubr.msk.f32.gmra.mxu1 %vm2715_vm8, %v6547_v31  ;;  %5024 = vmatmul.mubr.msk.f32.gmra.mxu0 %vm2715_vm8, %v6547_v31 }
 0xb1b   : > { %3228 = vmatpush1.msra.mxu1 %v2889_v28  ;;  %3341 = vmatpush1.msra.mxu0 %v2891_v30  ;;  %v6571_v50 = vpop.f32.mrf.mxu0 }
 0xb1c   : > { %3063 = vmatprep.mubr.f32.mxu1 %v5928_v0  ;;  %3176 = vmatprep.mubr.f32.mxu0 %v5928_v0 }
 0xb1d   : > { %3229 = vmatprep.subr.mxu1 %v2882_v32  ;;  %3342 = vmatprep.subr.mxu0 %v2884_v34  ;;  %v2836_v54 = vpop.f32.mrf.mxu0 }
 0xb1e   : > { %5017 = vmatmul.mubr.msk.f32.gmra.mxu1 %vm2715_vm8, %v6539_v25  ;;  %5025 = vmatmul.mubr.msk.f32.gmra.mxu0 %vm2715_vm8, %v6539_v25 }
 0xb1f   : > { %3230 = vmatpush1.msra.mxu1 %v2881_v35  ;;  %3343 = vmatpush1.msra.mxu0 %v2883_v36 }
 0xb20   : > { %3069 = vmatprep.mubr.f32.mxu1 %v5928_v0  ;;  %3182 = vmatprep.mubr.f32.mxu0 %v5928_v0 }
 0xb21   : > { %3231 = vmatprep.subr.mxu1 %v2874_v39  ;;  %3344 = vmatprep.subr.mxu0 %v2876_v40 }
 0xb22   : > { %5018 = vmatmul.mubr.msk.f32.gmra.mxu1 %vm2715_vm8, %v6563_v45  ;;  %5026 = vmatmul.mubr.msk.f32.gmra.mxu0 %vm2715_vm8, %v6563_v45 }
 0xb23   : > { %3232 = vmatpush1.msra.mxu1 %v2873_v41  ;;  %3345 = vmatpush1.msra.mxu0 %v2875_v42 }
 0xb24   : > { %3075 = vmatprep.mubr.f32.mxu1 %v5928_v0  ;;  %3188 = vmatprep.mubr.f32.mxu0 %v5928_v0 }
 0xb25   : > { %3233 = vmatprep.subr.mxu1 %v2866_v46  ;;  %3346 = vmatprep.subr.mxu0 %v2868_v47  ;;  %v6682_v47 = vpop.permute.xlu1 %2944 }
 0xb26   : > { %5019 = vmatmul.mubr.msk.f32.gmra.mxu1 %vm2715_vm8, %v6555_v37  ;;  %5027 = vmatmul.mubr.msk.f32.gmra.mxu0 %vm2715_vm8, %v6555_v37  ;;  %7963 = vst [vmem:[#allocation53_spill] sm:$0xff] %v6682_v47 }
 0xb27   : > { %3234 = vmatpush1.msra.mxu1 %v2865_v48  ;;  %3347 = vmatpush1.msra.mxu0 %v2867_v49 }
 0xb28   : > { %3081 = vmatprep.mubr.f32.mxu1 %v5928_v0  ;;  %3194 = vmatprep.mubr.f32.mxu0 %v5928_v0 }
 0xb29   : > { %3235 = vmatprep.subr.mxu1 %v2858_v51  ;;  %3348 = vmatprep.subr.mxu0 %v2860_v38 }
 0xb2a   : > { %5020 = vmatmul.mubr.msk.f32.gmra.mxu1 %vm2715_vm8, %v2836_v54  ;;  %5028 = vmatmul.mubr.msk.f32.gmra.mxu0 %vm2715_vm8, %v2836_v54 }
 0xb2b   : > { %3236 = vmatpush1.msra.mxu1 %v2857_v52  ;;  %3349 = vmatpush1.msra.mxu0 %v2859_v53 }
 0xb2c   : > { %3087 = vmatprep.mubr.f32.mxu1 %v5928_v0  ;;  %3200 = vmatprep.mubr.f32.mxu0 %v5928_v0 }
 0xb2d   : > { %3237 = vmatprep.subr.mxu1 %v2850_v55  ;;  %3350 = vmatprep.subr.mxu0 %v2852_v56 }
 0xb2e   : > { %5021 = vmatmul.mubr.msk.f32.gmra.mxu1 %vm2715_vm8, %v6571_v50  ;;  %5029 = vmatmul.mubr.msk.f32.gmra.mxu0 %vm2715_vm8, %v6571_v50 }
 0xb2f   : > { %3238 = vmatpush1.msra.mxu1 %v2849_v43  ;;  %3351 = vmatpush1.msra.mxu0 %v2851_v57 }
 0xb30   : > { %3271 = vmatprep.mubr.f32.mxu1 %v5928_v0  ;;  %3384 = vmatprep.mubr.f32.mxu0 %v5928_v0 }
 0xb32   : > { %5030 = vmatmul.mubr.msk.f32.vlgmr.msra.gmra.mxu1 %vm2715_vm8, %v6531_v20  ;;  %5038 = vmatmul.mubr.msk.f32.vlgmr.msra.gmra.mxu0 %vm2715_vm8, %v6531_v20 }
 0xb33   : > { %3277 = vmatprep.mubr.f32.mxu1 %v5928_v0  ;;  %3390 = vmatprep.mubr.f32.mxu0 %v5928_v0 }
 0xb36   : > { %5031 = vmatmul.mubr.msk.f32.gmra.mxu1 %vm2715_vm8, %v6529_v17  ;;  %5039 = vmatmul.mubr.msk.f32.gmra.mxu0 %vm2715_vm8, %v6529_v17  ;;  %v6653_v17 = vstv %s5290_s23  ;;  %s6918_s23 = scalar_lea.vmem [#allocation11], %s4981_s26  ;;  %s4776_s26 = sshll.u32 %s7980_s6, 4  ;;  %s7516_s26 = int_to_ptr.vmem [resolvable:$true] %s4776_s26 }
 0xb37   : > { %3283 = vmatprep.mubr.f32.mxu1 %v5928_v0  ;;  %3396 = vmatprep.mubr.f32.mxu0 %v5928_v0  ;;  %s5780_s6 = scalar_lea.vmem %s7516_s26, 16  ;;  %p5787_p3 = scmp.lt.s32.totalorder %s7516_s26, %s5785_s3 }
 0xb38   : > { %p5781_p5 = scmp.ne.s32.totalorder %s7516_s26, %s5780_s6  ;;  %p5788_p8 = scmp.lt.s32.totalorder %s5786_s4, %s5780_s6 }
 0xb3a   : > { %5032 = vmatmul.mubr.msk.f32.gmra.mxu1 %vm2715_vm8, %v6547_v31  ;;  %5040 = vmatmul.mubr.msk.f32.gmra.mxu0 %vm2715_vm8, %v6547_v31  ;;  %p5782_p9 = pnand %p5781_p5, %p7981_p4  ;;  %p5789_p0 = por %p5788_p8, %p5787_p3 }
 0xb3b   : > { %3289 = vmatprep.mubr.f32.mxu1 %v5928_v0  ;;  %3402 = vmatprep.mubr.f32.mxu0 %v5928_v0 }
 0xb3c   : > { %p5783_p13 = pneg %p5782_p9 }
 0xb3e   : > { %5033 = vmatmul.mubr.msk.f32.gmra.mxu1 %vm2715_vm8, %v6539_v25  ;;  %5041 = vmatmul.mubr.msk.f32.gmra.mxu0 %vm2715_vm8, %v6539_v25  ;;  %p5790_p11 = pnand %p5789_p0, %p5783_p13 }
 0xb3f   : > { %3295 = vmatprep.mubr.f32.mxu1 %v5928_v0  ;;  %3408 = vmatprep.mubr.f32.mxu0 %v5928_v0 }
 0xb42   : > { %5034 = vmatmul.mubr.msk.f32.gmra.mxu1 %vm2715_vm8, %v6563_v45  ;;  %5042 = vmatmul.mubr.msk.f32.gmra.mxu0 %vm2715_vm8, %v6563_v45 }
 0xb43   : > { %3301 = vmatprep.mubr.f32.mxu1 %v5928_v0  ;;  %3414 = vmatprep.mubr.f32.mxu0 %v5928_v0 }
 0xb46   : > { %5035 = vmatmul.mubr.msk.f32.gmra.mxu1 %vm2715_vm8, %v6555_v37  ;;  %5043 = vmatmul.mubr.msk.f32.gmra.mxu0 %vm2715_vm8, %v6555_v37 }
 0xb47   : > { %3307 = vmatprep.mubr.f32.mxu1 %v5928_v0  ;;  %3420 = vmatprep.mubr.f32.mxu0 %v5928_v0 }
 0xb4a   : > { %5036 = vmatmul.mubr.msk.f32.gmra.mxu1 %vm2715_vm8, %v2836_v54  ;;  %5044 = vmatmul.mubr.msk.f32.gmra.mxu0 %vm2715_vm8, %v2836_v54 }
 0xb4b   : > { %3313 = vmatprep.mubr.f32.mxu1 %v5928_v0  ;;  %3426 = vmatprep.mubr.f32.mxu0 %v5928_v0 }
 0xb4e   : > { %5037 = vmatmul.mubr.msk.f32.gmra.mxu1 %vm2715_vm8, %v6571_v50  ;;  %5045 = vmatmul.mubr.msk.f32.gmra.mxu0 %vm2715_vm8, %v6571_v50 }
 0xbd2   : > { %v3047_v58 = vpop.f32.mrf.mxu1  ;;  %v3160_v8 = vpop.f32.mrf.mxu0 }
 0xbd3   : > { %v3048_v19 = vadd.f32 %v3047_v58, %v6633_v61  ;;  %v3161_v22 = vadd.f32 %v3160_v8, %v6633_v61 }
 0xbd4   : > { %v3049_v59 = vpop.f32.mrf.mxu1  ;;  %v3162_v60 = vpop.f32.mrf.mxu0 }
 0xbd5   : > { %v3050_v23 = vadd.f32 %v3049_v59, %v6633_v61  ;;  %v3163_v26 = vadd.f32 %v3162_v60, %v6633_v61 }
 0xbd6   : > { %v3053_v62 = vpop.f32.mrf.mxu1  ;;  %v3166_v63 = vpop.f32.mrf.mxu0 }
 0xbd7   : > { %v3054_v27 = vadd.f32 %v3053_v62, %v6635_v4  ;;  %v3167_v28 = vadd.f32 %v3166_v63, %v6635_v4 }
 0xbd8   : > { %v3055_v1 = vpop.f32.mrf.mxu1  ;;  %v3168_v2 = vpop.f32.mrf.mxu0 }
 0xbd9   : > { %v6666_v30 = vadd.f32 %v3055_v1, %v6635_v4  ;;  %v6671_v39 = vadd.f32 %v3168_v2, %v6635_v4 }
 0xbda   : > { %v3059_v0 = vpop.f32.mrf.mxu1  ;;  %v3172_v3 = vpop.f32.mrf.mxu0 }
 0xbdb   : > { %v6674_v40 = vadd.f32 %v3059_v0, %v6500_v29  ;;  %v6677_v41 = vadd.f32 %v3172_v3, %v6500_v29 }
 0xbdc   : > { %v3061_v5 = vpop.f32.mrf.mxu1  ;;  %v3174_v6 = vpop.f32.mrf.mxu0 }
 0xbdd   : > { %v6680_v42 = vadd.f32 %v3061_v5, %v6500_v29  ;;  %v6685_v38 = vadd.f32 %v3174_v6, %v6500_v29 }
 0xbde   : > { %v3065_v7 = vpop.f32.mrf.mxu1  ;;  %v6637_v9 = vpop.f32.mrf.mxu0 }
 0xbdf   : > { %v6688_v52 = vadd.f32 %v3065_v7, %v6649_v15 }
 0xbe0   : > { %v6639_v10 = vpop.f32.mrf.mxu1  ;;  %v6641_v11 = vpop.f32.mrf.mxu0 }
 0xbe2   : > { %v3071_v20 = vpop.f32.mrf.mxu1  ;;  %v3184_v21 = vpop.f32.mrf.mxu0 }
 0xbe3   : > { %v3072_v24 = vadd.f32 %v3071_v20, %v6503_v33  ;;  %v3185_v25 = vadd.f32 %v3184_v21, %v6503_v33 }
 0xbe4   : > { %v3073_v31 = vpop.f32.mrf.mxu1  ;;  %v3186_v32 = vpop.f32.mrf.mxu0 }
 0xbe5   : > { %v3465_v34 = vadd.f32 %v3072_v24, %v3048_v19  ;;  %v3467_v35 = vadd.f32 %v3185_v25, %v3161_v22  ;;  %v3074_v36 = vadd.f32 %v3073_v31, %v6503_v33  ;;  %v3187_v37 = vadd.f32 %v3186_v32, %v6503_v33 }
 0xbe6   : > { %v3077_v45 = vpop.f32.mrf.mxu1  ;;  %v3190_v46 = vpop.f32.mrf.mxu0 }
 0xbe7   : > { %v3497_v48 = vmul.f32 0.5, %v3465_v34  ;;  %v3499_v49 = vmul.f32 0.5, %v3467_v35  ;;  %v3466_v50 = vadd.f32 %v3074_v36, %v3050_v23  ;;  %v3468_v51 = vadd.f32 %v3187_v37, %v3163_v26 }
 0xbe8   : > { %v3078_v53 = vadd.f32 %v3077_v45, %v6682_v47  ;;  %v3191_v54 = vadd.f32 %v3190_v46, %v6682_v47  ;;  %v3079_v0 = vpop.f32.mrf.mxu1 }
 0xbe9   : > { %v6692_v55 = vsub.f32 %v3048_v19, %v3497_v48  ;;  %v6694_v56 = vsub.f32 %v3072_v24, %v3497_v48  ;;  %v6696_v43 = vsub.f32 %v3161_v22, %v3499_v49  ;;  %v6698_v57 = vsub.f32 %v3185_v25, %v3499_v49 }
 0xbea   : > { %v3498_v58 = vmul.f32 0.5, %v3466_v50  ;;  %v3500_v8 = vmul.f32 0.5, %v3468_v51  ;;  %v3473_v59 = vadd.f32 %v3078_v53, %v3054_v27  ;;  %v3475_v60 = vadd.f32 %v3191_v54, %v3167_v28 }
 0xbeb   : > { %v3593_v62 = vmul.f32 %v6692_v55, %v6692_v55  ;;  %v3657_v63 = vmul.f32 %v6694_v56, %v6694_v56  ;;  %v3595_v1 = vmul.f32 %v6696_v43, %v6696_v43  ;;  %v3659_v2 = vmul.f32 %v6698_v57, %v6698_v57 }
 0xbec   : > { %v6708_v3 = vsub.f32 %v3050_v23, %v3498_v58  ;;  %v6710_v5 = vsub.f32 %v3074_v36, %v3498_v58  ;;  %v6712_v6 = vsub.f32 %v3163_v26, %v3500_v8  ;;  %v6714_v7 = vsub.f32 %v3187_v37, %v3500_v8  ;;  %v3192_v36 = vpop.f32.mrf.mxu0  ;;  %v3083_v37 = vpop.f32.mrf.mxu1 }
 0xbed   : > { %v3689_v19 = vadd.f32 %v3657_v63, %v3593_v62  ;;  %v3691_v20 = vadd.f32 %v3659_v2, %v3595_v1  ;;  %v3505_v21 = vmul.f32 0.5, %v3473_v59  ;;  %v3507_v22 = vmul.f32 0.5, %v3475_v60 }
 0xbee   : > { %v3594_v24 = vmul.f32 %v6708_v3, %v6708_v3  ;;  %v3658_v25 = vmul.f32 %v6710_v5, %v6710_v5  ;;  %v3596_v23 = vmul.f32 %v6712_v6, %v6712_v6  ;;  %v3660_v31 = vmul.f32 %v6714_v7, %v6714_v7  ;;  %v3196_v63 = vpop.f32.mrf.mxu0  ;;  %v3085_v1 = vpop.f32.mrf.mxu1 }
 0xbef   : > { %v3721_v26 = vmul.f32 0.5, %v3689_v19  ;;  %v3723_v32 = vmul.f32 0.5, %v3691_v20  ;;  %v6724_v34 = vsub.f32 %v3054_v27, %v3505_v21  ;;  %v6726_v35 = vsub.f32 %v3078_v53, %v3505_v21 }
 0xbf0   : > { %v3690_v45 = vadd.f32 %v3658_v25, %v3594_v24  ;;  %v3692_v46 = vadd.f32 %v3660_v31, %v3596_v23  ;;  %v6728_v48 = vsub.f32 %v3167_v28, %v3507_v22  ;;  %v6730_v49 = vsub.f32 %v3191_v54, %v3507_v22 }
 0xbf1   : > { %v3753_v50 = vadd.f32 1e-06, %v3721_v26  ;;  %v3755_v51 = vadd.f32 1e-06, %v3723_v32  ;;  %v3601_v58 = vmul.f32 %v6724_v34, %v6724_v34  ;;  %v3665_v8 = vmul.f32 %v6726_v35, %v6726_v35 }
 0xbf2   : > { %v3722_v27 = vmul.f32 0.5, %v3690_v45  ;;  %v3724_v59 = vmul.f32 0.5, %v3692_v46  ;;  %v3603_v53 = vmul.f32 %v6728_v48, %v6728_v48  ;;  %v3667_v60 = vmul.f32 %v6730_v49, %v6730_v49 }
 0xbf3   : > { %5456 = vrsqrt.f32 %v3753_v50  ;;  %v3697_v28 = vadd.f32 %v3665_v8, %v3601_v58  ;;  %v3080_v54 = vadd.f32 %v3079_v0, %v6682_v47  ;;  %v3193_v62 = vadd.f32 %v3192_v36, %v6682_v47 }
 0xbf4   : > { %5458 = vrsqrt.f32 %v3755_v51  ;;  %v3754_v2 = vadd.f32 1e-06, %v3722_v27  ;;  %v3756_v19 = vadd.f32 1e-06, %v3724_v59  ;;  %v3699_v20 = vadd.f32 %v3667_v60, %v3603_v53 }
 0xbf5   : > { %v3729_v21 = vmul.f32 0.5, %v3697_v28  ;;  %v3474_v22 = vadd.f32 %v3080_v54, %v6666_v30  ;;  %v3476_v24 = vadd.f32 %v3193_v62, %v6671_v39  ;;  %v3084_v25 = vadd.f32 %v3083_v37, %v6506_v44 }
 0xbf6   : > { %5460 = vrsqrt.f32 %v3754_v2  ;;  %v3731_v23 = vmul.f32 0.5, %v3699_v20  ;;  %v3197_v31 = vadd.f32 %v3196_v63, %v6506_v44  ;;  %v3086_v0 = vadd.f32 %v3085_v1, %v6506_v44 }
 0xbf7   : > { %v6749_v26 = vadd.f32 %v6637_v9, %v6649_v15  ;;  %5462 = vrsqrt.f32 %v3756_v19  ;;  %v3506_v32 = vmul.f32 0.5, %v3474_v22  ;;  %v3508_v36 = vmul.f32 0.5, %v3476_v24 }
 0xbf8   : > { %v6753_v45 = vadd.f32 %v6639_v10, %v6649_v15  ;;  %v3481_v46 = vadd.f32 %v3084_v25, %v6674_v40  ;;  %v3483_v37 = vadd.f32 %v3197_v31, %v6677_v41  ;;  %v3482_v50 = vadd.f32 %v3086_v0, %v6680_v42 }
 0xbf9   : > { %7964 = vst [vmem:[#allocation54_spill] sm:$0xff] %v6749_v26  ;;  %v3761_v51 = vadd.f32 1e-06, %v3729_v21  ;;  %v6759_v58 = vsub.f32 %v6666_v30, %v3506_v32  ;;  %v6761_v8 = vsub.f32 %v3080_v54, %v3506_v32  ;;  %v6764_v9 = vsub.f32 %v6671_v39, %v3508_v36 }
 0xbfa   : > { %7965 = vst [vmem:[#allocation55_spill] sm:$0xff] %v6753_v45  ;;  %v3763_v27 = vadd.f32 1e-06, %v3731_v23  ;;  %v6766_v59 = vsub.f32 %v3193_v62, %v3508_v36  ;;  %v3513_v10 = vmul.f32 0.5, %v3481_v46  ;;  %v3515_v53 = vmul.f32 0.5, %v3483_v37 }
 0xbfb   : > { %v3602_v60 = vmul.f32 %v6759_v58, %v6759_v58  ;;  %v3666_v28 = vmul.f32 %v6761_v8, %v6761_v8  ;;  %v3604_v30 = vmul.f32 %v6764_v9, %v6764_v9  ;;  %v3514_v63 = vmul.f32 0.5, %v3482_v50  ;;  %v6811_v50 = vpop.permute.xlu1 %2954 }
 0xbfc   : > { %v3668_v54 = vmul.f32 %v6766_v59, %v6766_v59  ;;  %v6777_v39 = vsub.f32 %v6674_v40, %v3513_v10  ;;  %v6779_v62 = vsub.f32 %v3084_v25, %v3513_v10  ;;  %v6782_v1 = vsub.f32 %v6677_v41, %v3515_v53  ;;  %v3198_v25 = vpop.f32.mrf.mxu0 }
 0xbfd   : > { %v3698_v2 = vadd.f32 %v3666_v28, %v3602_v60  ;;  %v6784_v19 = vsub.f32 %v3197_v31, %v3515_v53  ;;  %v6787_v20 = vsub.f32 %v6680_v42, %v3514_v63  ;;  %v6789_v21 = vsub.f32 %v3086_v0, %v3514_v63  ;;  %v3089_v0 = vpop.f32.mrf.mxu1 }
 0xbfe   : > { %v6793_v22 = vadd.f32 %v6641_v11, %v6649_v15  ;;  %v3700_v24 = vadd.f32 %v3668_v54, %v3604_v30  ;;  %v3609_v40 = vmul.f32 %v6777_v39, %v6777_v39  ;;  %v3673_v41 = vmul.f32 %v6779_v62, %v6779_v62 }
 0xbff   : > { %7966 = vst [vmem:[#allocation56_spill] sm:$0xff] %v6789_v21  ;;  %5464 = vrsqrt.f32 %v3761_v51  ;;  %v3730_v23 = vmul.f32 0.5, %v3698_v2  ;;  %v3611_v42 = vmul.f32 %v6782_v1, %v6782_v1  ;;  %v3675_v31 = vmul.f32 %v6784_v19, %v6784_v19 }
 0xc00   : > { %7967 = vst [vmem:[#allocation57_spill] sm:$0xff] %v6793_v22  ;;  %v5457_v32 = vpop.eup %5456  ;;  %5466 = vrsqrt.f32 %v3763_v27  ;;  %v3732_v11 = vmul.f32 0.5, %v3700_v24  ;;  %v6805_v36 = vmul.f32 %v6787_v20, %v6787_v20  ;;  %v6809_v46 = vmul.f32 %v6789_v21, %v6789_v21 }
 0xc01   : > { %v5459_v37 = vpop.eup %5458  ;;  %v3817_v51 = vmul.f32 %v5457_v32, %v6692_v55  ;;  %v4211_v10 = vmul.f32 %v5457_v32, %v6694_v56  ;;  %v3705_v53 = vadd.f32 %v3673_v41, %v3609_v40  ;;  %v6816_v60 = vadd.f32 %v3198_v25, %v6506_v44 }
 0xc02   : > { %v3819_v27 = vmul.f32 %v5459_v37, %v6696_v43  ;;  %v4213_v28 = vmul.f32 %v5459_v37, %v6698_v57  ;;  %v3762_v30 = vadd.f32 1e-06, %v3730_v23  ;;  %v6821_v63 = vadd.f32 %v3089_v0, %v6811_v50 }
 0xc03   : > { %v5461_v54 = vpop.eup %5460  ;;  %v3854_v2 = vmul.f32 %v6643_v12, %v3817_v51  ;;  %v4248_v24 = vmul.f32 %v6647_v14, %v4211_v10  ;;  %v6825_v55 = vadd.f32 1e-06, %v3732_v11  ;;  %v3707_v56 = vadd.f32 %v3675_v31, %v3611_v42 }
 0xc04   : > { %v5463_v40 = vpop.eup %5462  ;;  %v3856_v41 = vmul.f32 %v6643_v12, %v3819_v27  ;;  %v4250_v25 = vmul.f32 %v6647_v14, %v4213_v28  ;;  %v3818_v43 = vmul.f32 %v5461_v54, %v6708_v3  ;;  %v4212_v57 = vmul.f32 %v5461_v54, %v6710_v5 }
 0xc05   : > { %v3891_v23 = vadd.f32 %v6645_v13, %v3854_v2  ;;  %v4285_v0 = vadd.f32 %v6651_v16, %v4248_v24  ;;  %v3820_v32 = vmul.f32 %v5463_v40, %v6712_v6  ;;  %v4214_v37 = vmul.f32 %v5463_v40, %v6714_v7 }
 0xc06   : > { %v3893_v11 = vadd.f32 %v6645_v13, %v3856_v41  ;;  %v4287_v42 = vadd.f32 %v6651_v16, %v4250_v25  ;;  %v3855_v31 = vmul.f32 %v6643_v12, %v3818_v43  ;;  %v4249_v51 = vmul.f32 %v6647_v14, %v4212_v57 }
 0xc07   : > { %v3955_v10 = vmul.f32 0.044715, %v3891_v23  ;;  %v4349_v3 = vmul.f32 0.044715, %v4285_v0  ;;  %5468 = vrsqrt.f32 %v3762_v30  ;;  %v6839_v5 = vmul.f32 0.5, %v3705_v53 }
 0xc08   : > { %v6841_v27 = vmul.f32 0.5, %v3891_v23  ;;  %v3957_v28 = vmul.f32 0.044715, %v3893_v11  ;;  %v4351_v54 = vmul.f32 0.044715, %v4287_v42  ;;  %v6843_v6 = vmul.f32 0.5, %v3707_v56 }
 0xc09   : > { %v3987_v7 = vmul.f32 %v3955_v10, %v3891_v23  ;;  %v4381_v2 = vmul.f32 %v4349_v3, %v4285_v0  ;;  %v3892_v24 = vadd.f32 %v6645_v13, %v3855_v31  ;;  %v4286_v40 = vadd.f32 %v6651_v16, %v4249_v51 }
 0xc0a   : > { %v3989_v41 = vmul.f32 %v3957_v28, %v3893_v11  ;;  %v4383_v25 = vmul.f32 %v4351_v54, %v4287_v42  ;;  %v3857_v43 = vmul.f32 %v6643_v12, %v3820_v32  ;;  %v4251_v30 = vmul.f32 %v6647_v14, %v4214_v37 }
 0xc0b   : > { %v4019_v53 = vmul.f32 %v3987_v7, %v3891_v23  ;;  %v6849_v57 = vmul.f32 0.5, %v4285_v0  ;;  %v4413_v44 = vmul.f32 %v4381_v2, %v4285_v0  ;;  %v3956_v47 = vmul.f32 0.044715, %v3892_v24 }
 0xc0c   : > { %v5465_v33 = vpop.eup %5464  ;;  %v6851_v56 = vmul.f32 0.5, %v3893_v11  ;;  %v4021_v10 = vmul.f32 %v3989_v41, %v3893_v11  ;;  %v4415_v3 = vmul.f32 %v4383_v25, %v4287_v42  ;;  %v4350_v15 = vmul.f32 0.044715, %v4286_v40 }
 0xc0d   : > { %v5467_v31 = vpop.eup %5466  ;;  %v4051_v29 = vadd.f32 %v4019_v53, %v3891_v23  ;;  %v4445_v51 = vadd.f32 %v4413_v44, %v4285_v0  ;;  %v3988_v28 = vmul.f32 %v3956_v47, %v3892_v24  ;;  %v3894_v54 = vadd.f32 %v6645_v13, %v3857_v43 }
 0xc0e   : > { %v4053_v32 = vadd.f32 %v4021_v10, %v3893_v11  ;;  %v4447_v4 = vadd.f32 %v4415_v3, %v4287_v42  ;;  %v4382_v37 = vmul.f32 %v4350_v15, %v4286_v40  ;;  %v4288_v7 = vadd.f32 %v6651_v16, %v4251_v30 }
 0xc0f   : > { %v4083_v61 = vmul.f32 0.7978846, %v4051_v29  ;;  %v4477_v2 = vmul.f32 0.7978846, %v4445_v51  ;;  %v6855_v22 = vmul.f32 0.5, %v4287_v42  ;;  %v4020_v45 = vmul.f32 %v3988_v28, %v3892_v24 }
 0xc10   : > { %v4085_v26 = vmul.f32 0.7978846, %v4053_v32  ;;  %v4479_v41 = vmul.f32 0.7978846, %v4447_v4  ;;  %v4414_v25 = vmul.f32 %v4382_v37, %v4286_v40  ;;  %v3958_v21 = vmul.f32 0.044715, %v3894_v54 }
 0xc11   : > { %5470 = vtanh.f32 %v4083_v61  ;;  %v6857_v23 = vmul.f32 0.5, %v3892_v24  ;;  %v4052_v44 = vadd.f32 %v4020_v45, %v3892_v24  ;;  %v4352_v47 = vmul.f32 0.044715, %v4288_v7 }
 0xc12   : > { %5472 = vtanh.f32 %v4477_v2  ;;  %v4446_v0 = vadd.f32 %v4414_v25, %v4286_v40  ;;  %v3990_v11 = vmul.f32 %v3958_v21, %v3894_v54  ;;  %v3825_v15 = vmul.f32 %v5465_v33, %v6724_v34 }
 0xc13   : > { %5474 = vtanh.f32 %v4085_v26  ;;  %v4084_v29 = vmul.f32 0.7978846, %v4052_v44  ;;  %v4384_v43 = vmul.f32 %v4352_v47, %v4288_v7  ;;  %v4219_v42 = vmul.f32 %v5465_v33, %v6726_v35 }
 0xc14   : > { %v5469_v30 = vpop.eup %5468  ;;  %5476 = vtanh.f32 %v4479_v41  ;;  %v4478_v4 = vmul.f32 0.7978846, %v4446_v0  ;;  %v4022_v53 = vmul.f32 %v3990_v11, %v3894_v54  ;;  %v3862_v61 = vmul.f32 %v6643_v12, %v3825_v15 }
 0xc15   : > { %5478 = vtanh.f32 %v4084_v29  ;;  %v4416_v10 = vmul.f32 %v4384_v43, %v4288_v7  ;;  %v4256_v45 = vmul.f32 %v6647_v14, %v4219_v42  ;;  %v3827_v24 = vmul.f32 %v5467_v31, %v6728_v48 }
 0xc16   : > { %5480 = vtanh.f32 %v4478_v4  ;;  %v4054_v21 = vadd.f32 %v4022_v53, %v3894_v54  ;;  %v3899_v34 = vadd.f32 %v6645_v13, %v3862_v61  ;;  %v4221_v26 = vmul.f32 %v5467_v31, %v6730_v49 }
 0xc17   : > { %v4448_v3 = vadd.f32 %v4416_v10, %v4288_v7  ;;  %v4293_v33 = vadd.f32 %v6651_v16, %v4256_v45  ;;  %v3864_v35 = vmul.f32 %v6643_v12, %v3827_v24  ;;  %v3826_v51 = vmul.f32 %v5469_v30, %v6759_v58 }
 0xc18   : > { %v6869_v28 = vmul.f32 0.5, %v4286_v40  ;;  %v4086_v32 = vmul.f32 0.7978846, %v4054_v21  ;;  %v3963_v37 = vmul.f32 0.044715, %v3899_v34  ;;  %v4258_v2 = vmul.f32 %v6647_v14, %v4221_v26 }
 0xc19   : > { %v6872_v48 = vmul.f32 0.5, %v3894_v54  ;;  %v4480_v41 = vmul.f32 0.7978846, %v4448_v3  ;;  %v4357_v25 = vmul.f32 0.044715, %v4293_v33  ;;  %v6875_v44 = vadd.f32 %v6645_v13, %v3864_v35 }
 0xc1a   : > { %5482 = vtanh.f32 %v4086_v32  ;;  %v3995_v49 = vmul.f32 %v3963_v37, %v3899_v34  ;;  %v6878_v31 = vadd.f32 %v6651_v16, %v4258_v2  ;;  %v3863_v58 = vmul.f32 %v6643_v12, %v3826_v51 }
 0xc1b   : > { %v6881_v40 = vmul.f32 0.5, %v4288_v7  ;;  %5484 = vtanh.f32 %v4480_v41  ;;  %v4389_v47 = vmul.f32 %v4357_v25, %v4293_v33  ;;  %v3965_v0 = vmul.f32 0.044715, %v6875_v44 }
 0xc1c   : > { %v6884_v54 = vmul.f32 0.5, %v3899_v34  ;;  %v4027_v11 = vmul.f32 %v3995_v49, %v3899_v34  ;;  %v4359_v15 = vmul.f32 0.044715, %v6878_v31  ;;  %v6888_v29 = vadd.f32 %v6645_v13, %v3863_v58 }
 0xc1d   : > { %v4421_v43 = vmul.f32 %v4389_v47, %v4293_v33  ;;  %v3997_v42 = vmul.f32 %v3965_v0, %v6875_v44  ;;  %v4220_v4 = vmul.f32 %v5469_v30, %v6761_v8  ;;  %5486 = vrsqrt.f32 %v6825_v55 }
 0xc1e   : > { %v5471_v7 = vpop.eup %5470  ;;  %v4059_v53 = vadd.f32 %v4027_v11, %v3899_v34  ;;  %v6893_v61 = vmul.f32 0.5, %v4293_v33  ;;  %v4391_v10 = vmul.f32 %v4359_v15, %v6878_v31  ;;  %v3964_v45 = vmul.f32 0.044715, %v6888_v29 }
 0xc1f   : > { %v5473_v24 = vpop.eup %5472  ;;  %v4147_v21 = vadd.f32 1.0, %v5471_v7  ;;  %v4453_v26 = vadd.f32 %v4421_v43, %v4293_v33  ;;  %v4029_v3 = vmul.f32 %v3997_v42, %v6875_v44  ;;  %v4257_v35 = vmul.f32 %v6647_v14, %v4220_v4 }
 0xc20   : > { %v5475_v51 = vpop.eup %5474  ;;  %v4541_v8 = vadd.f32 1.0, %v5473_v24  ;;  %v4091_v30 = vmul.f32 0.7978846, %v4059_v53  ;;  %v4423_v55 = vmul.f32 %v4391_v10, %v6878_v31  ;;  %v3996_v34 = vmul.f32 %v3964_v45, %v6888_v29 }
 0xc21   : > { %v5477_v32 = vpop.eup %5476  ;;  %v4179_v37 = vmul.f32 %v4147_v21, %v6841_v27  ;;  %v4149_v2 = vadd.f32 1.0, %v5475_v51  ;;  %v4485_v41 = vmul.f32 0.7978846, %v4453_v26  ;;  %v4061_v25 = vadd.f32 %v4029_v3, %v6875_v44 }
 0xc22   : > { %v5479_v49 = vpop.eup %5478  ;;  %v4573_v33 = vmul.f32 %v4541_v8, %v6849_v57  ;;  %v4543_v58 = vadd.f32 1.0, %v5477_v32  ;;  %5488 = vtanh.f32 %v4091_v30  ;;  %v4455_v47 = vadd.f32 %v4423_v55, %v6878_v31 }
 0xc23   : > { %v5481_v0 = vpop.eup %5480  ;;  %v4609_v11 = vmul.f32 %v6653_v17, %v4179_v37  ;;  %v4181_v15 = vmul.f32 %v4149_v2, %v6851_v56  ;;  %v4148_v43 = vadd.f32 1.0, %v5479_v49  ;;  %5490 = vtanh.f32 %v4485_v41 }
 0xc24   : > { %v4646_v27 = vmul.f32 %v6655_v18, %v4573_v33  ;;  %v4575_v42 = vmul.f32 %v4543_v58, %v6855_v22  ;;  %v4542_v4 = vadd.f32 1.0, %v5481_v0  ;;  %v4093_v7 = vmul.f32 0.7978846, %v4061_v25 }
 0xc25   : > { %v4611_v53 = vmul.f32 %v6653_v17, %v4181_v15  ;;  %v4180_v57 = vmul.f32 %v4148_v43, %v6857_v23  ;;  %v4487_v10 = vmul.f32 0.7978846, %v4455_v47  ;;  %v4028_v45 = vmul.f32 %v3996_v34, %v6888_v29 }
 0xc26   : > { %v4678_v24 = vadd.f32 %v4646_v27, %v4609_v11  ;;  %v4648_v21 = vmul.f32 %v6655_v18, %v4575_v42  ;;  %v4574_v56 = vmul.f32 %v4542_v4, %v6869_v28  ;;  %5492 = vtanh.f32 %v4093_v7 }
 0xc27   : > { %v5483_v26 = vpop.eup %5482  ;;  %v4610_v3 = vmul.f32 %v6653_v17, %v4180_v57  ;;  %5494 = vtanh.f32 %v4487_v10  ;;  %v4060_v22 = vadd.f32 %v4028_v45, %v6888_v29  ;;  %v4294_v51 = vadd.f32 %v6651_v16, %v4257_v35 }
 0xc28   : > { %v5485_v8 = vpop.eup %5484  ;;  %4710 = vst [vmem:[%s6918_s23] sm:$0xff] %v4678_v24  ;;  %v4680_v23 = vadd.f32 %v4648_v21, %v4611_v53  ;;  %v4647_v30 = vmul.f32 %v6655_v18, %v4574_v56  ;;  %v4150_v55 = vadd.f32 1.0, %v5483_v26  ;;  %v3769_v28 = vadd.f32 1e-06, %v6839_v5 }
 0xc29   : > { %v4544_v34 = vadd.f32 1.0, %v5485_v8  ;;  %v3933_v32 = vmul.f32 0.5, %v6875_v44  ;;  %v4092_v37 = vmul.f32 0.7978846, %v4060_v22  ;;  %v4358_v2 = vmul.f32 0.044715, %v4294_v51 }
 0xc2a   : > { %v5487_v41 = vpop.eup %5486  ;;  %4712 = vst [vmem:[%s6918_s23 + $0x10] sm:$0xff] %v4680_v23  ;;  %v4679_v35 = vadd.f32 %v4647_v30, %v4610_v3  ;;  %v4182_v25 = vmul.f32 %v4150_v55, %v6872_v48  ;;  %5496 = vrsqrt.f32 %v3769_v28  ;;  %v3771_v49 = vadd.f32 1e-06, %v6843_v6 }
 0xc2b   : > { %v4576_v33 = vmul.f32 %v4544_v34, %v6881_v40  ;;  %5498 = vtanh.f32 %v4092_v37  ;;  %v4390_v58 = vmul.f32 %v4358_v2, %v4294_v51  ;;  %v3828_v47 = vmul.f32 %v5487_v41, %v6764_v9 }
 0xc2c   : > { %4711 = vst [vmem:[%s6918_s23 + $0x8] sm:$0xff] %v4679_v35  ;;  %v4612_v5 = vmul.f32 %v6653_v17, %v4182_v25  ;;  %v4222_v44 = vmul.f32 %v5487_v41, %v6766_v59  ;;  %5500 = vrsqrt.f32 %v3771_v49  ;;  %v3706_v0 = vadd.f32 %v6809_v46, %v6805_v36 }
 0xc2d   : > { %v4649_v48 = vmul.f32 %v6655_v18, %v4576_v33  ;;  %v4422_v11 = vmul.f32 %v4390_v58, %v4294_v51  ;;  %v3865_v6 = vmul.f32 %v6643_v12, %v3828_v47  ;;  %v3484_v40 = vadd.f32 %v6816_v60, %v6685_v38 }
 0xc2e   : > { %v4327_v9 = vmul.f32 0.5, %v6878_v31  ;;  %v4259_v15 = vmul.f32 %v6647_v14, %v4222_v44  ;;  %v3738_v43 = vmul.f32 0.5, %v3706_v0  ;;  %v3489_v59 = vadd.f32 %v6821_v63, %v6688_v52 }
 0xc2f   : > { %v5489_v27 = vpop.eup %5488  ;;  %v4681_v42 = vadd.f32 %v4649_v48, %v4612_v5  ;;  %v4454_v36 = vadd.f32 %v4422_v11, %v4294_v51  ;;  %v6943_v46 = vadd.f32 %v6645_v13, %v3865_v6  ;;  %v3516_v4 = vmul.f32 0.5, %v3484_v40 }
 0xc30   : > { %v5491_v7 = vpop.eup %5490  ;;  %v4155_v53 = vadd.f32 1.0, %v5489_v27  ;;  %v3932_v57 = vmul.f32 0.5, %v6888_v29  ;;  %v6947_v10 = vadd.f32 %v6651_v16, %v4259_v15  ;;  %v3770_v31 = vadd.f32 1e-06, %v3738_v43 }
 0xc31   : > { %4713 = vst [vmem:[%s6918_s23 + $0x18] sm:$0xff] %v4681_v42  ;;  %v4549_v45 = vadd.f32 1.0, %v5491_v7  ;;  %v6950_v24 = vmul.f32 0.5, %v4294_v51  ;;  %v4486_v21 = vmul.f32 0.7978846, %v4454_v36  ;;  %v3521_v22 = vmul.f32 0.5, %v3489_v59  ;;  %v3202_v51 = vpop.f32.mrf.mxu0 }
 0xc32   : > { %v3966_v56 = vmul.f32 0.044715, %v6943_v46  ;;  %v4187_v26 = vmul.f32 %v4155_v53, %v6884_v54  ;;  %v4360_v3 = vmul.f32 0.044715, %v6947_v10  ;;  %5502 = vrsqrt.f32 %v3770_v31 }
 0xc33   : > { %v5493_v8 = vpop.eup %5492  ;;  %v4581_v29 = vmul.f32 %v4549_v45, %v6893_v61  ;;  %5504 = vtanh.f32 %v4486_v21  ;;  %v6958_v30 = vsub.f32 %v6685_v38, %v3516_v4  ;;  %v6963_v37 = vsub.f32 %v6816_v60, %v3516_v4 }
 0xc34   : > { %v3998_v23 = vmul.f32 %v3966_v56, %v6943_v46  ;;  %v5495_v55 = vpop.eup %5494  ;;  %v4617_v28 = vmul.f32 %v6653_v17, %v4187_v26  ;;  %v4157_v34 = vadd.f32 1.0, %v5493_v8  ;;  %v4392_v54 = vmul.f32 %v4360_v3, %v6947_v10 }
 0xc35   : > { %v4654_v2 = vmul.f32 %v6655_v18, %v4581_v29  ;;  %v4551_v41 = vadd.f32 1.0, %v5495_v55  ;;  %v3612_v35 = vmul.f32 %v6958_v30, %v6958_v30  ;;  %v3676_v49 = vmul.f32 %v6963_v37, %v6963_v37 }
 0xc36   : > { %v4030_v61 = vmul.f32 %v3998_v23, %v6943_v46  ;;  %v4189_v38 = vmul.f32 %v4157_v34, %v3933_v32  ;;  %v4424_v25 = vmul.f32 %v4392_v54, %v6947_v10  ;;  %v6973_v33 = vadd.f32 %v3202_v51, %v6811_v50  ;;  %v7968_v34 = vld [vmem:[#allocation56_spill] sm:$0xff]  ;;  %v3091_v54 = vpop.f32.mrf.mxu1 }
 0xc37   : > { %v5497_v60 = vpop.eup %5496  ;;  %v4686_v58 = vadd.f32 %v4654_v2, %v4617_v28  ;;  %v4583_v47 = vmul.f32 %v4551_v41, %v4327_v9  ;;  %v6977_v44 = vsub.f32 %v6688_v52, %v3521_v22  ;;  %v3708_v59 = vadd.f32 %v3676_v49, %v3612_v35  ;;  %v7012_v2 = vpop.f32.mrf.mxu0 }
 0xc38   : > { %v4062_v5 = vadd.f32 %v4030_v61, %v6943_v46  ;;  %v5499_v0 = vpop.eup %5498  ;;  %v4619_v48 = vmul.f32 %v6653_v17, %v4189_v38  ;;  %v4456_v32 = vadd.f32 %v4424_v25, %v6947_v10  ;;  %v3833_v11 = vmul.f32 %v5497_v60, %v6777_v39 }
 0xc39   : > { %v4227_v6 = vmul.f32 %v5497_v60, %v6779_v62  ;;  %v5501_v40 = vpop.eup %5500  ;;  %4718 = vst [vmem:[%s6918_s23 + $0x40] sm:$0xff] %v4686_v58  ;;  %v4656_v15 = vmul.f32 %v6655_v18, %v4583_v47  ;;  %v4156_v9 = vadd.f32 1.0, %v5499_v0  ;;  %v6994_v45 = vmul.f32 0.5, %v6943_v46 }
 0xc3a   : > { %v4094_v43 = vmul.f32 0.7978846, %v4062_v5  ;;  %v4488_v27 = vmul.f32 0.7978846, %v4456_v32  ;;  %v3870_v52 = vmul.f32 %v6643_v12, %v3833_v11  ;;  %v3835_v36 = vmul.f32 %v5501_v40, %v6782_v1 }
 0xc3b   : > { %v4264_v42 = vmul.f32 %v6647_v14, %v4227_v6  ;;  %v4688_v4 = vadd.f32 %v4656_v15, %v4619_v48  ;;  %v4188_v7 = vmul.f32 %v4156_v9, %v3932_v57  ;;  %v4229_v39 = vmul.f32 %v5501_v40, %v6784_v19  ;;  %v7026_v6 = vpop.f32.mrf.mxu1  ;;  %v7028_v40 = vpop.f32.mrf.mxu0 }
 0xc3c   : > { %5506 = vtanh.f32 %v4094_v43  ;;  %v3907_v62 = vadd.f32 %v6645_v13, %v3870_v52  ;;  %v3872_v31 = vmul.f32 %v6643_v12, %v3835_v36  ;;  %v3740_v56 = vmul.f32 0.5, %v3708_v59 }
 0xc3d   : > { %5508 = vtanh.f32 %v4488_v27  ;;  %v4301_v53 = vadd.f32 %v6651_v16, %v4264_v42  ;;  %4720 = vst [vmem:[%s6918_s23 + $0x50] sm:$0xff] %v4688_v4  ;;  %v4266_v21 = vmul.f32 %v6647_v14, %v4229_v39  ;;  %v6998_v1 = vsub.f32 %v6821_v63, %v3521_v22 }
 0xc3e   : > { %v4618_v57 = vmul.f32 %v6653_v17, %v4188_v7  ;;  %v7002_v19 = vmul.f32 0.5, %v6947_v10  ;;  %v3971_v26 = vmul.f32 0.044715, %v3907_v62  ;;  %v3909_v29 = vadd.f32 %v6645_v13, %v3872_v31 }
 0xc3f   : > { %v4365_v3 = vmul.f32 0.044715, %v4301_v53  ;;  %v5503_v8 = vpop.eup %5502  ;;  %v7006_v23 = vadd.f32 %v6651_v16, %v4266_v21  ;;  %v3772_v46 = vadd.f32 1e-06, %v3740_v56  ;;  %v3617_v51 = vmul.f32 %v6977_v44, %v6977_v44 }
 0xc40   : > { %v5505_v55 = vpop.eup %5504  ;;  %v4003_v63 = vmul.f32 %v3971_v26, %v3907_v62  ;;  %v3834_v28 = vmul.f32 %v5503_v8, %v6787_v20  ;;  %v4228_v10 = vmul.f32 %v5503_v8, %v7968_v34  ;;  %v7014_v61 = vmul.f32 0.5, %v3907_v62  ;;  %v7042_v26 = vpop.f32.mrf.mxu1  ;;  %v7969_v34 = vld [vmem:[#allocation54_spill] sm:$0xff] }
 0xc41   : > { %v4397_v22 = vmul.f32 %v4365_v3, %v4301_v53  ;;  %v4550_v41 = vadd.f32 1.0, %v5505_v55  ;;  %v3973_v35 = vmul.f32 0.044715, %v3909_v29  ;;  %v3681_v38 = vmul.f32 %v6998_v1, %v6998_v1 }
 0xc42   : > { %v4035_v25 = vmul.f32 %v4003_v63, %v3907_v62  ;;  %v4367_v60 = vmul.f32 0.044715, %v7006_v23  ;;  %v3871_v58 = vmul.f32 %v6643_v12, %v3834_v28  ;;  %v4265_v5 = vmul.f32 %v6647_v14, %v4228_v10 }
 0xc43   : > { %v4429_v49 = vmul.f32 %v4397_v22, %v4301_v53  ;;  %v4582_v20 = vmul.f32 %v4550_v41, %v6950_v24  ;;  %v4005_v47 = vmul.f32 %v3973_v35, %v3909_v29  ;;  %5510 = vrsqrt.f32 %v3772_v46 }
 0xc44   : > { %v4067_v0 = vadd.f32 %v4035_v25, %v3907_v62  ;;  %v4399_v32 = vmul.f32 %v4367_v60, %v7006_v23  ;;  %v7024_v11 = vadd.f32 %v6645_v13, %v3871_v58  ;;  %v7032_v24 = vadd.f32 %v6651_v16, %v4265_v5  ;;  %v7056_v25 = vpop.f32.mrf.mxu1 }
 0xc45   : > { %v4461_v48 = vadd.f32 %v4429_v49, %v4301_v53  ;;  %v4655_v15 = vmul.f32 %v6655_v18, %v4582_v20  ;;  %v4037_v9 = vmul.f32 %v4005_v47, %v3909_v29  ;;  %v3713_v43 = vadd.f32 %v3681_v38, %v3617_v51 }
 0xc46   : > { %v4099_v59 = vmul.f32 0.7978846, %v4067_v0  ;;  %v7034_v27 = vmul.f32 0.5, %v4301_v53  ;;  %v4431_v42 = vmul.f32 %v4399_v32, %v7006_v23  ;;  %v7037_v4 = vmul.f32 0.5, %v3909_v29  ;;  %v7044_v53 = vpop.f32.mrf.mxu0 }
 0xc47   : > { %v4493_v52 = vmul.f32 0.7978846, %v4461_v48  ;;  %v4687_v36 = vadd.f32 %v4655_v15, %v4618_v57  ;;  %v4069_v7 = vadd.f32 %v4037_v9, %v3909_v29  ;;  %v3972_v39 = vmul.f32 0.044715, %v7024_v11 }
 0xc48   : > { %5512 = vtanh.f32 %v4099_v59  ;;  %v4463_v31 = vadd.f32 %v4431_v42, %v7006_v23  ;;  %v4366_v21 = vmul.f32 0.044715, %v7032_v24  ;;  %v3745_v56 = vmul.f32 0.5, %v3713_v43  ;;  %v7058_v49 = vpop.f32.mrf.mxu0  ;;  %v7971_v42 = vld [vmem:[#allocation57_spill] sm:$0xff] }
 0xc49   : > { %v5507_v62 = vpop.eup %5506  ;;  %4719 = vst [vmem:[%s6918_s23 + $0x48] sm:$0xff] %v4687_v36  ;;  %5514 = vtanh.f32 %v4493_v52  ;;  %v4101_v57 = vmul.f32 0.7978846, %v4069_v7  ;;  %v4004_v29 = vmul.f32 %v3972_v39, %v7024_v11  ;;  %v3491_v10 = vadd.f32 %v6973_v33, %v7969_v34  ;;  %v7077_v7 = vpop.f32.mrf.mxu1 }
 0xc4a   : > { %v5509_v3 = vpop.eup %5508  ;;  %v4158_v8 = vadd.f32 1.0, %v5507_v62  ;;  %v4495_v51 = vmul.f32 0.7978846, %v4463_v31  ;;  %v4398_v55 = vmul.f32 %v4366_v21, %v7032_v24  ;;  %v3777_v63 = vadd.f32 1e-06, %v3745_v56 }
 0xc4b   : > { %v4552_v46 = vadd.f32 1.0, %v5509_v3  ;;  %5516 = vtanh.f32 %v4101_v57  ;;  %v4036_v28 = vmul.f32 %v4004_v29, %v7024_v11  ;;  %v3092_v38 = vadd.f32 %v3091_v54, %v6811_v50 }
 0xc4c   : > { %v4190_v22 = vmul.f32 %v4158_v8, %v6994_v45  ;;  %5518 = vtanh.f32 %v4495_v51  ;;  %v4430_v35 = vmul.f32 %v4398_v55, %v7032_v24  ;;  %v3523_v58 = vmul.f32 0.5, %v3491_v10  ;;  %v7105_v51 = vpop.f32.mrf.mxu1 }
 0xc4d   : > { %v4584_v41 = vmul.f32 %v4552_v46, %v7002_v19  ;;  %v4068_v45 = vadd.f32 %v4036_v28, %v7024_v11  ;;  %5520 = vrsqrt.f32 %v3777_v63  ;;  %v7970_v19 = vld [vmem:[#allocation55_spill] sm:$0xff]  ;;  %v3205_v0 = vadd.f32 %v7012_v2, %v6811_v50  ;;  %v7079_v2 = vpop.f32.mrf.mxu0  ;;  %v7972_v28 = vld [vmem:[#allocation50_spill] sm:$0xff] }
 0xc4e   : > { %v4620_v60 = vmul.f32 %v6653_v17, %v4190_v22  ;;  %v4462_v47 = vadd.f32 %v4430_v35, %v7032_v24  ;;  %v3490_v5 = vadd.f32 %v3092_v38, %v7970_v19  ;;  %v7068_v54 = vmul.f32 0.5, %v7006_v23 }
 0xc4f   : > { %v4657_v20 = vmul.f32 %v6655_v18, %v4584_v41  ;;  %v4100_v48 = vmul.f32 0.7978846, %v4068_v45  ;;  %v7071_v32 = vsub.f32 %v7969_v34, %v3523_v58  ;;  %v7074_v15 = vsub.f32 %v6973_v33, %v3523_v58  ;;  %v7107_v55 = vpop.f32.mrf.mxu0 }
 0xc50   : > { %v5511_v9 = vpop.eup %5510  ;;  %v4494_v59 = vmul.f32 0.7978846, %v4462_v47  ;;  %v3522_v52 = vmul.f32 0.5, %v3490_v5  ;;  %v3492_v36 = vadd.f32 %v3205_v0, %v7971_v42  ;;  %v7094_v56 = vmul.f32 0.5, %v7024_v11 }
 0xc51   : > { %v4689_v43 = vadd.f32 %v4657_v20, %v4620_v60  ;;  %5522 = vtanh.f32 %v4100_v48  ;;  %v3836_v23 = vmul.f32 %v5511_v9, %v6958_v30  ;;  %v4230_v39 = vmul.f32 %v5511_v9, %v6963_v37 }
 0xc52   : > { %v3619_v62 = vmul.f32 %v7071_v32, %v7071_v32  ;;  %5524 = vtanh.f32 %v4494_v59  ;;  %v3683_v33 = vmul.f32 %v7074_v15, %v7074_v15  ;;  %v7089_v31 = vsub.f32 %v7970_v19, %v3522_v52 }
 0xc53   : > { %4721 = vst [vmem:[%s6918_s23 + $0x58] sm:$0xff] %v4689_v43  ;;  %v7091_v21 = vsub.f32 %v3092_v38, %v3522_v52  ;;  %v3873_v30 = vmul.f32 %v6643_v12, %v3836_v23  ;;  %v4267_v37 = vmul.f32 %v6647_v14, %v4230_v39  ;;  %v3524_v3 = vmul.f32 0.5, %v3492_v36  ;;  %v7135_v43 = vpop.f32.mrf.mxu1 }
 0xc54   : > { %v7099_v8 = vmul.f32 0.5, %v7032_v24  ;;  %v3715_v57 = vadd.f32 %v3683_v33, %v3619_v62  ;;  %v3618_v29 = vmul.f32 %v7089_v31, %v7089_v31  ;;  %v7120_v34 = vadd.f32 %v7026_v6, %v7972_v28 }
 0xc55   : > { %v3682_v46 = vmul.f32 %v7091_v21, %v7091_v21  ;;  %v5513_v11 = vpop.eup %5512  ;;  %v7110_v63 = vadd.f32 %v6645_v13, %v3873_v30  ;;  %v7113_v22 = vadd.f32 %v6651_v16, %v4267_v37  ;;  %v7116_v24 = vsub.f32 %v7971_v42, %v3524_v3 }
 0xc56   : > { %v5515_v10 = vpop.eup %5514  ;;  %v4163_v41 = vadd.f32 1.0, %v5513_v11  ;;  %v3747_v35 = vmul.f32 0.5, %v3715_v57  ;;  %v7124_v60 = vadd.f32 %v7028_v40, %v7972_v28  ;;  %v7127_v20 = vsub.f32 %v3205_v0, %v3524_v3  ;;  %v7137_v40 = vpop.f32.mrf.mxu0 }
 0xc57   : > { %v3714_v38 = vadd.f32 %v3682_v46, %v3618_v29  ;;  %v4557_v45 = vadd.f32 1.0, %v5515_v10  ;;  %v3974_v58 = vmul.f32 0.044715, %v7110_v63  ;;  %v7131_v47 = vadd.f32 %v7042_v26, %v7972_v28  ;;  %v7152_v46 = vpop.f32.mrf.mxu1 }
 0xc58   : > { %v5517_v19 = vpop.eup %5516  ;;  %v4195_v6 = vmul.f32 %v4163_v41, %v7014_v61  ;;  %v4368_v5 = vmul.f32 0.044715, %v7113_v22  ;;  %v3779_v48 = vadd.f32 1e-06, %v3747_v35  ;;  %v3620_v26 = vmul.f32 %v7116_v24, %v7116_v24  ;;  %v7154_v11 = vpop.f32.mrf.mxu0 }
 0xc59   : > { %v3746_v9 = vmul.f32 0.5, %v3714_v38  ;;  %v5519_v59 = vpop.eup %5518  ;;  %v4589_v52 = vmul.f32 %v4557_v45, %v7034_v27  ;;  %v4165_v0 = vadd.f32 1.0, %v5517_v19  ;;  %v4006_v42 = vmul.f32 %v3974_v58, %v7110_v63 }
 0xc5a   : > { %v5521_v36 = vpop.eup %5520  ;;  %v4625_v61 = vmul.f32 %v6653_v17, %v4195_v6  ;;  %v4559_v23 = vadd.f32 1.0, %v5519_v59  ;;  %v4400_v39 = vmul.f32 %v4368_v5, %v7113_v22  ;;  %5526 = vrsqrt.f32 %v3779_v48 }
 0xc5b   : > { %v4662_v62 = vmul.f32 %v6655_v18, %v4589_v52  ;;  %v4197_v33 = vmul.f32 %v4165_v0, %v7037_v4  ;;  %v4038_v30 = vmul.f32 %v4006_v42, %v7110_v63  ;;  %v3841_v27 = vmul.f32 %v5521_v36, %v6977_v44  ;;  %v7167_v0 = vpop.f32.mrf.mxu1  ;;  %v7169_v42 = vpop.f32.mrf.mxu0 }
 0xc5c   : > { %v4591_v37 = vmul.f32 %v4559_v23, %v7068_v54  ;;  %v4432_v3 = vmul.f32 %v4400_v39, %v7113_v22  ;;  %v4235_v57 = vmul.f32 %v5521_v36, %v6998_v1  ;;  %v3778_v29 = vadd.f32 1e-06, %v3746_v9 }
 0xc5d   : > { %v4694_v10 = vadd.f32 %v4662_v62, %v4625_v61  ;;  %v4627_v41 = vmul.f32 %v6653_v17, %v4197_v33  ;;  %v4070_v4 = vadd.f32 %v4038_v30, %v7110_v63  ;;  %v3878_v35 = vmul.f32 %v6643_v12, %v3841_v27 }
 0xc5e   : > { %v5523_v44 = vpop.eup %5522  ;;  %v4664_v54 = vmul.f32 %v6655_v18, %v4591_v37  ;;  %v4464_v38 = vadd.f32 %v4432_v3, %v7113_v22  ;;  %v4272_v45 = vmul.f32 %v6647_v14, %v4235_v57  ;;  %5528 = vrsqrt.f32 %v3778_v29 }
 0xc5f   : > { %v5525_v1 = vpop.eup %5524  ;;  %4726 = vst [vmem:[%s6918_s23 + $0x80] sm:$0xff] %v4694_v10  ;;  %v4164_v58 = vadd.f32 1.0, %v5523_v44  ;;  %v4102_v19 = vmul.f32 0.7978846, %v4070_v4  ;;  %v3915_v6 = vadd.f32 %v6645_v13, %v3878_v35  ;;  %v3684_v5 = vmul.f32 %v7127_v20, %v7127_v20 }
 0xc60   : > { %v4696_v48 = vadd.f32 %v4664_v54, %v4627_v41  ;;  %v4558_v9 = vadd.f32 1.0, %v5525_v1  ;;  %v4496_v59 = vmul.f32 0.7978846, %v4464_v38  ;;  %v4309_v52 = vadd.f32 %v6651_v16, %v4272_v45  ;;  %v7973_v41 = vld [vmem:[#allocation51_spill] sm:$0xff] }
 0xc61   : > { %v4196_v36 = vmul.f32 %v4164_v58, %v7094_v56  ;;  %5530 = vtanh.f32 %v4102_v19  ;;  %v3979_v61 = vmul.f32 0.044715, %v3915_v6  ;;  %v7174_v23 = vadd.f32 %v7044_v53, %v7972_v28  ;;  %v7974_v58 = vld [vmem:[#allocation47_spill] sm:$0xff] }
 0xc62   : > { %4728 = vst [vmem:[%s6918_s23 + $0x90] sm:$0xff] %v4696_v48  ;;  %v4590_v39 = vmul.f32 %v4558_v9, %v7099_v8  ;;  %v7179_v62 = vmul.f32 0.5, %v7110_v63  ;;  %5532 = vtanh.f32 %v4496_v59  ;;  %v4373_v33 = vmul.f32 0.044715, %v4309_v52  ;;  %v3297_v8 = vpop.f32.mrf.mxu1  ;;  %v3410_v63 = vpop.f32.mrf.mxu0 }
 0xc63   : > { %v4626_v30 = vmul.f32 %v6653_v17, %v4196_v36  ;;  %v7183_v27 = vmul.f32 0.5, %v7113_v22  ;;  %v4011_v56 = vmul.f32 %v3979_v61, %v3915_v6  ;;  %v3716_v37 = vadd.f32 %v3684_v5, %v3620_v26  ;;  %v7976_v36 = vld [vmem:[#allocation48_spill] sm:$0xff] }
 0xc64   : > { %v4663_v3 = vmul.f32 %v6655_v18, %v4590_v39  ;;  %v7186_v57 = vmul.f32 0.5, %v3915_v6  ;;  %v7188_v53 = vmul.f32 0.5, %v4309_v52  ;;  %v4405_v28 = vmul.f32 %v4373_v33, %v4309_v52  ;;  %v3412_v48 = vpop.f32.mrf.mxu0 }
 0xc65   : > { %v4043_v29 = vmul.f32 %v4011_v56, %v3915_v6  ;;  %v3748_v10 = vmul.f32 0.5, %v3716_v37  ;;  %v7192_v4 = vadd.f32 %v7056_v25, %v7973_v41  ;;  %v7196_v22 = vadd.f32 %v7058_v49, %v7973_v41 }
 0xc66   : > { %v4695_v26 = vadd.f32 %v4663_v3, %v4626_v30  ;;  %v4437_v35 = vmul.f32 %v4405_v28, %v4309_v52  ;;  %v7200_v44 = vadd.f32 %v7077_v7, %v7973_v41  ;;  %v7204_v54 = vadd.f32 %v7079_v2, %v7973_v41 }
 0xc67   : > { %v5527_v38 = vpop.eup %5526  ;;  %v4075_v45 = vadd.f32 %v4043_v29, %v3915_v6  ;;  %v3780_v1 = vadd.f32 1e-06, %v3748_v10  ;;  %v7208_v25 = vadd.f32 %v7105_v51, %v7974_v58  ;;  %v7212_v49 = vadd.f32 %v7107_v55, %v7974_v58  ;;  %v3299_v6 = vpop.f32.mrf.mxu1  ;;  %v7975_v55 = vld [vmem:[#allocation52_spill] sm:$0xff] }
 0xc68   : > { %4727 = vst [vmem:[%s6918_s23 + $0x88] sm:$0xff] %v4695_v26  ;;  %v4469_v19 = vadd.f32 %v4437_v35, %v4309_v52  ;;  %v3843_v7 = vmul.f32 %v5527_v38, %v7071_v32  ;;  %v4237_v5 = vmul.f32 %v5527_v38, %v7074_v15  ;;  %v7219_v2 = vadd.f32 %v7135_v43, %v7974_v58 }
 0xc69   : > { %v4107_v9 = vmul.f32 0.7978846, %v4075_v45  ;;  %5534 = vrsqrt.f32 %v3780_v1  ;;  %v7223_v51 = vadd.f32 %v7137_v40, %v7974_v58  ;;  %v7227_v59 = vadd.f32 %v7152_v46, %v7975_v55 }
 0xc6a   : > { %v4501_v52 = vmul.f32 0.7978846, %v4469_v19  ;;  %v3880_v32 = vmul.f32 %v6643_v12, %v3843_v7  ;;  %v4274_v15 = vmul.f32 %v6647_v14, %v4237_v5  ;;  %v3298_v43 = vadd.f32 %v3297_v8, %v7976_v36 }
 0xc6b   : > { %v5529_v61 = vpop.eup %5528  ;;  %5536 = vtanh.f32 %v4107_v9  ;;  %v3411_v39 = vadd.f32 %v3410_v63, %v7976_v36  ;;  %v7234_v33 = vadd.f32 %v3299_v6, %v7976_v36  ;;  %v7237_v40 = vadd.f32 %v3412_v48, %v7976_v36 }
 0xc6c   : > { %5538 = vtanh.f32 %v4501_v52  ;;  %v3917_v46 = vadd.f32 %v6645_v13, %v3880_v32  ;;  %v4311_v30 = vadd.f32 %v6651_v16, %v4274_v15  ;;  %v3842_v56 = vmul.f32 %v5529_v61, %v7089_v31 }
 0xc6d   : > { %v4236_v37 = vmul.f32 %v5529_v61, %v7091_v21  ;;  %v3469_v3 = vadd.f32 %v3298_v43, %v7120_v34  ;;  %v3471_v28 = vadd.f32 %v3411_v39, %v7124_v60  ;;  %v7247_v8 = vadd.f32 %v7234_v33, %v7131_v47 }
 0xc6e   : > { %v5531_v63 = vpop.eup %5530  ;;  %v7249_v29 = vmul.f32 0.5, %v3917_v46  ;;  %v3981_v10 = vmul.f32 0.044715, %v3917_v46  ;;  %v7251_v41 = vmul.f32 0.5, %v4311_v30  ;;  %v4375_v26 = vmul.f32 0.044715, %v4311_v30 }
 0xc6f   : > { %v5533_v35 = vpop.eup %5532  ;;  %v4166_v38 = vadd.f32 1.0, %v5531_v63  ;;  %v3879_v31 = vmul.f32 %v6643_v12, %v3842_v56  ;;  %v4273_v21 = vmul.f32 %v6647_v14, %v4236_v37  ;;  %v3501_v45 = vmul.f32 0.5, %v3469_v3 }
 0xc70   : > { %v4560_v1 = vadd.f32 1.0, %v5533_v35  ;;  %v4013_v58 = vmul.f32 %v3981_v10, %v3917_v46  ;;  %v4407_v19 = vmul.f32 %v4375_v26, %v4311_v30  ;;  %v3503_v7 = vmul.f32 0.5, %v3471_v28 }
 0xc71   : > { %v4198_v5 = vmul.f32 %v4166_v38, %v7179_v62  ;;  %v3916_v6 = vadd.f32 %v6645_v13, %v3879_v31  ;;  %v4310_v48 = vadd.f32 %v6651_v16, %v4273_v21  ;;  %v7259_v9 = vsub.f32 %v7120_v34, %v3501_v45 }
 0xc72   : > { %v4592_v52 = vmul.f32 %v4560_v1, %v7183_v27  ;;  %v4045_v32 = vmul.f32 %v4013_v58, %v3917_v46  ;;  %v4439_v15 = vmul.f32 %v4407_v19, %v4311_v30  ;;  %v7262_v36 = vsub.f32 %v3298_v43, %v3501_v45 }
 0xc73   : > { %v4628_v61 = vmul.f32 %v6653_v17, %v4198_v5  ;;  %v7265_v56 = vmul.f32 0.5, %v3916_v6  ;;  %v3980_v37 = vmul.f32 0.044715, %v3916_v6  ;;  %v7267_v3 = vmul.f32 0.5, %v4310_v48 }
 0xc74   : > { %v4665_v62 = vmul.f32 %v6655_v18, %v4592_v52  ;;  %v4077_v28 = vadd.f32 %v4045_v32, %v3917_v46  ;;  %v4471_v63 = vadd.f32 %v4439_v15, %v4311_v30  ;;  %v4374_v34 = vmul.f32 0.044715, %v4310_v48 }
 0xc75   : > { %v4012_v10 = vmul.f32 %v3980_v37, %v3916_v6  ;;  %v3597_v27 = vmul.f32 %v7259_v9, %v7259_v9  ;;  %v3661_v43 = vmul.f32 %v7262_v36, %v7262_v36  ;;  %v7275_v26 = vsub.f32 %v7124_v60, %v3503_v7 }
 0xc76   : > { %v5535_v35 = vpop.eup %5534  ;;  %v4697_v38 = vadd.f32 %v4665_v62, %v4628_v61  ;;  %v4109_v31 = vmul.f32 0.7978846, %v4077_v28  ;;  %v4503_v21 = vmul.f32 0.7978846, %v4471_v63  ;;  %v4406_v45 = vmul.f32 %v4374_v34, %v4310_v48 }
 0xc77   : > { %v4044_v1 = vmul.f32 %v4012_v10, %v3916_v6  ;;  %v3844_v46 = vmul.f32 %v5535_v35, %v7116_v24  ;;  %v4238_v30 = vmul.f32 %v5535_v35, %v7127_v20  ;;  %v3693_v58 = vadd.f32 %v3661_v43, %v3597_v27 }
 0xc78   : > { %v5537_v19 = vpop.eup %5536  ;;  %4729 = vst [vmem:[%s6918_s23 + $0x98] sm:$0xff] %v4697_v38  ;;  %5540 = vtanh.f32 %v4109_v31  ;;  %v4438_v5 = vmul.f32 %v4406_v45, %v4310_v48  ;;  %v7280_v52 = vsub.f32 %v3411_v39, %v3503_v7  ;;  %v3599_v60 = vmul.f32 %v7275_v26, %v7275_v26  ;;  %v3303_v31 = vpop.f32.mrf.mxu1 }
 0xc79   : > { %v5539_v32 = vpop.eup %5538  ;;  %v4171_v15 = vadd.f32 1.0, %v5537_v19  ;;  %5542 = vtanh.f32 %v4503_v21  ;;  %v4076_v61 = vadd.f32 %v4044_v1, %v3916_v6  ;;  %v3881_v37 = vmul.f32 %v6643_v12, %v3844_v46 }
 0xc7a   : > { %v4565_v62 = vadd.f32 1.0, %v5539_v32  ;;  %v4470_v24 = vadd.f32 %v4438_v5, %v4310_v48  ;;  %v4275_v20 = vmul.f32 %v6647_v14, %v4238_v30  ;;  %v3725_v28 = vmul.f32 0.5, %v3693_v58  ;;  %v3416_v30 = vpop.f32.mrf.mxu0  ;;  %v7977_v32 = vld [vmem:[#allocation53_spill] sm:$0xff] }
 0xc7b   : > { %v4203_v63 = vmul.f32 %v4171_v15, %v7186_v57  ;;  %v4108_v34 = vmul.f32 0.7978846, %v4076_v61  ;;  %v3918_v39 = vadd.f32 %v6645_v13, %v3881_v37  ;;  %v3663_v7 = vmul.f32 %v7280_v52, %v7280_v52 }
 0xc7c   : > { %v4597_v10 = vmul.f32 %v4565_v62, %v7188_v53  ;;  %v4502_v27 = vmul.f32 0.7978846, %v4470_v24  ;;  %v4312_v6 = vadd.f32 %v6651_v16, %v4275_v20  ;;  %v3757_v43 = vadd.f32 1e-06, %v3725_v28 }
 0xc7d   : > { %v4633_v35 = vmul.f32 %v6653_v17, %v4203_v63  ;;  %5544 = vtanh.f32 %v4108_v34  ;;  %v7293_v48 = vmul.f32 0.5, %v3918_v39  ;;  %v3982_v38 = vmul.f32 0.044715, %v3918_v39 }
 0xc7e   : > { %v4670_v57 = vmul.f32 %v6655_v18, %v4597_v10  ;;  %5546 = vtanh.f32 %v4502_v27  ;;  %v7296_v21 = vmul.f32 0.5, %v4312_v6  ;;  %v4376_v45 = vmul.f32 0.044715, %v4312_v6 }
 0xc7f   : > { %v4014_v1 = vmul.f32 %v3982_v38, %v3918_v39  ;;  %5548 = vrsqrt.f32 %v3757_v43  ;;  %v3695_v53 = vadd.f32 %v3663_v7, %v3599_v60  ;;  %v3502_v46 = vmul.f32 0.5, %v7247_v8 }
 0xc80   : > { %v4702_v58 = vadd.f32 %v4670_v57, %v4633_v35  ;;  %v4408_v19 = vmul.f32 %v4376_v45, %v4312_v6  ;;  %v3472_v5 = vadd.f32 %v7237_v40, %v7174_v23  ;;  %v3304_v15 = vadd.f32 %v3303_v31, %v7977_v32 }
 0xc81   : > { %v4046_v61 = vmul.f32 %v4014_v1, %v3918_v39  ;;  %v3727_v37 = vmul.f32 0.5, %v3695_v53  ;;  %v7303_v62 = vsub.f32 %v7131_v47, %v3502_v46  ;;  %v7306_v24 = vsub.f32 %v7234_v33, %v3502_v46 }
 0xc82   : > { %4734 = vst [vmem:[%s6918_s23 + $0xc0] sm:$0xff] %v4702_v58  ;;  %v4440_v60 = vmul.f32 %v4408_v19, %v4312_v6  ;;  %v3504_v20 = vmul.f32 0.5, %v3472_v5  ;;  %v3477_v8 = vadd.f32 %v3304_v15, %v7192_v4  ;;  %v3417_v28 = vadd.f32 %v3416_v30, %v7977_v32  ;;  %v3305_v30 = vpop.f32.mrf.mxu1 }
 0xc83   : > { %v4078_v63 = vadd.f32 %v4046_v61, %v3918_v39  ;;  %v3759_v34 = vadd.f32 1e-06, %v3727_v37  ;;  %v3598_v7 = vmul.f32 %v7303_v62, %v7303_v62  ;;  %v3662_v10 = vmul.f32 %v7306_v24, %v7306_v24 }
 0xc84   : > { %v4472_v47 = vadd.f32 %v4440_v60, %v4312_v6  ;;  %v7316_v27 = vsub.f32 %v7174_v23, %v3504_v20  ;;  %v7319_v33 = vsub.f32 %v7237_v40, %v3504_v20  ;;  %v3509_v43 = vmul.f32 0.5, %v3477_v8 }
 0xc85   : > { %v5541_v35 = vpop.eup %5540  ;;  %v4110_v38 = vmul.f32 0.7978846, %v4078_v63  ;;  %5550 = vrsqrt.f32 %v3759_v34  ;;  %v3694_v31 = vadd.f32 %v3662_v10, %v3598_v7  ;;  %v3479_v39 = vadd.f32 %v3417_v28, %v7196_v22 }
 0xc86   : > { %v5543_v57 = vpop.eup %5542  ;;  %v4173_v45 = vadd.f32 1.0, %v5541_v35  ;;  %v4504_v1 = vmul.f32 0.7978846, %v4472_v47  ;;  %v3600_v53 = vmul.f32 %v7316_v27, %v7316_v27  ;;  %v3664_v23 = vmul.f32 %v7319_v33, %v7319_v33 }
 0xc87   : > { %v4567_v6 = vadd.f32 1.0, %v5543_v57  ;;  %5552 = vtanh.f32 %v4110_v38  ;;  %v3726_v40 = vmul.f32 0.5, %v3694_v31  ;;  %v7327_v46 = vsub.f32 %v7192_v4, %v3509_v43 }
 0xc88   : > { %v4205_v58 = vmul.f32 %v4173_v45, %v7249_v29  ;;  %5554 = vtanh.f32 %v4504_v1  ;;  %v3696_v19 = vadd.f32 %v3664_v23, %v3600_v53  ;;  %v7330_v5 = vsub.f32 %v3304_v15, %v3509_v43  ;;  %v3418_v53 = vpop.f32.mrf.mxu0 }
 0xc89   : > { %v4599_v61 = vmul.f32 %v4567_v6, %v7251_v41  ;;  %v3758_v37 = vadd.f32 1e-06, %v3726_v40  ;;  %v3605_v60 = vmul.f32 %v7327_v46, %v7327_v46  ;;  %v3511_v20 = vmul.f32 0.5, %v3479_v39  ;;  %v3309_v40 = vpop.f32.mrf.mxu1 }
 0xc8a   : > { %v5545_v8 = vpop.eup %5544  ;;  %v4635_v63 = vmul.f32 %v6653_v17, %v4205_v58  ;;  %v3728_v34 = vmul.f32 0.5, %v3696_v19  ;;  %v3669_v4 = vmul.f32 %v7330_v5, %v7330_v5  ;;  %v3306_v29 = vadd.f32 %v3305_v30, %v7977_v32 }
 0xc8b   : > { %v5547_v7 = vpop.eup %5546  ;;  %v4672_v15 = vmul.f32 %v6655_v18, %v4599_v61  ;;  %v4172_v10 = vadd.f32 1.0, %v5545_v8  ;;  %5556 = vrsqrt.f32 %v3758_v37  ;;  %v7341_v41 = vsub.f32 %v7196_v22, %v3511_v20 }
 0xc8c   : > { %v5549_v47 = vpop.eup %5548  ;;  %v4566_v43 = vadd.f32 1.0, %v5547_v7  ;;  %v3760_v35 = vadd.f32 1e-06, %v3728_v34  ;;  %v3701_v38 = vadd.f32 %v3669_v4, %v3605_v60  ;;  %v7343_v31 = vsub.f32 %v3417_v28, %v3511_v20  ;;  %v7978_v20 = vld [vmem:[#allocation49_spill] sm:$0xff] }
 0xc8d   : > { %v4704_v39 = vadd.f32 %v4672_v15, %v4635_v63  ;;  %v4204_v57 = vmul.f32 %v4172_v10, %v7265_v56  ;;  %v3821_v45 = vmul.f32 %v5549_v47, %v7259_v9  ;;  %v4215_v1 = vmul.f32 %v5549_v47, %v7262_v36 }
 0xc8e   : > { %v4598_v23 = vmul.f32 %v4566_v43, %v7267_v3  ;;  %5558 = vrsqrt.f32 %v3760_v35  ;;  %v3733_v22 = vmul.f32 0.5, %v3701_v38  ;;  %v3607_v6 = vmul.f32 %v7341_v41, %v7341_v41 }
 0xc8f   : > { %4736 = vst [vmem:[%s6918_s23 + $0xd0] sm:$0xff] %v4704_v39  ;;  %v4634_v28 = vmul.f32 %v6653_v17, %v4204_v57  ;;  %v3858_v30 = vmul.f32 %v6643_v12, %v3821_v45  ;;  %v4252_v56 = vmul.f32 %v6647_v14, %v4215_v1  ;;  %v3671_v9 = vmul.f32 %v7343_v31, %v7343_v31 }
 0xc90   : > { %v4671_v36 = vmul.f32 %v6655_v18, %v4598_v23  ;;  %v3765_v58 = vadd.f32 1e-06, %v3733_v22  ;;  %v3478_v3 = vadd.f32 %v3306_v29, %v7200_v44  ;;  %v7360_v19 = vadd.f32 %v3418_v53, %v7977_v32 }
 0xc91   : > { %v3895_v61 = vadd.f32 %v6645_v13, %v3858_v30  ;;  %v4289_v37 = vadd.f32 %v6651_v16, %v4252_v56  ;;  %v3703_v60 = vadd.f32 %v3671_v9, %v3607_v6  ;;  %v7365_v8 = vadd.f32 %v3309_v40, %v7978_v20 }
 0xc92   : > { %v5551_v63 = vpop.eup %5550  ;;  %v4703_v34 = vadd.f32 %v4671_v36, %v4634_v28  ;;  %5560 = vrsqrt.f32 %v3765_v58  ;;  %v3510_v4 = vmul.f32 0.5, %v3478_v3  ;;  %v7369_v7 = vadd.f32 %v7360_v19, %v7204_v54 }
 0xc93   : > { %v7371_v15 = vmul.f32 0.5, %v3895_v61  ;;  %v3959_v32 = vmul.f32 0.044715, %v3895_v61  ;;  %v7373_v10 = vmul.f32 0.5, %v4289_v37  ;;  %v4353_v47 = vmul.f32 0.044715, %v4289_v37 }
 0xc94   : > { %v5553_v43 = vpop.eup %5552  ;;  %4735 = vst [vmem:[%s6918_s23 + $0xc8] sm:$0xff] %v4703_v34  ;;  %v3823_v35 = vmul.f32 %v5551_v63, %v7275_v26  ;;  %v4217_v38 = vmul.f32 %v5551_v63, %v7280_v52  ;;  %v3735_v39 = vmul.f32 0.5, %v3703_v60  ;;  %v7379_v57 = vsub.f32 %v7200_v44, %v3510_v4 }
 0xc95   : > { %v5555_v45 = vpop.eup %5554  ;;  %v4174_v1 = vadd.f32 1.0, %v5553_v43  ;;  %v3991_v53 = vmul.f32 %v3959_v32, %v3895_v61  ;;  %v4385_v23 = vmul.f32 %v4353_v47, %v4289_v37  ;;  %v7381_v22 = vsub.f32 %v3306_v29, %v3510_v4 }
 0xc96   : > { %v4568_v6 = vadd.f32 1.0, %v5555_v45  ;;  %v3860_v40 = vmul.f32 %v6643_v12, %v3823_v35  ;;  %v4254_v28 = vmul.f32 %v6647_v14, %v4217_v38  ;;  %v3767_v30 = vadd.f32 1e-06, %v3735_v39 }
 0xc97   : > { %v4206_v26 = vmul.f32 %v4174_v1, %v7293_v48  ;;  %v4023_v56 = vmul.f32 %v3991_v53, %v3895_v61  ;;  %v4417_v52 = vmul.f32 %v4385_v23, %v4289_v37  ;;  %v7388_v44 = vmul.f32 %v7379_v57, %v7379_v57 }
 0xc98   : > { %v5557_v9 = vpop.eup %5556  ;;  %v4600_v36 = vmul.f32 %v4568_v6, %v7296_v21  ;;  %v3897_v29 = vadd.f32 %v6645_v13, %v3860_v40  ;;  %v4291_v58 = vadd.f32 %v6651_v16, %v4254_v28  ;;  %5562 = vrsqrt.f32 %v3767_v30 }
 0xc99   : > { %v4636_v3 = vmul.f32 %v6653_v17, %v4206_v26  ;;  %v4055_v60 = vadd.f32 %v4023_v56, %v3895_v61  ;;  %v4449_v63 = vadd.f32 %v4417_v52, %v4289_v37  ;;  %v3822_v48 = vmul.f32 %v5557_v9, %v7303_v62 }
 0xc9a   : > { %v4673_v34 = vmul.f32 %v6655_v18, %v4600_v36  ;;  %v7396_v4 = vmul.f32 0.5, %v3897_v29  ;;  %v3961_v32 = vmul.f32 0.044715, %v3897_v29  ;;  %v7398_v47 = vmul.f32 0.5, %v4291_v58 }
 0xc9b   : > { %v5559_v21 = vpop.eup %5558  ;;  %v4087_v43 = vmul.f32 0.7978846, %v4055_v60  ;;  %v4481_v35 = vmul.f32 0.7978846, %v4449_v63  ;;  %v4355_v38 = vmul.f32 0.044715, %v4291_v58  ;;  %v3859_v39 = vmul.f32 %v6643_v12, %v3822_v48 }
 0xc9c   : > { %v4705_v45 = vadd.f32 %v4673_v34, %v4636_v3  ;;  %v3993_v1 = vmul.f32 %v3961_v32, %v3897_v29  ;;  %v4216_v61 = vmul.f32 %v5557_v9, %v7306_v24  ;;  %v3824_v62 = vmul.f32 %v5559_v21, %v7316_v27 }
 0xc9d   : > { %5564 = vtanh.f32 %v4087_v43  ;;  %v4387_v37 = vmul.f32 %v4355_v38, %v4291_v58  ;;  %v3896_v53 = vadd.f32 %v6645_v13, %v3859_v39  ;;  %v4218_v23 = vmul.f32 %v5559_v21, %v7319_v33 }
 0xc9e   : > { %4737 = vst [vmem:[%s6918_s23 + $0xd8] sm:$0xff] %v4705_v45  ;;  %5566 = vtanh.f32 %v4481_v35  ;;  %v4025_v6 = vmul.f32 %v3993_v1, %v3897_v29  ;;  %v4253_v40 = vmul.f32 %v6647_v14, %v4216_v61  ;;  %v3861_v28 = vmul.f32 %v6643_v12, %v3824_v62 }
 0xc9f   : > { %v5561_v30 = vpop.eup %5560  ;;  %v4419_v26 = vmul.f32 %v4387_v37, %v4291_v58  ;;  %v7408_v56 = vmul.f32 0.5, %v3896_v53  ;;  %v3960_v24 = vmul.f32 0.044715, %v3896_v53  ;;  %v4255_v27 = vmul.f32 %v6647_v14, %v4218_v23 }
 0xca0   : > { %v4057_v52 = vadd.f32 %v4025_v6, %v3897_v29  ;;  %v4290_v9 = vadd.f32 %v6651_v16, %v4253_v40  ;;  %v3898_v36 = vadd.f32 %v6645_v13, %v3861_v28  ;;  %v3829_v33 = vmul.f32 %v5561_v30, %v7327_v46 }
 0xca1   : > { %v4451_v3 = vadd.f32 %v4419_v26, %v4291_v58  ;;  %v3992_v60 = vmul.f32 %v3960_v24, %v3896_v53  ;;  %v4292_v63 = vadd.f32 %v6651_v16, %v4255_v27  ;;  %v4223_v48 = vmul.f32 %v5561_v30, %v7330_v5 }
 0xca2   : > { %v4089_v34 = vmul.f32 0.7978846, %v4057_v52  ;;  %v7416_v32 = vmul.f32 0.5, %v4290_v9  ;;  %v4354_v21 = vmul.f32 0.044715, %v4290_v9  ;;  %v7418_v43 = vmul.f32 0.5, %v3898_v36 }
 0xca3   : > { %v4483_v35 = vmul.f32 0.7978846, %v4451_v3  ;;  %v4024_v29 = vmul.f32 %v3992_v60, %v3896_v53  ;;  %v3962_v38 = vmul.f32 0.044715, %v3898_v36  ;;  %v7420_v39 = vmul.f32 0.5, %v4292_v63 }
 0xca4   : > { %5568 = vtanh.f32 %v4089_v34  ;;  %v4386_v45 = vmul.f32 %v4354_v21, %v4290_v9  ;;  %v4356_v46 = vmul.f32 0.044715, %v4292_v63  ;;  %v3866_v58 = vmul.f32 %v6643_v12, %v3829_v33 }
 0xca5   : > { %v5563_v1 = vpop.eup %5562  ;;  %5570 = vtanh.f32 %v4483_v35  ;;  %v4056_v61 = vadd.f32 %v4024_v29, %v3896_v53  ;;  %v3994_v5 = vmul.f32 %v3962_v38, %v3898_v36  ;;  %v4260_v62 = vmul.f32 %v6647_v14, %v4223_v48 }
 0xca6   : > { %v4418_v37 = vmul.f32 %v4386_v45, %v4290_v9  ;;  %v4388_v23 = vmul.f32 %v4356_v46, %v4292_v63  ;;  %v3903_v6 = vadd.f32 %v6645_v13, %v3866_v58  ;;  %v3831_v40 = vmul.f32 %v5563_v1, %v7341_v41 }
 0xca7   : > { %v4088_v28 = vmul.f32 0.7978846, %v4056_v61  ;;  %v4026_v30 = vmul.f32 %v3994_v5, %v3898_v36  ;;  %v4297_v26 = vadd.f32 %v6651_v16, %v4260_v62  ;;  %v4225_v24 = vmul.f32 %v5563_v1, %v7343_v31 }
 0xca8   : > { %v4450_v27 = vadd.f32 %v4418_v37, %v4290_v9  ;;  %v4420_v52 = vmul.f32 %v4388_v23, %v4292_v63  ;;  %v7428_v33 = vmul.f32 0.5, %v3903_v6  ;;  %v3967_v53 = vmul.f32 0.044715, %v3903_v6 }
 0xca9   : > { %5572 = vtanh.f32 %v4088_v28  ;;  %v4058_v3 = vadd.f32 %v4026_v30, %v3898_v36  ;;  %v7430_v60 = vmul.f32 0.5, %v4297_v26  ;;  %v4361_v48 = vmul.f32 0.044715, %v4297_v26 }
 0xcaa   : > { %v5565_v34 = vpop.eup %5564  ;;  %v4482_v21 = vmul.f32 0.7978846, %v4450_v27  ;;  %v4452_v35 = vadd.f32 %v4420_v52, %v4292_v63  ;;  %v3999_v41 = vmul.f32 %v3967_v53, %v3903_v6  ;;  %v3868_v29 = vmul.f32 %v6643_v12, %v3831_v40 }
 0xcab   : > { %v5567_v38 = vpop.eup %5566  ;;  %v4151_v45 = vadd.f32 1.0, %v5565_v34  ;;  %v4090_v46 = vmul.f32 0.7978846, %v4058_v3  ;;  %v4393_v31 = vmul.f32 %v4361_v48, %v4297_v26  ;;  %v4262_v9 = vmul.f32 %v6647_v14, %v4225_v24 }
 0xcac   : > { %v4545_v58 = vadd.f32 1.0, %v5567_v38  ;;  %5574 = vtanh.f32 %v4482_v21  ;;  %v4484_v1 = vmul.f32 0.7978846, %v4452_v35  ;;  %v4031_v61 = vmul.f32 %v3999_v41, %v3903_v6 }
 0xcad   : > { %v4183_v36 = vmul.f32 %v4151_v45, %v7371_v15  ;;  %5576 = vtanh.f32 %v4090_v46  ;;  %v4425_v5 = vmul.f32 %v4393_v31, %v4297_v26  ;;  %v3905_v62 = vadd.f32 %v6645_v13, %v3868_v29 }
 0xcae   : > { %v4577_v63 = vmul.f32 %v4545_v58, %v7373_v10  ;;  %5578 = vtanh.f32 %v4484_v1  ;;  %v4063_v37 = vadd.f32 %v4031_v61, %v3903_v6  ;;  %v4299_v23 = vadd.f32 %v6651_v16, %v4262_v9 }
 0xcaf   : > { %v4613_v40 = vmul.f32 %v6653_v17, %v4183_v36  ;;  %v4457_v28 = vadd.f32 %v4425_v5, %v4297_v26  ;;  %v7439_v30 = vmul.f32 0.5, %v3905_v62  ;;  %v3969_v24 = vmul.f32 0.044715, %v3905_v62  ;;  %v3422_v5 = vpop.f32.mrf.mxu0 }
 0xcb0   : > { %v4650_v27 = vmul.f32 %v6655_v18, %v4577_v63  ;;  %v4095_v52 = vmul.f32 0.7978846, %v4063_v37  ;;  %v7442_v15 = vmul.f32 0.5, %v4299_v23  ;;  %v4363_v53 = vmul.f32 0.044715, %v4299_v23 }
 0xcb1   : > { %v5569_v3 = vpop.eup %5568  ;;  %v4489_v48 = vmul.f32 0.7978846, %v4457_v28  ;;  %v4001_v10 = vmul.f32 %v3969_v24, %v3905_v62  ;;  %v3670_v6 = vmul.f32 %v7381_v22, %v7381_v22  ;;  %v3512_v34 = vmul.f32 0.5, %v7369_v7 }
 0xcb2   : > { %v5571_v21 = vpop.eup %5570  ;;  %v4682_v26 = vadd.f32 %v4650_v27, %v4613_v40  ;;  %v4153_v35 = vadd.f32 1.0, %v5569_v3  ;;  %5580 = vtanh.f32 %v4095_v52  ;;  %v4395_v41 = vmul.f32 %v4363_v53, %v4299_v23 }
 0xcb3   : > { %v4547_v29 = vadd.f32 1.0, %v5571_v21  ;;  %5582 = vtanh.f32 %v4489_v48  ;;  %v4033_v38 = vmul.f32 %v4001_v10, %v3905_v62  ;;  %v3702_v45 = vadd.f32 %v3670_v6, %v7388_v44 }
 0xcb4   : > { %4714 = vst [vmem:[%s6918_s23 + $0x20] sm:$0xff] %v4682_v26  ;;  %v4185_v46 = vmul.f32 %v4153_v35, %v7396_v4  ;;  %v4427_v31 = vmul.f32 %v4395_v41, %v4299_v23  ;;  %v7451_v9 = vsub.f32 %v7204_v54, %v3512_v34  ;;  %v7454_v58 = vsub.f32 %v7360_v19, %v3512_v34  ;;  %v3311_v19 = vpop.f32.mrf.mxu1 }
 0xcb5   : > { %v4579_v7 = vmul.f32 %v4547_v29, %v7398_v47  ;;  %v4065_v1 = vadd.f32 %v4033_v38, %v3905_v62  ;;  %v3734_v61 = vmul.f32 0.5, %v3702_v45  ;;  %v3485_v36 = vadd.f32 %v7365_v8, %v7208_v25 }
 0xcb6   : > { %v5573_v63 = vpop.eup %5572  ;;  %v4615_v44 = vmul.f32 %v6653_v17, %v4185_v46  ;;  %v4459_v37 = vadd.f32 %v4427_v31, %v4299_v23  ;;  %v3608_v4 = vmul.f32 %v7451_v9, %v7451_v9  ;;  %v3672_v54 = vmul.f32 %v7454_v58, %v7454_v58 }
 0xcb7   : > { %v4652_v40 = vmul.f32 %v6655_v18, %v4579_v7  ;;  %v4152_v47 = vadd.f32 1.0, %v5573_v63  ;;  %v4097_v62 = vmul.f32 0.7978846, %v4065_v1  ;;  %v3766_v28 = vadd.f32 1e-06, %v3734_v61 }
 0xcb8   : > { %v4491_v24 = vmul.f32 0.7978846, %v4459_v37  ;;  %v3704_v27 = vadd.f32 %v3672_v54, %v3608_v4  ;;  %v3517_v52 = vmul.f32 0.5, %v3485_v36  ;;  %v3423_v53 = vadd.f32 %v3422_v5, %v7978_v20 }
 0xcb9   : > { %v5575_v3 = vpop.eup %5574  ;;  %v4684_v23 = vadd.f32 %v4652_v40, %v4615_v44  ;;  %v4184_v48 = vmul.f32 %v4152_v47, %v7408_v56  ;;  %5584 = vtanh.f32 %v4097_v62  ;;  %v3312_v10 = vadd.f32 %v3311_v19, %v7978_v20  ;;  %v3424_v56 = vpop.f32.mrf.mxu0 }
 0xcba   : > { %v5577_v6 = vpop.eup %5576  ;;  %v4546_v34 = vadd.f32 1.0, %v5575_v3  ;;  %5586 = vtanh.f32 %v4491_v24  ;;  %v3736_v21 = vmul.f32 0.5, %v3704_v27  ;;  %v7469_v26 = vsub.f32 %v7208_v25, %v3517_v52 }
 0xcbb   : > { %v5579_v35 = vpop.eup %5578  ;;  %4716 = vst [vmem:[%s6918_s23 + $0x30] sm:$0xff] %v4684_v23  ;;  %v4614_v41 = vmul.f32 %v6653_v17, %v4184_v48  ;;  %v4154_v29 = vadd.f32 1.0, %v5577_v6  ;;  %5588 = vrsqrt.f32 %v3766_v28  ;;  %v7474_v38 = vsub.f32 %v7365_v8, %v3517_v52  ;;  %v3315_v48 = vpop.f32.mrf.mxu1 }
 0xcbc   : > { %v4578_v45 = vmul.f32 %v4546_v34, %v7416_v32  ;;  %v4548_v46 = vadd.f32 1.0, %v5579_v35  ;;  %v3768_v31 = vadd.f32 1e-06, %v3736_v21  ;;  %v3613_v7 = vmul.f32 %v7469_v26, %v7469_v26 }
 0xcbd   : > { %v4186_v25 = vmul.f32 %v4154_v29, %v7418_v43  ;;  %v3677_v1 = vmul.f32 %v7474_v38, %v7474_v38  ;;  %v3487_v61 = vadd.f32 %v3423_v53, %v7212_v49  ;;  %v3486_v36 = vadd.f32 %v3312_v10, %v7219_v2 }
 0xcbe   : > { %v4651_v8 = vmul.f32 %v6655_v18, %v4578_v45  ;;  %v4580_v5 = vmul.f32 %v4548_v46, %v7420_v39  ;;  %5590 = vrsqrt.f32 %v3768_v31  ;;  %v7487_v32 = vadd.f32 %v3424_v56, %v7978_v20 }
 0xcbf   : > { %v5581_v63 = vpop.eup %5580  ;;  %v4616_v43 = vmul.f32 %v6653_v17, %v4186_v25  ;;  %v3709_v44 = vadd.f32 %v3677_v1, %v3613_v7  ;;  %v3519_v37 = vmul.f32 0.5, %v3487_v61  ;;  %v3518_v4 = vmul.f32 0.5, %v3486_v36 }
 0xcc0   : > { %v5583_v54 = vpop.eup %5582  ;;  %v4683_v19 = vadd.f32 %v4651_v8, %v4614_v41  ;;  %v4653_v40 = vmul.f32 %v6655_v18, %v4580_v5  ;;  %v4159_v47 = vadd.f32 1.0, %v5581_v63  ;;  %v3488_v39 = vadd.f32 %v7487_v32, %v7223_v51 }
 0xcc1   : > { %v4553_v62 = vadd.f32 1.0, %v5583_v54  ;;  %v3741_v20 = vmul.f32 0.5, %v3709_v44  ;;  %v7494_v28 = vsub.f32 %v7212_v49, %v3519_v37  ;;  %v7496_v24 = vsub.f32 %v3423_v53, %v3519_v37 }
 0xcc2   : > { %4715 = vst [vmem:[%s6918_s23 + $0x28] sm:$0xff] %v4683_v19  ;;  %v4685_v27 = vadd.f32 %v4653_v40, %v4616_v43  ;;  %v4191_v52 = vmul.f32 %v4159_v47, %v7428_v33  ;;  %v7502_v3 = vsub.f32 %v7219_v2, %v3518_v4  ;;  %v7504_v23 = vsub.f32 %v3312_v10, %v3518_v4  ;;  %v3428_v2 = vpop.f32.mrf.mxu0 }
 0xcc3   : > { %v4585_v49 = vmul.f32 %v4553_v62, %v7430_v60  ;;  %v3773_v53 = vadd.f32 1e-06, %v3741_v20  ;;  %v3615_v6 = vmul.f32 %v7494_v28, %v7494_v28  ;;  %v3679_v33 = vmul.f32 %v7496_v24, %v7496_v24 }
 0xcc4   : > { %4717 = vst [vmem:[%s6918_s23 + $0x38] sm:$0xff] %v4685_v27  ;;  %v4621_v10 = vmul.f32 %v6653_v17, %v4191_v52  ;;  %v3614_v34 = vmul.f32 %v7502_v3, %v7502_v3  ;;  %v3678_v60 = vmul.f32 %v7504_v23, %v7504_v23  ;;  %v3520_v21 = vmul.f32 0.5, %v3488_v39 }
 0xcc5   : > { %5793 = shalt.err (!%p5790_p11)
}
 0xcc6   : > { %s5794_s5 = scalar_lea.hbm %s7507_s13, 16  ;;  %s5798_s8 = scalar_lea.hbm %s7979_s2, 32 }
 0xcc7   : > { %p5795_p2 = scmp.ne.s32.totalorder %s7507_s13, %s5794_s5  ;;  %p5799_p1 = scmp.lt.s32.totalorder %s7507_s13, %s7979_s2 }
 0xcc8   : > { %p5800_p6 = scmp.lt.s32.totalorder %s5798_s8, %s5794_s5 }
 0xcc9   : > { %p5796_p10 = pnand %p5795_p2, %p7981_p4 }
 0xcca   : > { %p5801_p7 = por %p5800_p6, %p5799_p1 }
 0xccb   : > { %p5797_p12 = pneg %p5796_p10 }
 0xccd   : > { %p5802_p5 = pnand %p5801_p7, %p5797_p12 }
 0xccf   : > { %5805 = shalt.err (!%p5802_p5)
}
 0xcd0   : > { %5312 = dma.vmem_to_hbm [thread:$0]  (%p7981_p4), %s7516_s26, 16, %s7507_s13, %s4748_s20   ;;  %v4658_v35 = vmul.f32 %v6655_v18, %v4585_v49  ;;  %5592 = vrsqrt.f32 %v3773_v53  ;;  %v3711_v41 = vadd.f32 %v3679_v33, %v3615_v6  ;;  %v3316_v29 = vadd.f32 %v3315_v48, %v6811_v50  ;;  %v5585_v56 = vpop.eup %5584 }
 0xcd1   : > { %v3710_v45 = vadd.f32 %v3678_v60, %v3614_v34  ;;  %v7544_v46 = vsub.f32 %v7223_v51, %v3520_v21  ;;  %v7547_v31 = vsub.f32 %v7487_v32, %v3520_v21  ;;  %v7550_v7 = vadd.f32 %v3428_v2, %v6811_v50  ;;  %v5587_v25 = vpop.eup %5586  ;;  %s7982_s5 = sld [smem:[#allocation44_spill]]  ;;  %s5052_s3 = sshll.u32 %s6132_s18, 12 }
 0xcd2   : > { %v4690_v1 = vadd.f32 %v4658_v35, %v4621_v10  ;;  %v4161_v61 = vadd.f32 1.0, %v5585_v56  ;;  %v3743_v36 = vmul.f32 0.5, %v3711_v41  ;;  %v3493_v8 = vadd.f32 %v3316_v29, %v7227_v59  ;;  %v5589_v5 = vpop.eup %5588  ;;  %s4760_s8 = sshll.u32 %s6918_s23, 4  ;;  %s4743_s0 = scalar_lea.sflag [#allocation4], %s6277_s16  ;;  %s7808_s8 = int_to_ptr.vmem [resolvable:$true] %s4760_s8 }
 0xcd3   : > { %v4555_v63 = vadd.f32 1.0, %v5587_v25  ;;  %v3742_v43 = vmul.f32 0.5, %v3710_v45  ;;  %v3616_v44 = vmul.f32 %v7544_v46, %v7544_v46  ;;  %v3680_v51 = vmul.f32 %v7547_v31, %v7547_v31  ;;  %v5591_v62 = vpop.eup %5590  ;;  %s5806_s13 = scalar_lea.vmem %s7808_s8, 4096  ;;  %s5934_s18 = smov [#allocation11]  }
 0xcd4   : > { %4722 = vst [vmem:[%s6918_s23 + $0x60] sm:$0xff] %v4690_v1  ;;  %v4193_v32 = vmul.f32 %v4161_v61, %v7439_v30  ;;  %v3830_v37 = vmul.f32 %v5589_v5, %v7379_v57  ;;  %v4224_v4 = vmul.f32 %v5589_v5, %v7381_v22  ;;  %v3775_v54 = vadd.f32 1e-06, %v3743_v36  ;;  %p5807_p9 = scmp.ne.s32.totalorder %s7808_s8, %s5806_s13  ;;  %s5810_s26 = sshll.u32 %s5934_s18, 4  ;;  %s5811_s26 = int_to_ptr.vmem [resolvable:$false] %s5810_s26 }
 0xcd5   : > { %v4587_v19 = vmul.f32 %v4555_v63, %v7442_v15  ;;  %v3774_v40 = vadd.f32 1e-06, %v3742_v43  ;;  %v3712_v47 = vadd.f32 %v3680_v51, %v3616_v44  ;;  %v3525_v39 = vmul.f32 0.5, %v3493_v8  ;;  %s5812_s20 = scalar_lea.vmem %s5811_s26, 8192  ;;  %p5813_p8 = scmp.lt.s32.totalorder %s7808_s8, %s5811_s26 }
 0xcd6   : > { %v4623_v20 = vmul.f32 %v6653_v17, %v4193_v32  ;;  %v3867_v27 = vmul.f32 %v6643_v12, %v3830_v37  ;;  %v4261_v52 = vmul.f32 %v6647_v14, %v4224_v4  ;;  %5594 = vrsqrt.f32 %v3775_v54  ;;  %p5808_p13 = pnand %p5807_p9, %p7981_p4  ;;  %p5814_p0 = scmp.lt.s32.totalorder %s5812_s20, %s5806_s13 }
 0xcd7   : > { %v4660_v30 = vmul.f32 %v6655_v18, %v4587_v19  ;;  %v3832_v57 = vmul.f32 %v5591_v62, %v7451_v9  ;;  %v4226_v22 = vmul.f32 %v5591_v62, %v7454_v58  ;;  %5596 = vrsqrt.f32 %v3774_v40  ;;  %s7806_s4 = scalar_lea.hbm %s7982_s5, %s5052_s3 }
 0xcd8   : > { %v3904_v15 = vadd.f32 %v6645_v13, %v3867_v27  ;;  %v4298_v48 = vadd.f32 %v6651_v16, %v4261_v52  ;;  %v3744_v49 = vmul.f32 0.5, %v3712_v47  ;;  %v7571_v53 = vsub.f32 %v7227_v59, %v3525_v39  ;;  %p5809_p3 = pneg %p5808_p13  ;;  %p5815_p11 = por %p5814_p0, %p5813_p8 }
 0xcd9   : > { %v4692_v6 = vadd.f32 %v4660_v30, %v4623_v20  ;;  %v3869_v33 = vmul.f32 %v6643_v12, %v3832_v57  ;;  %v4263_v2 = vmul.f32 %v6647_v14, %v4226_v22  ;;  %v7575_v10 = vsub.f32 %v3316_v29, %v3525_v39 }
 0xcda   : > { %v3405_v9 = vadd.f32 %v7154_v11, %v7975_v55  ;;  %v3968_v58 = vmul.f32 0.044715, %v3904_v15  ;;  %v4362_v34 = vmul.f32 0.044715, %v4298_v48  ;;  %v3776_v59 = vadd.f32 1e-06, %v3744_v49  ;;  %p5816_p2 = pnand %p5815_p11, %p5809_p3 }
 0xcdb   : > { %4724 = vst [vmem:[%s6918_s23 + $0x70] sm:$0xff] %v4692_v6  ;;  %v7581_v60 = vadd.f32 %v6645_v13, %v3869_v33  ;;  %v7584_v21 = vadd.f32 %v6651_v16, %v4263_v2  ;;  %v3621_v35 = vmul.f32 %v7571_v53, %v7571_v53  ;;  %v3685_v29 = vmul.f32 %v7575_v10, %v7575_v10 }
 0xcdc   : > { %v4000_v41 = vmul.f32 %v3968_v58, %v3904_v15  ;;  %v4394_v56 = vmul.f32 %v4362_v34, %v4298_v48  ;;  %v7592_v11 = vadd.f32 %v7167_v0, %v7975_v55  ;;  %v3495_v61 = vadd.f32 %v7550_v7, %v3405_v9 }
 0xcdd   : > { %v5593_v45 = vpop.eup %5592  ;;  %v3970_v25 = vmul.f32 0.044715, %v7581_v60  ;;  %v4364_v1 = vmul.f32 0.044715, %v7584_v21  ;;  %5598 = vrsqrt.f32 %v3776_v59  ;;  %v3717_v51 = vadd.f32 %v3685_v29, %v3621_v35 }
 0xcde   : > { %v4032_v36 = vmul.f32 %v4000_v41, %v3904_v15  ;;  %v4426_v8 = vmul.f32 %v4394_v56, %v4298_v48  ;;  %v3837_v5 = vmul.f32 %v5593_v45, %v7469_v26  ;;  %v4231_v63 = vmul.f32 %v5593_v45, %v7474_v38 }
 0xcdf   : > { %v4002_v43 = vmul.f32 %v3970_v25, %v7581_v60  ;;  %v4396_v44 = vmul.f32 %v4364_v1, %v7584_v21  ;;  %v7605_v54 = vadd.f32 %v7169_v42, %v7975_v55  ;;  %v3749_v19 = vmul.f32 0.5, %v3717_v51 }
 0xce0   : > { %v4064_v0 = vadd.f32 %v4032_v36, %v3904_v15  ;;  %v4458_v32 = vadd.f32 %v4426_v8, %v4298_v48  ;;  %v3874_v37 = vmul.f32 %v6643_v12, %v3837_v5  ;;  %v4268_v4 = vmul.f32 %v6647_v14, %v4231_v63 }
 0xce1   : > { %v4034_v26 = vmul.f32 %v4002_v43, %v7581_v60  ;;  %v4428_v38 = vmul.f32 %v4396_v44, %v7584_v21  ;;  %v7611_v27 = vmul.f32 0.5, %v3904_v15  ;;  %v3527_v42 = vmul.f32 0.5, %v3495_v61 }
 0xce2   : > { %v4096_v40 = vmul.f32 0.7978846, %v4064_v0  ;;  %v4490_v47 = vmul.f32 0.7978846, %v4458_v32  ;;  %v3911_v39 = vadd.f32 %v6645_v13, %v3874_v37  ;;  %v4305_v62 = vadd.f32 %v6651_v16, %v4268_v4 }
 0xce3   : > { %v5595_v20 = vpop.eup %5594  ;;  %v4066_v52 = vadd.f32 %v4034_v26, %v7581_v60  ;;  %v4460_v30 = vadd.f32 %v4428_v38, %v7584_v21  ;;  %v7615_v57 = vmul.f32 0.5, %v4298_v48  ;;  %v3781_v49 = vadd.f32 1e-06, %v3749_v19 }
 0xce4   : > { %v5597_v55 = vpop.eup %5596  ;;  %5600 = vtanh.f32 %v4096_v40  ;;  %v3975_v22 = vmul.f32 0.044715, %v3911_v39  ;;  %v4369_v2 = vmul.f32 0.044715, %v4305_v62  ;;  %v3839_v34 = vmul.f32 %v5595_v20, %v7494_v28 }
 0xce5   : > { %5602 = vtanh.f32 %v4490_v47  ;;  %v4098_v6 = vmul.f32 0.7978846, %v4066_v52  ;;  %v4492_v33 = vmul.f32 0.7978846, %v4460_v30  ;;  %v4233_v15 = vmul.f32 %v5595_v20, %v7496_v24  ;;  %v3317_v30 = vpop.f32.mrf.mxu1 }
 0xce6   : > { %v4007_v58 = vmul.f32 %v3975_v22, %v3911_v39  ;;  %v3838_v59 = vmul.f32 %v5597_v55, %v7502_v3  ;;  %v4401_v35 = vmul.f32 %v4369_v2, %v4305_v62  ;;  %v4232_v41 = vmul.f32 %v5597_v55, %v7504_v23 }
 0xce7   : > { %5604 = vtanh.f32 %v4098_v6  ;;  %v7621_v56 = vsub.f32 %v3405_v9, %v3527_v42  ;;  %v3876_v29 = vmul.f32 %v6643_v12, %v3839_v34  ;;  %v4270_v45 = vmul.f32 %v6647_v14, %v4233_v15 }
 0xce8   : > { %5606 = vtanh.f32 %v4492_v33  ;;  %v4039_v48 = vmul.f32 %v4007_v58, %v3911_v39  ;;  %v4433_v25 = vmul.f32 %v4401_v35, %v4305_v62  ;;  %v3875_v1 = vmul.f32 %v6643_v12, %v3838_v59 }
 0xce9   : > { %v4269_v28 = vmul.f32 %v6647_v14, %v4232_v41  ;;  %v7628_v24 = vsub.f32 %v7550_v7, %v3527_v42  ;;  %v7631_v61 = vadd.f32 %v6645_v13, %v3876_v29  ;;  %v7634_v23 = vadd.f32 %v6651_v16, %v4270_v45 }
 0xcea   : > { %v4071_v3 = vadd.f32 %v4039_v48, %v3911_v39  ;;  %5608 = vrsqrt.f32 %v3781_v49  ;;  %v3938_v9 = vmul.f32 0.5, %v7581_v60  ;;  %v4465_v36 = vadd.f32 %v4433_v25, %v4305_v62  ;;  %v5599_v63 = vpop.eup %5598 }
 0xceb   : > { %v7638_v8 = vadd.f32 %v6645_v13, %v3875_v1  ;;  %v7641_v5 = vadd.f32 %v6651_v16, %v4269_v28  ;;  %v4332_v7 = vmul.f32 0.5, %v7584_v21  ;;  %v7644_v43 = vmul.f32 0.5, %v3911_v39 }
 0xcec   : > { %v4103_v44 = vmul.f32 0.7978846, %v4071_v3  ;;  %v3977_v51 = vmul.f32 0.044715, %v7631_v61  ;;  %v4497_v0 = vmul.f32 0.7978846, %v4465_v36  ;;  %v3623_v60 = vmul.f32 %v7621_v56, %v7621_v56 }
 0xced   : > { %v4371_v32 = vmul.f32 0.044715, %v7634_v23  ;;  %v3687_v37 = vmul.f32 %v7628_v24, %v7628_v24  ;;  %v3976_v26 = vmul.f32 0.044715, %v7638_v8  ;;  %v4370_v21 = vmul.f32 0.044715, %v7641_v5 }
 0xcee   : > { %5610 = vtanh.f32 %v4103_v44  ;;  %v4009_v4 = vmul.f32 %v3977_v51, %v7631_v61  ;;  %v3840_v19 = vmul.f32 %v5599_v63, %v7544_v46  ;;  %v4234_v40 = vmul.f32 %v5599_v63, %v7547_v31 }
 0xcef   : > { %5612 = vtanh.f32 %v4497_v0  ;;  %v4403_v38 = vmul.f32 %v4371_v32, %v7634_v23  ;;  %v7658_v47 = vmul.f32 0.5, %v4305_v62  ;;  %v4008_v20 = vmul.f32 %v3976_v26, %v7638_v8  ;;  %v3430_v26 = vpop.f32.mrf.mxu0 }
 0xcf0   : > { %v4041_v39 = vmul.f32 %v4009_v4, %v7631_v61  ;;  %v4402_v52 = vmul.f32 %v4370_v21, %v7641_v5  ;;  %v3877_v22 = vmul.f32 %v6643_v12, %v3840_v19  ;;  %v4271_v49 = vmul.f32 %v6647_v14, %v4234_v40 }
 0xcf1   : > { %v5601_v42 = vpop.eup %5600  ;;  %v4435_v55 = vmul.f32 %v4403_v38, %v7634_v23  ;;  %v3719_v6 = vadd.f32 %v3687_v37, %v3623_v60  ;;  %v4040_v62 = vmul.f32 %v4008_v20, %v7638_v8  ;;  %v7674_v59 = vadd.f32 %v3317_v30, %v6811_v50 }
 0xcf2   : > { %v5603_v46 = vpop.eup %5602  ;;  %v4160_v33 = vadd.f32 1.0, %v5601_v42  ;;  %v4073_v31 = vadd.f32 %v4041_v39, %v7631_v61  ;;  %v4434_v2 = vmul.f32 %v4402_v52, %v7641_v5  ;;  %v7671_v15 = vadd.f32 %v6645_v13, %v3877_v22 }
 0xcf3   : > { %v4554_v58 = vadd.f32 1.0, %v5603_v46  ;;  %v4467_v34 = vadd.f32 %v4435_v55, %v7634_v23  ;;  %v4072_v29 = vadd.f32 %v4040_v62, %v7638_v8  ;;  %v7681_v36 = vadd.f32 %v6651_v16, %v4271_v49 }
 0xcf4   : > { %v5605_v35 = vpop.eup %5604  ;;  %v4192_v41 = vmul.f32 %v4160_v33, %v7611_v27  ;;  %v4105_v48 = vmul.f32 0.7978846, %v4073_v31  ;;  %v4466_v45 = vadd.f32 %v4434_v2, %v7641_v5  ;;  %v3978_v4 = vmul.f32 0.044715, %v7671_v15 }
 0xcf5   : > { %v5607_v25 = vpop.eup %5606  ;;  %v4586_v1 = vmul.f32 %v4554_v58, %v7615_v57  ;;  %v4162_v28 = vadd.f32 1.0, %v5605_v35  ;;  %v4499_v3 = vmul.f32 0.7978846, %v4467_v34  ;;  %v4104_v51 = vmul.f32 0.7978846, %v4072_v29 }
 0xcf6   : > { %v4622_v63 = vmul.f32 %v6653_v17, %v4192_v41  ;;  %v4556_v44 = vadd.f32 1.0, %v5607_v25  ;;  %5614 = vtanh.f32 %v4105_v48  ;;  %v4498_v60 = vmul.f32 0.7978846, %v4466_v45 }
 0xcf7   : > { %v5609_v0 = vpop.eup %5608  ;;  %v4659_v27 = vmul.f32 %v6655_v18, %v4586_v1  ;;  %v4194_v32 = vmul.f32 %v4162_v28, %v3938_v9  ;;  %5616 = vtanh.f32 %v4499_v3  ;;  %v7686_v57 = vmul.f32 0.5, %v7631_v61 }
 0xcf8   : > { %v4588_v37 = vmul.f32 %v4556_v44, %v4332_v7  ;;  %5618 = vtanh.f32 %v4104_v51  ;;  %v4372_v19 = vmul.f32 0.044715, %v7681_v36  ;;  %v4010_v9 = vmul.f32 %v3978_v4, %v7671_v15 }
 0xcf9   : > { %v4691_v21 = vadd.f32 %v4659_v27, %v4622_v63  ;;  %v4624_v38 = vmul.f32 %v6653_v17, %v4194_v32  ;;  %5620 = vtanh.f32 %v4498_v60  ;;  %v3845_v39 = vmul.f32 %v5609_v0, %v7571_v53 }
 0xcfa   : > { %v4661_v40 = vmul.f32 %v6655_v18, %v4588_v37  ;;  %v4239_v7 = vmul.f32 %v5609_v0, %v7575_v10  ;;  %v4404_v20 = vmul.f32 %v4372_v19, %v7681_v36  ;;  %v3751_v52 = vmul.f32 0.5, %v3719_v6 }
 0xcfb   : > { %v5611_v61 = vpop.eup %5610  ;;  %4723 = vst [vmem:[%s6918_s23 + $0x68] sm:$0xff] %v4691_v21  ;;  %v3494_v30 = vadd.f32 %v7674_v59, %v7592_v11  ;;  %v7700_v42 = vadd.f32 %v3430_v26, %v6811_v50  ;;  %v4042_v46 = vmul.f32 %v4010_v9, %v7671_v15  ;;  %v3882_v53 = vmul.f32 %v6643_v12, %v3845_v39 }
 0xcfc   : > { %v5613_v55 = vpop.eup %5612  ;;  %v4693_v22 = vadd.f32 %v4661_v40, %v4624_v38  ;;  %v4167_v49 = vadd.f32 1.0, %v5611_v61  ;;  %v4436_v33 = vmul.f32 %v4404_v20, %v7681_v36  ;;  %v4276_v31 = vmul.f32 %v6647_v14, %v4239_v7 }
 0xcfd   : > { %v4561_v10 = vadd.f32 1.0, %v5613_v55  ;;  %v3783_v62 = vadd.f32 1e-06, %v3751_v52  ;;  %v4074_v2 = vadd.f32 %v4042_v46, %v7671_v15  ;;  %v7710_v50 = vadd.f32 %v6645_v13, %v3882_v53 }
 0xcfe   : > { %4725 = vst [vmem:[%s6918_s23 + $0x78] sm:$0xff] %v4693_v22  ;;  %v4199_v6 = vmul.f32 %v4167_v49, %v7644_v43  ;;  %v3526_v58 = vmul.f32 0.5, %v3494_v30  ;;  %v4468_v35 = vadd.f32 %v4436_v33, %v7681_v36  ;;  %v7715_v41 = vadd.f32 %v6651_v16, %v4276_v31 }
 0xcff   : > { %v4593_v34 = vmul.f32 %v4561_v10, %v7658_v47  ;;  %5622 = vrsqrt.f32 %v3783_v62  ;;  %v4339_v29 = vmul.f32 0.5, %v7634_v23  ;;  %v4106_v45 = vmul.f32 0.7978846, %v4074_v2 }
 0xd00   : > { %v4629_v48 = vmul.f32 %v6653_v17, %v4199_v6  ;;  %v3983_v43 = vmul.f32 0.044715, %v7710_v50  ;;  %v3944_v1 = vmul.f32 0.5, %v7638_v8  ;;  %v4500_v28 = vmul.f32 0.7978846, %v4468_v35 }
 0xd01   : > { %v4666_v25 = vmul.f32 %v6655_v18, %v4593_v34  ;;  %v4377_v47 = vmul.f32 0.044715, %v7715_v41  ;;  %5624 = vtanh.f32 %v4106_v45  ;;  %v7725_v63 = vsub.f32 %v7592_v11, %v3526_v58 }
 0xd02   : > { %v4015_v3 = vmul.f32 %v3983_v43, %v7710_v50  ;;  %v7728_v44 = vsub.f32 %v7674_v59, %v3526_v58  ;;  %5626 = vtanh.f32 %v4500_v28  ;;  %v3496_v8 = vadd.f32 %v7700_v42, %v7605_v54 }
 0xd03   : > { %v5615_v23 = vpop.eup %5614  ;;  %v4698_v51 = vadd.f32 %v4666_v25, %v4629_v48  ;;  %v4409_v0 = vmul.f32 %v4377_v47, %v7715_v41  ;;  %v3622_v37 = vmul.f32 %v7725_v63, %v7725_v63  ;;  %v4338_v26 = vmul.f32 0.5, %v7641_v5 }
 0xd04   : > { %v5617_v27 = vpop.eup %5616  ;;  %v4169_v32 = vadd.f32 1.0, %v5615_v23  ;;  %v4047_v60 = vmul.f32 %v4015_v3, %v7710_v50  ;;  %v3686_v11 = vmul.f32 %v7728_v44, %v7728_v44  ;;  %v3528_v38 = vmul.f32 0.5, %v3496_v8 }
 0xd05   : > { %v5619_v59 = vpop.eup %5618  ;;  %4730 = vst [vmem:[%s6918_s23 + $0xa0] sm:$0xff] %v4698_v51  ;;  %v4563_v4 = vadd.f32 1.0, %v5617_v27  ;;  %v4441_v21 = vmul.f32 %v4409_v0, %v7715_v41  ;;  %v3946_v28 = vmul.f32 0.5, %v7671_v15  ;;  %v4340_v3 = vmul.f32 0.5, %v7681_v36 }
 0xd06   : > { %v5621_v19 = vpop.eup %5620  ;;  %v4201_v40 = vmul.f32 %v4169_v32, %v7686_v57  ;;  %v4168_v9 = vadd.f32 1.0, %v5619_v59  ;;  %v4079_v39 = vadd.f32 %v4047_v60, %v7710_v50  ;;  %v3718_v7 = vadd.f32 %v3686_v11, %v3622_v37 }
 0xd07   : > { %v4595_v61 = vmul.f32 %v4563_v4, %v4339_v29  ;;  %v4562_v20 = vadd.f32 1.0, %v5621_v19  ;;  %v4473_v52 = vadd.f32 %v4441_v21, %v7715_v41  ;;  %v7745_v30 = vsub.f32 %v7605_v54, %v3528_v38 }
 0xd08   : > { %v4631_v55 = vmul.f32 %v6653_v17, %v4201_v40  ;;  %v4200_v5 = vmul.f32 %v4168_v9, %v3944_v1  ;;  %v4111_v22 = vmul.f32 0.7978846, %v4079_v39  ;;  %v3750_v49 = vmul.f32 0.5, %v3718_v7 }
 0xd09   : > { %v4668_v46 = vmul.f32 %v6655_v18, %v4595_v61  ;;  %v4594_v57 = vmul.f32 %v4562_v20, %v4338_v26  ;;  %v4505_v53 = vmul.f32 0.7978846, %v4473_v52  ;;  %v7750_v10 = vsub.f32 %v7700_v42, %v3528_v38 }
 0xd0a   : > { %v4630_v33 = vmul.f32 %v6653_v17, %v4200_v5  ;;  %5628 = vtanh.f32 %v4111_v22  ;;  %v3782_v31 = vadd.f32 1e-06, %v3750_v49  ;;  %v3624_v54 = vmul.f32 %v7745_v30, %v7745_v30 }
 0xd0b   : > { %v4700_v62 = vadd.f32 %v4668_v46, %v4631_v55  ;;  %v4667_v6 = vmul.f32 %v6655_v18, %v4594_v57  ;;  %5630 = vtanh.f32 %v4505_v53  ;;  %v3688_v2 = vmul.f32 %v7750_v10, %v7750_v10 }
 0xd0c   : > { %v5623_v58 = vpop.eup %5622  ;;  %5632 = vrsqrt.f32 %v3782_v31  ;;  %v3951_v21 = vmul.f32 0.5, %v7710_v50  ;;  %v4345_v9 = vmul.f32 0.5, %v7715_v41 }
 0xd0d   : > { %4732 = vst [vmem:[%s6918_s23 + $0xb0] sm:$0xff] %v4700_v62  ;;  %v4699_v42 = vadd.f32 %v4667_v6, %v4630_v33  ;;  %v3847_v34 = vmul.f32 %v5623_v58, %v7621_v56  ;;  %v4241_v35 = vmul.f32 %v5623_v58, %v7628_v24  ;;  %v3720_v48 = vadd.f32 %v3688_v2, %v3624_v54 }
 0xd0e   : > { %v5625_v29 = vpop.eup %5624 }
 0xd0f   : > { %4731 = vst [vmem:[%s6918_s23 + $0xa8] sm:$0xff] %v4699_v42  ;;  %v3884_v45 = vmul.f32 %v6643_v12, %v3847_v34  ;;  %v4278_v43 = vmul.f32 %v6647_v14, %v4241_v35  ;;  %v3752_v25 = vmul.f32 0.5, %v3720_v48  ;;  %v5627_v1 = vpop.eup %5626  ;;  %v4170_v47 = vadd.f32 1.0, %v5625_v29 }
 0xd10   : > { %v4564_v23 = vadd.f32 1.0, %v5627_v1 }
 0xd11   : > { %v3921_v51 = vadd.f32 %v6645_v13, %v3884_v45  ;;  %v7768_v56 = vadd.f32 %v6651_v16, %v4278_v43  ;;  %v3784_v24 = vadd.f32 1e-06, %v3752_v25  ;;  %v4202_v0 = vmul.f32 %v4170_v47, %v3946_v28 }
 0xd12   : > { %v4596_v8 = vmul.f32 %v4564_v23, %v4340_v3 }
 0xd13   : > { %v3985_v27 = vmul.f32 0.044715, %v3921_v51  ;;  %v4632_v32 = vmul.f32 %v6653_v17, %v4202_v0  ;;  %v4379_v60 = vmul.f32 0.044715, %v7768_v56  ;;  %5634 = vrsqrt.f32 %v3784_v24 }
 0xd14   : > { %v4669_v15 = vmul.f32 %v6655_v18, %v4596_v8 }
 0xd15   : > { %v4017_v37 = vmul.f32 %v3985_v27, %v3921_v51  ;;  %v4411_v36 = vmul.f32 %v4379_v60, %v7768_v56 }
 0xd16   : > { %v4701_v59 = vadd.f32 %v4669_v15, %v4632_v32 }
 0xd17   : > { %v5629_v11 = vpop.eup %5628  ;;  %v4049_v4 = vmul.f32 %v4017_v37, %v3921_v51  ;;  %v4443_v19 = vmul.f32 %v4411_v36, %v7768_v56 }
 0xd18   : > { %v5631_v26 = vpop.eup %5630  ;;  %v4175_v38 = vadd.f32 1.0, %v5629_v11  ;;  %4733 = vst [vmem:[%s6918_s23 + $0xb8] sm:$0xff] %v4701_v59 }
 0xd19   : > { %v5633_v40 = vpop.eup %5632  ;;  %v4569_v39 = vadd.f32 1.0, %v5631_v26  ;;  %v4081_v7 = vadd.f32 %v4049_v4, %v3921_v51  ;;  %v4475_v20 = vadd.f32 %v4443_v19, %v7768_v56 }
 0xd1a   : > { %v4207_v61 = vmul.f32 %v4175_v38, %v3951_v21  ;;  %v3846_v52 = vmul.f32 %v5633_v40, %v7725_v63  ;;  %v4240_v55 = vmul.f32 %v5633_v40, %v7728_v44 }
 0xd1b   : > { %v4601_v5 = vmul.f32 %v4569_v39, %v4345_v9  ;;  %v4113_v22 = vmul.f32 0.7978846, %v4081_v7  ;;  %v4507_v49 = vmul.f32 0.7978846, %v4475_v20 }
 0xd1c   : > { %v4637_v50 = vmul.f32 %v6653_v17, %v4207_v61  ;;  %v3883_v46 = vmul.f32 %v6643_v12, %v3846_v52  ;;  %v4277_v57 = vmul.f32 %v6647_v14, %v4240_v55 }
 0xd1d   : > { %v4674_v41 = vmul.f32 %v6655_v18, %v4601_v5  ;;  %5636 = vtanh.f32 %v4113_v22 }
 0xd1e   : > { %5638 = vtanh.f32 %v4507_v49  ;;  %v3920_v53 = vadd.f32 %v6645_v13, %v3883_v46  ;;  %v4314_v63 = vadd.f32 %v6651_v16, %v4277_v57 }
 0xd1f   : > { %v4706_v33 = vadd.f32 %v4674_v41, %v4637_v50 }
 0xd20   : > { %v3984_v44 = vmul.f32 0.044715, %v3920_v53  ;;  %v4378_v31 = vmul.f32 0.044715, %v4314_v63  ;;  %v5635_v54 = vpop.eup %5634  ;;  %v3952_v26 = vmul.f32 0.5, %v3920_v53  ;;  %v4346_v38 = vmul.f32 0.5, %v4314_v63 }
 0xd21   : > { %4738 = vst [vmem:[%s6918_s23 + $0xe0] sm:$0xff] %v4706_v33  ;;  %v3848_v2 = vmul.f32 %v5635_v54, %v7745_v30  ;;  %v4242_v58 = vmul.f32 %v5635_v54, %v7750_v10  ;;  %v3953_v30 = vmul.f32 0.5, %v3921_v51 }
 0xd22   : > { %v4016_v62 = vmul.f32 %v3984_v44, %v3920_v53  ;;  %v4410_v6 = vmul.f32 %v4378_v31, %v4314_v63 }
 0xd23   : > { %v3885_v35 = vmul.f32 %v6643_v12, %v3848_v2  ;;  %v4279_v48 = vmul.f32 %v6647_v14, %v4242_v58  ;;  %v4347_v14 = vmul.f32 0.5, %v7768_v56 }
 0xd24   : > { %v4048_v42 = vmul.f32 %v4016_v62, %v3920_v53  ;;  %v4442_v34 = vmul.f32 %v4410_v6, %v4314_v63 }
 0xd25   : > { %v3922_v43 = vadd.f32 %v6645_v13, %v3885_v35  ;;  %v4316_v25 = vadd.f32 %v6651_v16, %v4279_v48 }
 0xd26   : > { %v4080_v29 = vadd.f32 %v4048_v42, %v3920_v53  ;;  %v4474_v45 = vadd.f32 %v4442_v34, %v4314_v63 }
 0xd27   : > { %v3986_v47 = vmul.f32 0.044715, %v3922_v43  ;;  %v4380_v3 = vmul.f32 0.044715, %v4316_v25  ;;  %v3954_v55 = vmul.f32 0.5, %v3922_v43  ;;  %v4348_v22 = vmul.f32 0.5, %v4316_v25 }
 0xd28   : > { %v4112_v1 = vmul.f32 0.7978846, %v4080_v29  ;;  %v4506_v28 = vmul.f32 0.7978846, %v4474_v45 }
 0xd29   : > { %v4018_v0 = vmul.f32 %v3986_v47, %v3922_v43  ;;  %v4412_v12 = vmul.f32 %v4380_v3, %v4316_v25 }
 0xd2a   : > { %v5637_v23 = vpop.eup %5636  ;;  %5640 = vtanh.f32 %v4112_v1 }
 0xd2b   : > { %v5639_v10 = vpop.eup %5638  ;;  %v4177_v24 = vadd.f32 1.0, %v5637_v23  ;;  %5642 = vtanh.f32 %v4506_v28  ;;  %v4050_v13 = vmul.f32 %v4018_v0, %v3922_v43  ;;  %v4444_v32 = vmul.f32 %v4412_v12, %v4316_v25 }
 0xd2c   : > { %v4571_v8 = vadd.f32 1.0, %v5639_v10 }
 0xd2d   : > { %v4209_v27 = vmul.f32 %v4177_v24, %v3953_v30  ;;  %v4082_v15 = vadd.f32 %v4050_v13, %v3922_v43  ;;  %v4476_v37 = vadd.f32 %v4444_v32, %v4316_v25 }
 0xd2e   : > { %v4603_v16 = vmul.f32 %v4571_v8, %v4347_v14 }
 0xd2f   : > { %v4639_v60 = vmul.f32 %v6653_v17, %v4209_v27  ;;  %v4114_v36 = vmul.f32 0.7978846, %v4082_v15  ;;  %v4508_v11 = vmul.f32 0.7978846, %v4476_v37 }
 0xd30   : > { %v4676_v51 = vmul.f32 %v6655_v18, %v4603_v16 }
 0xd31   : > { %5644 = vtanh.f32 %v4114_v36 }
 0xd32   : > { %v4708_v59 = vadd.f32 %v4676_v51, %v4639_v60  ;;  %5646 = vtanh.f32 %v4508_v11 }
 0xd34   : > { %4740 = vst [vmem:[%s6918_s23 + $0xf0] sm:$0xff] %v4708_v59 }
 0xd37   : > { %v5641_v4 = vpop.eup %5640 }
 0xd38   : > { %v5643_v56 = vpop.eup %5642  ;;  %v4176_v21 = vadd.f32 1.0, %v5641_v4 }
 0xd39   : > { %v4570_v19 = vadd.f32 1.0, %v5643_v56 }
 0xd3a   : > { %v4208_v40 = vmul.f32 %v4176_v21, %v3952_v26 }
 0xd3b   : > { %v4602_v9 = vmul.f32 %v4570_v19, %v4346_v38 }
 0xd3c   : > { %v4638_v39 = vmul.f32 %v6653_v17, %v4208_v40 }
 0xd3d   : > { %v4675_v7 = vmul.f32 %v6655_v18, %v4602_v9 }
 0xd3e   : > { %v5645_v20 = vpop.eup %5644 }
 0xd3f   : > { %v4707_v61 = vadd.f32 %v4675_v7, %v4638_v39  ;;  %v5647_v52 = vpop.eup %5646  ;;  %v4178_v5 = vadd.f32 1.0, %v5645_v20 }
 0xd40   : > { %v4572_v50 = vadd.f32 1.0, %v5647_v52 }
 0xd41   : > { %4739 = vst [vmem:[%s6918_s23 + $0xe8] sm:$0xff] %v4707_v61  ;;  %v4210_v49 = vmul.f32 %v4178_v5, %v3954_v55 }
 0xd42   : > { %v4604_v46 = vmul.f32 %v4572_v50, %v4348_v22 }
 0xd43   : > { %v4640_v57 = vmul.f32 %v6653_v17, %v4210_v49 }
 0xd44   : > { %v4677_v41 = vmul.f32 %v6655_v18, %v4604_v46 }
 0xd46   : > { %v4709_v53 = vadd.f32 %v4677_v41, %v4640_v57 }
 0xd48   : > { %4741 = vst [vmem:[%s6918_s23 + $0xf8] sm:$0xff] %v4709_v53 }
 0xd49   : > { %5819 = shalt.err (!%p5816_p2)
}
 0xd4a   : > { %s5820_s23 = scalar_lea.hbm %s7806_s4, 4096  ;;  %s5824_s6 = scalar_lea.hbm %s7982_s5, 8192 }
 0xd4b   : > { %p5821_p10 = scmp.ne.s32.totalorder %s7806_s4, %s5820_s23  ;;  %p5825_p6 = scmp.lt.s32.totalorder %s7806_s4, %s7982_s5 }
 0xd4c   : > { %p5826_p7 = scmp.lt.s32.totalorder %s5824_s6, %s5820_s23 }
 0xd4d   : > { %p5822_p12 = pnand %p5821_p10, %p7981_p4 }
 0xd4e   : > { %p5827_p5 = por %p5826_p7, %p5825_p6 }
 0xd4f   : > { %p5823_p1 = pneg %p5822_p12 }
 0xd51   : > { %p5828_p9 = pnand %p5827_p5, %p5823_p1 }
 0xd53   : > { %5831 = shalt.err (!%p5828_p9)
}
 0xd54   : > { %s5935_s3 = smov 1024   ;;  %s7983_s13 = smov 64  }
 0xd55   : > { %5311 = dma.vmem_to_hbm [thread:$0]  (%p7981_p4), %s7808_s8, 4096, %s7806_s4, %s4743_s0, %s5935_s3, %s5935_s3, %s7983_s13  }
 0xd56 PF: > { %s4788_s18 = sand.u32 1, %s5874_s7   ;;  %p7984_p13 = scmp.ne.s32.totalorder %s7928_s1, 0 }
 0xd57   : > { %p7985_p3 = scmp.ge.s32.totalorder %s5886_s15, 2  ;;  %s4789_s26 = scalar_lea.sflag [#allocation4], %s4788_s18 }
 0xd59   : > { %p5333_p8 = pnand %p7985_p3, %p7984_p13 }
 0xd5b   : > { %p5334_p0 = pneg %p5333_p8 }
 0xd5d   : > { %5865 = dma.done.wait (%p5334_p0), %s4789_s26, 4096  }
 0xd5e   : > { %5867 = vsyncadd (%p5334_p0), %s4789_s26, 4294963200  ;;  %s4798_s20 = scalar_lea.sflag [#allocation13], %s4788_s18 }
 0xd5f   : > { %5869 = dma.done.wait (%p5334_p0), %s4798_s20, 16  }
 0xd60   : > { %5871 = vsyncadd (%p5334_p0), %s4798_s20, 4294967280  ;;  %s7986_s19 = sld [smem:[#allocation46_spill]]  ;;  %p86_p4 = scmp.ge.s32.totalorder %s6214_s28, 4  }
 0xd61   : > { %s7987_s7 = smov %s5878_s10  ;;  %s7988_s10 = smov %s5882_s11 }
 0xd62   : > { %s7990_s15 = smov %s6214_s28  ;;  %88 = sbr.rel (!%p86_p4) target bundleno = 74 (0x4a), region = 266 }
 0xd66   : > { %s7989_s11 = smov %s7986_s19 }
 0xd67   :  { %4802 = vsyncpa [#allocation3], 1 }
 0xd68   :  { %4804 = vsyncpa [#allocation3 + $0x1], 1 }
 0xd69   :  { %4805 = vsyncpa [#allocation6], 1 }
 0xd6a   :  { %4807 = vsyncpa [#allocation6 + $0x1], 1 }
 0xd6b   :  { %4808 = vsyncpa [#allocation9], 1 }
 0xd6c   :  { %4809 = vsyncpa [#allocation4], 1 }
 0xd6d   :  { %4811 = vsyncpa [#allocation4 + $0x1], 1 }
 0xd6e   :  { %4812 = vsyncpa [#allocation13], 1 }
 0xd6f   :  { %4814 = vsyncpa [#allocation13 + $0x1], 1 }

</bundles_post_ra>
